<compile_context>
chip_gen: v5e
topology: v5e:2x2
jax: 0.10.0
libtpu: 0.0.40
codegen_flags: <defaults>
</compile_context>

<pallas_src>
import jax
import jax.numpy as jnp
from jax import lax
from jax.experimental import pallas as pl
from jax.experimental.pallas import tpu as pltpu

_LANES = 128


def _round_up(v, m):
    return ((v + m - 1) // m) * m


# --------------------------------------------------------------------------------
# Fused kernel: one batch element per grid step.
# --------------------------------------------------------------------------------
def _decoder_block_kernel(x_ref, skip_ref, w1_ref, s1_ref, b1_ref,
                          w2_ref, s2_ref, b2_ref, o_ref,
                          zin_ref, z2_ref):
    # x_ref    : (1, H, OW, Cx)    low-res input, columns already 2x repeated (f32)
    # skip_ref : (1, OH, OW, Cs)   skip connection, NHWC (f32)
    # w1_ref   : (9, Cin, Cop)     conv1 taps, packed [x-chans | skip-chans] (bf16)
    # s1/b1    : (1, Cop)          folded BN1 scale/bias (f32, zero-padded)
    # w2_ref   : (9, Cop, Cop)     conv2 taps (bf16)
    # s2/b2    : (1, Cop)          folded BN2 scale/bias
    # o_ref    : (1, OH, OW, Cout) output (only the real Cout channels)
    # zin_ref  : (OH+2, OW+2, Cin) f32 VMEM   halo'd concat(x_up, skip)
    # z2_ref   : (OH+2, OW+2, Cop) f32 VMEM   halo'd conv1 output
    H = x_ref.shape[1]
    Cx = x_ref.shape[3]
    OH, OW, Cout = o_ref.shape[1], o_ref.shape[2], o_ref.shape[3]
    Cin = zin_ref.shape[2]
    Cop = z2_ref.shape[2]
    M = OH * OW
    cdt = w1_ref.dtype                      # bf16 compute dtype for the MXU
    f32 = jnp.float32

    # ---- stage 0: zero ONLY the 1-px halo border (interior fully overwritten
    # below -> no full-buffer zero fills; done per step so it is megacore-safe). ---
    zin_ref[0:1, :, :] = jnp.zeros((1, OW + 2, Cin), f32)
    zin_ref[OH + 1:OH + 2, :, :] = jnp.zeros((1, OW + 2, Cin), f32)
    zin_ref[:, 0:1, :] = jnp.zeros((OH + 2, 1, Cin), f32)
    zin_ref[:, OW + 1:OW + 2, :] = jnp.zeros((OH + 2, 1, Cin), f32)

    # ---- stage 1: concat(x_up, skip) into ONE halo buffer (concat never in HBM).
    # Row (H) doubling of the nearest upsample is done here: a major-dim repeat is
    # a layout no-op reshape.  Column doubling was done on the low-res input in the
    # wrapper.
    xl = x_ref[0]                                                   # (H, OW, Cx)
    x_up = jnp.broadcast_to(xl[:, None, :, :],
                            (H, 2, OW, Cx)).reshape(OH, OW, Cx)     # (OH, OW, Cx)
    zin_ref[1:OH + 1, 1:OW + 1, 0:Cx] = x_up
    zin_ref[1:OH + 1, 1:OW + 1, Cx:Cin] = skip_ref[0]

    s1 = s1_ref[...]                                                # (1, Cop)
    b1 = b1_ref[...]
    s2 = s2_ref[...]
    b2 = b2_ref[...]

    # ---- conv1 (3x3, pad=1) + BN(eval) + ReLU -----------------------------------
    # torch.cat([x_up, skip], dim=1) + conv1 == one K=(Cx+Cs) contraction per tap.
    # Sum over 9 taps in registers; single write of the result (no scratch RMW).
    acc1 = None
    for dx in range(3):
        # One sublane (W) shift per dx, reused by the 3 dy taps; cast once.
        slab = zin_ref[:, dx:dx + OW, :].astype(cdt)                # (OH+2, OW, Cin)
        for dy in range(3):
            lhs = slab[dy:dy + OH].reshape(M, Cin)                  # dense 2-D matmul
            p = lax.dot_general(lhs, w1_ref[dy * 3 + dx],
                                dimension_numbers=(((1,), (0,)), ((), ())),
                                preferred_element_type=jnp.float32)
            acc1 = p if acc1 is None else acc1 + p
    h1 = jnp.maximum(acc1 * s1 + b1, 0.0)                           # (M, Cop) f32

    # ---- conv2 (3x3, pad=1) + BN(eval) + ReLU -----------------------------------
    # conv1's output never leaves VMEM: re-halo it and consume it immediately.
    z2_ref[0:1, :, :] = jnp.zeros((1, OW + 2, Cop), f32)
    z2_ref[OH + 1:OH + 2, :, :] = jnp.zeros((1, OW + 2, Cop), f32)
    z2_ref[:, 0:1, :] = jnp.zeros((OH + 2, 1, Cop), f32)
    z2_ref[:, OW + 1:OW + 2, :] = jnp.zeros((OH + 2, 1, Cop), f32)
    z2_ref[1:OH + 1, 1:OW + 1, :] = h1.reshape(OH, OW, Cop)

    acc2 = None
    for dx in range(3):
        slab = z2_ref[:, dx:dx + OW, :].astype(cdt)                 # (OH+2, OW, Cop)
        for dy in range(3):
            lhs = slab[dy:dy + OH].reshape(M, Cop)                  # dense K=N=128
            p = lax.dot_general(lhs, w2_ref[dy * 3 + dx],
                                dimension_numbers=(((1,), (0,)), ((), ())),
                                preferred_element_type=jnp.float32)
            acc2 = p if acc2 is None else acc2 + p
    h2 = jnp.maximum(acc2 * s2 + b2, 0.0)                           # (M, Cop) f32

    # Only the Cout real channels go back to HBM (padded lanes are exact zeros).
    o_ref[0] = h2.reshape(OH, OW, Cop)[:, :, :Cout].astype(o_ref.dtype)


def _fused_decoder_call(xw, skip, w1, s1, b1, w2, s2, b2, cout):
    N, H, OW, Cx = xw.shape
    OH = 2 * H
    Cs = skip.shape[-1]
    Cin = w1.shape[1]
    Cop = w1.shape[-1]
    assert Cin == Cx + Cs
    assert skip.shape == (N, OH, OW, Cs)

    return pl.pallas_call(
        _decoder_block_kernel,
        out_shape=jax.ShapeDtypeStruct((N, OH, OW, cout), xw.dtype),
        grid_spec=pltpu.PrefetchScalarGridSpec(
            num_scalar_prefetch=0,
            grid=(N,),
            in_specs=[
                pl.BlockSpec((1, H, OW, Cx), lambda n: (n, 0, 0, 0)),
                pl.BlockSpec((1, OH, OW, Cs), lambda n: (n, 0, 0, 0)),
                pl.BlockSpec((9, Cin, Cop), lambda n: (0, 0, 0)),
                pl.BlockSpec((1, Cop), lambda n: (0, 0)),
                pl.BlockSpec((1, Cop), lambda n: (0, 0)),
                pl.BlockSpec((9, Cop, Cop), lambda n: (0, 0, 0)),
                pl.BlockSpec((1, Cop), lambda n: (0, 0)),
                pl.BlockSpec((1, Cop), lambda n: (0, 0)),
            ],
            out_specs=pl.BlockSpec((1, OH, OW, cout), lambda n: (n, 0, 0, 0)),
            scratch_shapes=[
                pltpu.VMEM((OH + 2, OW + 2, Cin), jnp.float32),   # halo'd concat in
                pltpu.VMEM((OH + 2, OW + 2, Cop), jnp.float32),   # halo'd conv1 out
            ],
        ),
        compiler_params=pltpu.CompilerParams(
            dimension_semantics=("parallel",),
            vmem_limit_bytes=32 * 1024 * 1024,
        ),
    )(xw, skip, w1, s1, b1, w2, s2, b2)


# --------------------------------------------------------------------------------
# Parameter handling (BatchNorm eval-mode folding + padded weight packing).
# --------------------------------------------------------------------------------
def _fold_bn(gamma, beta, running_mean, running_var, eps=1e-5):
    scale = gamma / jnp.sqrt(running_var + eps)
    bias = beta - running_mean * scale
    return scale, bias


def init_decoder_block_params(key, in_channels, skip_channels, out_channels):
    """Deterministic synthetic parameters (Conv2dReLU with use_batchnorm=True)."""
    c_in1 = in_channels + skip_channels
    k1, k2 = jax.random.split(key, 2)
    w1 = (jax.random.normal(k1, (3, 3, c_in1, out_channels), jnp.float32)
          * (1.0 / jnp.sqrt(9.0 * c_in1)))                       # HWIO
    w2 = (jax.random.normal(k2, (3, 3, out_channels, out_channels), jnp.float32)
          * (1.0 / jnp.sqrt(9.0 * out_channels)))
    g1 = 1.0 + 0.05 * jnp.arange(out_channels, dtype=jnp.float32)
    be1 = 0.01 * jnp.arange(out_channels, dtype=jnp.float32)
    m1 = 0.02 * jnp.arange(out_channels, dtype=jnp.float32)
    v1 = 1.0 + 0.03 * jnp.arange(out_channels, dtype=jnp.float32)
    g2 = 1.0 - 0.02 * jnp.arange(out_channels, dtype=jnp.float32)
    be2 = -0.01 * jnp.arange(out_channels, dtype=jnp.float32)
    m2 = -0.015 * jnp.arange(out_channels, dtype=jnp.float32)
    v2 = 1.0 + 0.01 * jnp.arange(out_channels, dtype=jnp.float32)
    s1, b1 = _fold_bn(g1, be1, m1, v1)
    s2, b2 = _fold_bn(g2, be2, m2, v2)
    return {"w1": w1, "s1": s1, "b1": b1, "w2": w2, "s2": s2, "b2": b2}


def _prepare_fused(params, cx, cs, cout, compute_dtype=jnp.bfloat16):
    """Pack conv1 weights as one (9, Cx+Cs, Cop) tensor (single dot per tap),
    lane-pad output channels to 128, cast to bf16, zero-pad BN scale/bias."""
    cop = _round_up(cout, _LANES)
    cin = cx + cs
    w1 = params["w1"].reshape(9, cin, cout)
    w2 = params["w2"].reshape(9, cout, cout)
    w1p = jnp.zeros((9, cin, cop), compute_dtype).at[:, :, :cout].set(
        w1.astype(compute_dtype))
    w2p = jnp.zeros((9, cop, cop), compute_dtype).at[:, :cout, :cout].set(
        w2.astype(compute_dtype))

    def pad_vec(v):
        return jnp.zeros((1, cop), jnp.float32).at[0, :cout].set(
            v.astype(jnp.float32))

    return (w1p, w2p, pad_vec(params["s1"]), pad_vec(params["b1"]),
            pad_vec(params["s2"]), pad_vec(params["b2"]))


# --------------------------------------------------------------------------------
# Forward passes.
# --------------------------------------------------------------------------------
def decoder_block_forward_nhwc(x_nhwc, skip_nhwc, params,
                               compute_dtype=jnp.bfloat16):
    """TPU-native (NHWC) DecoderBlock forward.  attention1/2 are Identity
    (attention_type=None); BatchNorm runs in eval mode (folded scale/bias)."""
    N, H, W, Cx = x_nhwc.shape
    OH, OW = 2 * H, 2 * W
    assert OW % 8 == 0, "upsampled width must be a multiple of 8"

    # Only the W half of the 2x nearest upsample happens host-side (on the low-res
    # input); the H half is folded into the kernel's staging copy.
    xw = jnp.repeat(x_nhwc, 2, axis=2)                     # (N, H, 2W, Cx)

    if skip_nhwc is None:
        # Keep the fused kernel uniform: one dummy zero skip channel with zero
        # weights contributes nothing.
        skip_nhwc = jnp.zeros((N, OH, OW, 1), x_nhwc.dtype)
        params = dict(params)
        w1 = params["w1"]
        params["w1"] = jnp.concatenate(
            [w1, jnp.zeros((3, 3, 1, w1.shape[-1]), w1.dtype)], axis=2)
    cs = skip_nhwc.shape[-1]
    cout = params["w2"].shape[-1]

    w1p, w2p, s1, b1, s2, b2 = _prepare_fused(params, Cx, cs, cout, compute_dtype)
    return _fused_decoder_call(xw, skip_nhwc, w1p, s1, b1, w2p, s2, b2, cout)


def decoder_block_forward(x_nchw, skip_nchw, params):
    """PyTorch-layout compatibility wrapper (NCHW in / NCHW out).  A full NHWC
    model would call decoder_block_forward_nhwc directly and skip the transposes."""
    x = jnp.transpose(x_nchw, (0, 2, 3, 1))
    skip = None if skip_nchw is None else jnp.transpose(skip_nchw, (0, 2, 3, 1))
    y = decoder_block_forward_nhwc(x, skip, params)
    return jnp.transpose(y, (0, 3, 1, 2))


# --------------------------------------------------------------------------------
# Pure-JAX reference (f32) for correctness checking.
# --------------------------------------------------------------------------------
def _reference_forward(x_nchw, skip_nchw, params):
    x = jnp.repeat(jnp.repeat(x_nchw, 2, axis=2), 2, axis=3)
    if skip_nchw is not None:
        x = jnp.concatenate([x, skip_nchw], axis=1)
    xh = jnp.transpose(x, (0, 2, 3, 1))

    def conv_bn_relu(v, w, s, b):
        y = lax.conv_general_dilated(
            v, w, window_strides=(1, 1), padding="SAME",
            dimension_numbers=("NHWC", "HWIO", "NHWC"))
        return jnp.maximum(y * s + b, 0.0)

    y = conv_bn_relu(xh, params["w1"], params["s1"], params["b1"])
    y = conv_bn_relu(y, params["w2"], params["s2"], params["b2"])
    return jnp.transpose(y, (0, 3, 1, 2))


if __name__ == "__main__":
    key = jax.random.PRNGKey(0)
    kx, ks, kp = jax.random.split(key, 3)

    batch, in_channels, skip_channels, out_channels = 2, 4, 4, 8
    h, w = 8, 8                                        # upsampled to 16x16

    x = jax.random.normal(kx, (batch, in_channels, h, w), jnp.float32)
    skip = jax.random.normal(ks, (batch, skip_channels, 2 * h, 2 * w), jnp.float32)
    params = init_decoder_block_params(kp, in_channels, skip_channels, out_channels)

    fwd = jax.jit(decoder_block_forward)
    out = jax.block_until_ready(fwd(x, skip, params))
    assert out.shape == (batch, out_channels, 2 * h, 2 * w), out.shape
    assert bool(jnp.all(out >= 0.0))                   # ReLU output

    ref = jax.block_until_ready(_reference_forward(x, skip, params))
    max_err = float(jnp.max(jnp.abs(out - ref)))
    assert max_err < 0.3, f"mismatch vs reference: max_err={max_err}"

    print("KERNEL_OK")
</pallas_src>

<mosaic_0001>
module attributes {stable_mosaic.version = 11 : i64} {
  func.func @_decoder_block_kernel(%arg0: i32, %arg1: memref<1x8x16x4xf32, #tpu.memory_space<vmem>>, %arg2: memref<1x16x16x4xf32, #tpu.memory_space<vmem>>, %arg3: memref<9x8x128xbf16, #tpu.memory_space<vmem>>, %arg4: memref<1x128xf32, #tpu.memory_space<vmem>>, %arg5: memref<1x128xf32, #tpu.memory_space<vmem>>, %arg6: memref<9x128x128xbf16, #tpu.memory_space<vmem>>, %arg7: memref<1x128xf32, #tpu.memory_space<vmem>>, %arg8: memref<1x128xf32, #tpu.memory_space<vmem>>, %arg9: memref<1x16x16x8xf32, #tpu.memory_space<vmem>>, %arg10: memref<18x18x8xf32, #tpu.memory_space<vmem>>, %arg11: memref<18x18x128xf32, #tpu.memory_space<vmem>>) attributes {dimension_semantics = [#tpu.dimension_semantics<parallel>], iteration_bounds = array<i64: 2>, scalar_prefetch = 0 : i64, scratch_operands = 2 : i64, tpu.core_type = #tpu.core_type<tc>, window_params = [{transform_indices = @transform_0, window_bounds = array<i64: 1, 8, 16, 4>}, {transform_indices = @transform_1, window_bounds = array<i64: 1, 16, 16, 4>}, {pipeline_mode = #tpu.pipeline_mode<synchronous>, transform_indices = @transform_2, window_bounds = array<i64: 9, 8, 128>}, {pipeline_mode = #tpu.pipeline_mode<synchronous>, transform_indices = @transform_3, window_bounds = array<i64: 1, 128>}, {pipeline_mode = #tpu.pipeline_mode<synchronous>, transform_indices = @transform_4, window_bounds = array<i64: 1, 128>}, {pipeline_mode = #tpu.pipeline_mode<synchronous>, transform_indices = @transform_5, window_bounds = array<i64: 9, 128, 128>}, {pipeline_mode = #tpu.pipeline_mode<synchronous>, transform_indices = @transform_6, window_bounds = array<i64: 1, 128>}, {pipeline_mode = #tpu.pipeline_mode<synchronous>, transform_indices = @transform_7, window_bounds = array<i64: 1, 128>}, {transform_indices = @transform_8, window_bounds = array<i64: 1, 16, 16, 8>}]} {
    %cst = arith.constant 0.000000e+00 : f32
    %0 = vector.broadcast %cst : f32 to vector<1x18x8xf32>
    %c0 = arith.constant 0 : index
    %c0_0 = arith.constant 0 : index
    %c0_1 = arith.constant 0 : index
    %1 = vector.load %arg10[%c0, %c0_0, %c0_1] : memref<18x18x8xf32, #tpu.memory_space<vmem>>, vector<1x18x8xf32>
    tpu.vector_store %arg10[%c0, %c0_0, %c0_1], %0 {strides = array<i32>} : memref<18x18x8xf32, #tpu.memory_space<vmem>>, vector<1x18x8xf32>,
    %cst_2 = arith.constant 0.000000e+00 : f32
    %2 = vector.broadcast %cst_2 : f32 to vector<1x18x8xf32>
    %c17 = arith.constant 17 : index
    %c0_3 = arith.constant 0 : index
    %c0_4 = arith.constant 0 : index
    %3 = vector.load %arg10[%c17, %c0_3, %c0_4] : memref<18x18x8xf32, #tpu.memory_space<vmem>>, vector<1x18x8xf32>
    tpu.vector_store %arg10[%c17, %c0_3, %c0_4], %2 {strides = array<i32>} : memref<18x18x8xf32, #tpu.memory_space<vmem>>, vector<1x18x8xf32>,
    %cst_5 = arith.constant 0.000000e+00 : f32
    %4 = vector.broadcast %cst_5 : f32 to vector<18x1x8xf32>
    %c0_6 = arith.constant 0 : index
    %c0_7 = arith.constant 0 : index
    %c0_8 = arith.constant 0 : index
    %5 = vector.load %arg10[%c0_6, %c0_7, %c0_8] : memref<18x18x8xf32, #tpu.memory_space<vmem>>, vector<18x1x8xf32>
    tpu.vector_store %arg10[%c0_6, %c0_7, %c0_8], %4 {strides = array<i32>} : memref<18x18x8xf32, #tpu.memory_space<vmem>>, vector<18x1x8xf32>,
    %cst_9 = arith.constant 0.000000e+00 : f32
    %6 = vector.broadcast %cst_9 : f32 to vector<18x1x8xf32>
    %c0_10 = arith.constant 0 : index
    %c17_11 = arith.constant 17 : index
    %c0_12 = arith.constant 0 : index
    %7 = vector.load %arg10[%c0_10, %c17_11, %c0_12] : memref<18x18x8xf32, #tpu.memory_space<vmem>>, vector<18x1x8xf32>
    tpu.vector_store %arg10[%c0_10, %c17_11, %c0_12], %6 {strides = array<i32>} : memref<18x18x8xf32, #tpu.memory_space<vmem>>, vector<18x1x8xf32>,
    %c0_13 = arith.constant 0 : index
    %c0_14 = arith.constant 0 : index
    %c0_15 = arith.constant 0 : index
    %c0_16 = arith.constant 0 : index
    %8 = vector.load %arg1[%c0_13, %c0_14, %c0_15, %c0_16] : memref<1x8x16x4xf32, #tpu.memory_space<vmem>>, vector<1x8x16x4xf32>
    %9 = vector.shape_cast %8 : vector<1x8x16x4xf32> to vector<8x16x4xf32>
    %10 = vector.shape_cast %9 : vector<8x16x4xf32> to vector<8x1x16x4xf32>
    %11 = vector.shape_cast %10 : vector<8x1x16x4xf32> to vector<8x1x16x4xf32>
    %12 = vector.broadcast %11 : vector<8x1x16x4xf32> to vector<8x2x16x4xf32>
    %13 = vector.shape_cast %12 : vector<8x2x16x4xf32> to vector<16x16x4xf32>
    %c1 = arith.constant 1 : index
    %c1_17 = arith.constant 1 : index
    %c0_18 = arith.constant 0 : index
    %14 = vector.load %arg10[%c1, %c1_17, %c0_18] : memref<18x18x8xf32, #tpu.memory_space<vmem>>, vector<16x16x4xf32>
    tpu.vector_store %arg10[%c1, %c1_17, %c0_18], %13 {strides = array<i32>} : memref<18x18x8xf32, #tpu.memory_space<vmem>>, vector<16x16x4xf32>,
    %c0_19 = arith.constant 0 : index
    %c0_20 = arith.constant 0 : index
    %c0_21 = arith.constant 0 : index
    %c0_22 = arith.constant 0 : index
    %15 = vector.load %arg2[%c0_19, %c0_20, %c0_21, %c0_22] : memref<1x16x16x4xf32, #tpu.memory_space<vmem>>, vector<1x16x16x4xf32>
    %16 = vector.shape_cast %15 : vector<1x16x16x4xf32> to vector<16x16x4xf32>
    %c1_23 = arith.constant 1 : index
    %c1_24 = arith.constant 1 : index
    %c4 = arith.constant 4 : index
    %17 = vector.load %arg10[%c1_23, %c1_24, %c4] : memref<18x18x8xf32, #tpu.memory_space<vmem>>, vector<16x16x4xf32>
    tpu.vector_store %arg10[%c1_23, %c1_24, %c4], %16 {strides = array<i32>} : memref<18x18x8xf32, #tpu.memory_space<vmem>>, vector<16x16x4xf32>,
    %c0_25 = arith.constant 0 : index
    %c0_26 = arith.constant 0 : index
    %18 = vector.load %arg4[%c0_25, %c0_26] : memref<1x128xf32, #tpu.memory_space<vmem>>, vector<1x128xf32>
    %c0_27 = arith.constant 0 : index
    %c0_28 = arith.constant 0 : index
    %19 = vector.load %arg5[%c0_27, %c0_28] : memref<1x128xf32, #tpu.memory_space<vmem>>, vector<1x128xf32>
    %c0_29 = arith.constant 0 : index
    %c0_30 = arith.constant 0 : index
    %20 = vector.load %arg7[%c0_29, %c0_30] : memref<1x128xf32, #tpu.memory_space<vmem>>, vector<1x128xf32>
    %c0_31 = arith.constant 0 : index
    %c0_32 = arith.constant 0 : index
    %21 = vector.load %arg8[%c0_31, %c0_32] : memref<1x128xf32, #tpu.memory_space<vmem>>, vector<1x128xf32>
    %c0_33 = arith.constant 0 : index
    %c0_34 = arith.constant 0 : index
    %c0_35 = arith.constant 0 : index
    %22 = vector.load %arg10[%c0_33, %c0_34, %c0_35] : memref<18x18x8xf32, #tpu.memory_space<vmem>>, vector<18x16x8xf32>
    %23 = arith.truncf %22 : vector<18x16x8xf32> to vector<18x16x8xbf16>
    %24 = vector.extract_strided_slice %23 {offsets = [0, 0, 0], sizes = [16, 16, 8], strides = [1, 1, 1]} : vector<18x16x8xbf16> to vector<16x16x8xbf16>
    %25 = vector.shape_cast %24 : vector<16x16x8xbf16> to vector<256x8xbf16>
    %c0_36 = arith.constant 0 : index
    %c0_37 = arith.constant 0 : index
    %c0_38 = arith.constant 0 : index
    %26 = vector.load %arg3[%c0_36, %c0_37, %c0_38] : memref<9x8x128xbf16, #tpu.memory_space<vmem>>, vector<1x8x128xbf16>
    %27 = vector.shape_cast %26 : vector<1x8x128xbf16> to vector<8x128xbf16>
    %cst_39 = arith.constant dense<0.000000e+00> : vector<256x128xf32>
    %28 = tpu.matmul %25, %27, %cst_39 {dimension_numbers = #tpu.dot_dimension_numbers<[1], [0], [0], [1], [0, 0, 1, 1], [], []>} : vector<256x8xbf16>, vector<8x128xbf16>, vector<256x128xf32> -> vector<256x128xf32>
    %29 = vector.extract_strided_slice %23 {offsets = [1, 0, 0], sizes = [16, 16, 8], strides = [1, 1, 1]} : vector<18x16x8xbf16> to vector<16x16x8xbf16>
    %30 = vector.shape_cast %29 : vector<16x16x8xbf16> to vector<256x8xbf16>
    %c3 = arith.constant 3 : index
    %c0_40 = arith.constant 0 : index
    %c0_41 = arith.constant 0 : index
    %31 = vector.load %arg3[%c3, %c0_40, %c0_41] : memref<9x8x128xbf16, #tpu.memory_space<vmem>>, vector<1x8x128xbf16>
    %32 = vector.shape_cast %31 : vector<1x8x128xbf16> to vector<8x128xbf16>
    %cst_42 = arith.constant dense<0.000000e+00> : vector<256x128xf32>
    %33 = tpu.matmul %30, %32, %cst_42 {dimension_numbers = #tpu.dot_dimension_numbers<[1], [0], [0], [1], [0, 0, 1, 1], [], []>} : vector<256x8xbf16>, vector<8x128xbf16>, vector<256x128xf32> -> vector<256x128xf32>
    %34 = arith.addf %28, %33 : vector<256x128xf32>
    %35 = vector.extract_strided_slice %23 {offsets = [2, 0, 0], sizes = [16, 16, 8], strides = [1, 1, 1]} : vector<18x16x8xbf16> to vector<16x16x8xbf16>
    %36 = vector.shape_cast %35 : vector<16x16x8xbf16> to vector<256x8xbf16>
    %c6 = arith.constant 6 : index
    %c0_43 = arith.constant 0 : index
    %c0_44 = arith.constant 0 : index
    %37 = vector.load %arg3[%c6, %c0_43, %c0_44] : memref<9x8x128xbf16, #tpu.memory_space<vmem>>, vector<1x8x128xbf16>
    %38 = vector.shape_cast %37 : vector<1x8x128xbf16> to vector<8x128xbf16>
    %cst_45 = arith.constant dense<0.000000e+00> : vector<256x128xf32>
    %39 = tpu.matmul %36, %38, %cst_45 {dimension_numbers = #tpu.dot_dimension_numbers<[1], [0], [0], [1], [0, 0, 1, 1], [], []>} : vector<256x8xbf16>, vector<8x128xbf16>, vector<256x128xf32> -> vector<256x128xf32>
    %40 = arith.addf %34, %39 : vector<256x128xf32>
    %c0_46 = arith.constant 0 : index
    %c1_47 = arith.constant 1 : index
    %c0_48 = arith.constant 0 : index
    %41 = vector.load %arg10[%c0_46, %c1_47, %c0_48] : memref<18x18x8xf32, #tpu.memory_space<vmem>>, vector<18x16x8xf32>
    %42 = arith.truncf %41 : vector<18x16x8xf32> to vector<18x16x8xbf16>
    %43 = vector.extract_strided_slice %42 {offsets = [0, 0, 0], sizes = [16, 16, 8], strides = [1, 1, 1]} : vector<18x16x8xbf16> to vector<16x16x8xbf16>
    %44 = vector.shape_cast %43 : vector<16x16x8xbf16> to vector<256x8xbf16>
    %c1_49 = arith.constant 1 : index
    %c0_50 = arith.constant 0 : index
    %c0_51 = arith.constant 0 : index
    %45 = vector.load %arg3[%c1_49, %c0_50, %c0_51] : memref<9x8x128xbf16, #tpu.memory_space<vmem>>, vector<1x8x128xbf16>
    %46 = vector.shape_cast %45 : vector<1x8x128xbf16> to vector<8x128xbf16>
    %cst_52 = arith.constant dense<0.000000e+00> : vector<256x128xf32>
    %47 = tpu.matmul %44, %46, %cst_52 {dimension_numbers = #tpu.dot_dimension_numbers<[1], [0], [0], [1], [0, 0, 1, 1], [], []>} : vector<256x8xbf16>, vector<8x128xbf16>, vector<256x128xf32> -> vector<256x128xf32>
    %48 = arith.addf %40, %47 : vector<256x128xf32>
    %49 = vector.extract_strided_slice %42 {offsets = [1, 0, 0], sizes = [16, 16, 8], strides = [1, 1, 1]} : vector<18x16x8xbf16> to vector<16x16x8xbf16>
    %50 = vector.shape_cast %49 : vector<16x16x8xbf16> to vector<256x8xbf16>
    %c4_53 = arith.constant 4 : index
    %c0_54 = arith.constant 0 : index
    %c0_55 = arith.constant 0 : index
    %51 = vector.load %arg3[%c4_53, %c0_54, %c0_55] : memref<9x8x128xbf16, #tpu.memory_space<vmem>>, vector<1x8x128xbf16>
    %52 = vector.shape_cast %51 : vector<1x8x128xbf16> to vector<8x128xbf16>
    %cst_56 = arith.constant dense<0.000000e+00> : vector<256x128xf32>
    %53 = tpu.matmul %50, %52, %cst_56 {dimension_numbers = #tpu.dot_dimension_numbers<[1], [0], [0], [1], [0, 0, 1, 1], [], []>} : vector<256x8xbf16>, vector<8x128xbf16>, vector<256x128xf32> -> vector<256x128xf32>
    %54 = arith.addf %48, %53 : vector<256x128xf32>
    %55 = vector.extract_strided_slice %42 {offsets = [2, 0, 0], sizes = [16, 16, 8], strides = [1, 1, 1]} : vector<18x16x8xbf16> to vector<16x16x8xbf16>
    %56 = vector.shape_cast %55 : vector<16x16x8xbf16> to vector<256x8xbf16>
    %c7 = arith.constant 7 : index
    %c0_57 = arith.constant 0 : index
    %c0_58 = arith.constant 0 : index
    %57 = vector.load %arg3[%c7, %c0_57, %c0_58] : memref<9x8x128xbf16, #tpu.memory_space<vmem>>, vector<1x8x128xbf16>
    %58 = vector.shape_cast %57 : vector<1x8x128xbf16> to vector<8x128xbf16>
    %cst_59 = arith.constant dense<0.000000e+00> : vector<256x128xf32>
    %59 = tpu.matmul %56, %58, %cst_59 {dimension_numbers = #tpu.dot_dimension_numbers<[1], [0], [0], [1], [0, 0, 1, 1], [], []>} : vector<256x8xbf16>, vector<8x128xbf16>, vector<256x128xf32> -> vector<256x128xf32>
    %60 = arith.addf %54, %59 : vector<256x128xf32>
    %c0_60 = arith.constant 0 : index
    %c2 = arith.constant 2 : index
    %c0_61 = arith.constant 0 : index
    %61 = vector.load %arg10[%c0_60, %c2, %c0_61] : memref<18x18x8xf32, #tpu.memory_space<vmem>>, vector<18x16x8xf32>
    %62 = arith.truncf %61 : vector<18x16x8xf32> to vector<18x16x8xbf16>
    %63 = vector.extract_strided_slice %62 {offsets = [0, 0, 0], sizes = [16, 16, 8], strides = [1, 1, 1]} : vector<18x16x8xbf16> to vector<16x16x8xbf16>
    %64 = vector.shape_cast %63 : vector<16x16x8xbf16> to vector<256x8xbf16>
    %c2_62 = arith.constant 2 : index
    %c0_63 = arith.constant 0 : index
    %c0_64 = arith.constant 0 : index
    %65 = vector.load %arg3[%c2_62, %c0_63, %c0_64] : memref<9x8x128xbf16, #tpu.memory_space<vmem>>, vector<1x8x128xbf16>
    %66 = vector.shape_cast %65 : vector<1x8x128xbf16> to vector<8x128xbf16>
    %cst_65 = arith.constant dense<0.000000e+00> : vector<256x128xf32>
    %67 = tpu.matmul %64, %66, %cst_65 {dimension_numbers = #tpu.dot_dimension_numbers<[1], [0], [0], [1], [0, 0, 1, 1], [], []>} : vector<256x8xbf16>, vector<8x128xbf16>, vector<256x128xf32> -> vector<256x128xf32>
    %68 = arith.addf %60, %67 : vector<256x128xf32>
    %69 = vector.extract_strided_slice %62 {offsets = [1, 0, 0], sizes = [16, 16, 8], strides = [1, 1, 1]} : vector<18x16x8xbf16> to vector<16x16x8xbf16>
    %70 = vector.shape_cast %69 : vector<16x16x8xbf16> to vector<256x8xbf16>
    %c5 = arith.constant 5 : index
    %c0_66 = arith.constant 0 : index
    %c0_67 = arith.constant 0 : index
    %71 = vector.load %arg3[%c5, %c0_66, %c0_67] : memref<9x8x128xbf16, #tpu.memory_space<vmem>>, vector<1x8x128xbf16>
    %72 = vector.shape_cast %71 : vector<1x8x128xbf16> to vector<8x128xbf16>
    %cst_68 = arith.constant dense<0.000000e+00> : vector<256x128xf32>
    %73 = tpu.matmul %70, %72, %cst_68 {dimension_numbers = #tpu.dot_dimension_numbers<[1], [0], [0], [1], [0, 0, 1, 1], [], []>} : vector<256x8xbf16>, vector<8x128xbf16>, vector<256x128xf32> -> vector<256x128xf32>
    %74 = arith.addf %68, %73 : vector<256x128xf32>
    %75 = vector.extract_strided_slice %62 {offsets = [2, 0, 0], sizes = [16, 16, 8], strides = [1, 1, 1]} : vector<18x16x8xbf16> to vector<16x16x8xbf16>
    %76 = vector.shape_cast %75 : vector<16x16x8xbf16> to vector<256x8xbf16>
    %c8 = arith.constant 8 : index
    %c0_69 = arith.constant 0 : index
    %c0_70 = arith.constant 0 : index
    %77 = vector.load %arg3[%c8, %c0_69, %c0_70] : memref<9x8x128xbf16, #tpu.memory_space<vmem>>, vector<1x8x128xbf16>
    %78 = vector.shape_cast %77 : vector<1x8x128xbf16> to vector<8x128xbf16>
    %cst_71 = arith.constant dense<0.000000e+00> : vector<256x128xf32>
    %79 = tpu.matmul %76, %78, %cst_71 {dimension_numbers = #tpu.dot_dimension_numbers<[1], [0], [0], [1], [0, 0, 1, 1], [], []>} : vector<256x8xbf16>, vector<8x128xbf16>, vector<256x128xf32> -> vector<256x128xf32>
    %80 = arith.addf %74, %79 : vector<256x128xf32>
    %81 = vector.broadcast %18 : vector<1x128xf32> to vector<256x128xf32>
    %82 = arith.mulf %80, %81 : vector<256x128xf32>
    %83 = vector.broadcast %19 : vector<1x128xf32> to vector<256x128xf32>
    %84 = arith.addf %82, %83 : vector<256x128xf32>
    %cst_72 = arith.constant 0.000000e+00 : f32
    %85 = vector.broadcast %cst_72 : f32 to vector<256x128xf32>
    %86 = arith.maximumf %84, %85 : vector<256x128xf32>
    %cst_73 = arith.constant 0.000000e+00 : f32
    %87 = vector.broadcast %cst_73 : f32 to vector<1x18x128xf32>
    %c0_74 = arith.constant 0 : index
    %c0_75 = arith.constant 0 : index
    %c0_76 = arith.constant 0 : index
    %88 = vector.load %arg11[%c0_74, %c0_75, %c0_76] : memref<18x18x128xf32, #tpu.memory_space<vmem>>, vector<1x18x128xf32>
    tpu.vector_store %arg11[%c0_74, %c0_75, %c0_76], %87 {strides = array<i32>} : memref<18x18x128xf32, #tpu.memory_space<vmem>>, vector<1x18x128xf32>,
    %cst_77 = arith.constant 0.000000e+00 : f32
    %89 = vector.broadcast %cst_77 : f32 to vector<1x18x128xf32>
    %c17_78 = arith.constant 17 : index
    %c0_79 = arith.constant 0 : index
    %c0_80 = arith.constant 0 : index
    %90 = vector.load %arg11[%c17_78, %c0_79, %c0_80] : memref<18x18x128xf32, #tpu.memory_space<vmem>>, vector<1x18x128xf32>
    tpu.vector_store %arg11[%c17_78, %c0_79, %c0_80], %89 {strides = array<i32>} : memref<18x18x128xf32, #tpu.memory_space<vmem>>, vector<1x18x128xf32>,
    %cst_81 = arith.constant 0.000000e+00 : f32
    %91 = vector.broadcast %cst_81 : f32 to vector<18x1x128xf32>
    %c0_82 = arith.constant 0 : index
    %c0_83 = arith.constant 0 : index
    %c0_84 = arith.constant 0 : index
    %92 = vector.load %arg11[%c0_82, %c0_83, %c0_84] : memref<18x18x128xf32, #tpu.memory_space<vmem>>, vector<18x1x128xf32>
    tpu.vector_store %arg11[%c0_82, %c0_83, %c0_84], %91 {strides = array<i32>} : memref<18x18x128xf32, #tpu.memory_space<vmem>>, vector<18x1x128xf32>,
    %cst_85 = arith.constant 0.000000e+00 : f32
    %93 = vector.broadcast %cst_85 : f32 to vector<18x1x128xf32>
    %c0_86 = arith.constant 0 : index
    %c17_87 = arith.constant 17 : index
    %c0_88 = arith.constant 0 : index
    %94 = vector.load %arg11[%c0_86, %c17_87, %c0_88] : memref<18x18x128xf32, #tpu.memory_space<vmem>>, vector<18x1x128xf32>
    tpu.vector_store %arg11[%c0_86, %c17_87, %c0_88], %93 {strides = array<i32>} : memref<18x18x128xf32, #tpu.memory_space<vmem>>, vector<18x1x128xf32>,
    %95 = vector.shape_cast %86 : vector<256x128xf32> to vector<16x16x128xf32>
    %c1_89 = arith.constant 1 : index
    %c1_90 = arith.constant 1 : index
    %c0_91 = arith.constant 0 : index
    %96 = vector.load %arg11[%c1_89, %c1_90, %c0_91] : memref<18x18x128xf32, #tpu.memory_space<vmem>>, vector<16x16x128xf32>
    tpu.vector_store %arg11[%c1_89, %c1_90, %c0_91], %95 {strides = array<i32>} : memref<18x18x128xf32, #tpu.memory_space<vmem>>, vector<16x16x128xf32>,
    %c0_92 = arith.constant 0 : index
    %c0_93 = arith.constant 0 : index
    %c0_94 = arith.constant 0 : index
    %97 = vector.load %arg11[%c0_92, %c0_93, %c0_94] : memref<18x18x128xf32, #tpu.memory_space<vmem>>, vector<18x16x128xf32>
    %98 = arith.truncf %97 : vector<18x16x128xf32> to vector<18x16x128xbf16>
    %99 = vector.extract_strided_slice %98 {offsets = [0, 0, 0], sizes = [16, 16, 128], strides = [1, 1, 1]} : vector<18x16x128xbf16> to vector<16x16x128xbf16>
    %100 = vector.shape_cast %99 : vector<16x16x128xbf16> to vector<256x128xbf16>
    %c0_95 = arith.constant 0 : index
    %c0_96 = arith.constant 0 : index
    %c0_97 = arith.constant 0 : index
    %101 = vector.load %arg6[%c0_95, %c0_96, %c0_97] : memref<9x128x128xbf16, #tpu.memory_space<vmem>>, vector<1x128x128xbf16>
    %102 = vector.shape_cast %101 : vector<1x128x128xbf16> to vector<128x128xbf16>
    %cst_98 = arith.constant dense<0.000000e+00> : vector<256x128xf32>
    %103 = tpu.matmul %100, %102, %cst_98 {dimension_numbers = #tpu.dot_dimension_numbers<[1], [0], [0], [1], [0, 0, 1, 1], [], []>} : vector<256x128xbf16>, vector<128x128xbf16>, vector<256x128xf32> -> vector<256x128xf32>
    %104 = vector.extract_strided_slice %98 {offsets = [1, 0, 0], sizes = [16, 16, 128], strides = [1, 1, 1]} : vector<18x16x128xbf16> to vector<16x16x128xbf16>
    %105 = vector.shape_cast %104 : vector<16x16x128xbf16> to vector<256x128xbf16>
    %c3_99 = arith.constant 3 : index
    %c0_100 = arith.constant 0 : index
    %c0_101 = arith.constant 0 : index
    %106 = vector.load %arg6[%c3_99, %c0_100, %c0_101] : memref<9x128x128xbf16, #tpu.memory_space<vmem>>, vector<1x128x128xbf16>
    %107 = vector.shape_cast %106 : vector<1x128x128xbf16> to vector<128x128xbf16>
    %cst_102 = arith.constant dense<0.000000e+00> : vector<256x128xf32>
    %108 = tpu.matmul %105, %107, %cst_102 {dimension_numbers = #tpu.dot_dimension_numbers<[1], [0], [0], [1], [0, 0, 1, 1], [], []>} : vector<256x128xbf16>, vector<128x128xbf16>, vector<256x128xf32> -> vector<256x128xf32>
    %109 = arith.addf %103, %108 : vector<256x128xf32>
    %110 = vector.extract_strided_slice %98 {offsets = [2, 0, 0], sizes = [16, 16, 128], strides = [1, 1, 1]} : vector<18x16x128xbf16> to vector<16x16x128xbf16>
    %111 = vector.shape_cast %110 : vector<16x16x128xbf16> to vector<256x128xbf16>
    %c6_103 = arith.constant 6 : index
    %c0_104 = arith.constant 0 : index
    %c0_105 = arith.constant 0 : index
    %112 = vector.load %arg6[%c6_103, %c0_104, %c0_105] : memref<9x128x128xbf16, #tpu.memory_space<vmem>>, vector<1x128x128xbf16>
    %113 = vector.shape_cast %112 : vector<1x128x128xbf16> to vector<128x128xbf16>
    %cst_106 = arith.constant dense<0.000000e+00> : vector<256x128xf32>
    %114 = tpu.matmul %111, %113, %cst_106 {dimension_numbers = #tpu.dot_dimension_numbers<[1], [0], [0], [1], [0, 0, 1, 1], [], []>} : vector<256x128xbf16>, vector<128x128xbf16>, vector<256x128xf32> -> vector<256x128xf32>
    %115 = arith.addf %109, %114 : vector<256x128xf32>
    %c0_107 = arith.constant 0 : index
    %c1_108 = arith.constant 1 : index
    %c0_109 = arith.constant 0 : index
    %116 = vector.load %arg11[%c0_107, %c1_108, %c0_109] : memref<18x18x128xf32, #tpu.memory_space<vmem>>, vector<18x16x128xf32>
    %117 = arith.truncf %116 : vector<18x16x128xf32> to vector<18x16x128xbf16>
    %118 = vector.extract_strided_slice %117 {offsets = [0, 0, 0], sizes = [16, 16, 128], strides = [1, 1, 1]} : vector<18x16x128xbf16> to vector<16x16x128xbf16>
    %119 = vector.shape_cast %118 : vector<16x16x128xbf16> to vector<256x128xbf16>
    %c1_110 = arith.constant 1 : index
    %c0_111 = arith.constant 0 : index
    %c0_112 = arith.constant 0 : index
    %120 = vector.load %arg6[%c1_110, %c0_111, %c0_112] : memref<9x128x128xbf16, #tpu.memory_space<vmem>>, vector<1x128x128xbf16>
    %121 = vector.shape_cast %120 : vector<1x128x128xbf16> to vector<128x128xbf16>
    %cst_113 = arith.constant dense<0.000000e+00> : vector<256x128xf32>
    %122 = tpu.matmul %119, %121, %cst_113 {dimension_numbers = #tpu.dot_dimension_numbers<[1], [0], [0], [1], [0, 0, 1, 1], [], []>} : vector<256x128xbf16>, vector<128x128xbf16>, vector<256x128xf32> -> vector<256x128xf32>
    %123 = arith.addf %115, %122 : vector<256x128xf32>
    %124 = vector.extract_strided_slice %117 {offsets = [1, 0, 0], sizes = [16, 16, 128], strides = [1, 1, 1]} : vector<18x16x128xbf16> to vector<16x16x128xbf16>
    %125 = vector.shape_cast %124 : vector<16x16x128xbf16> to vector<256x128xbf16>
    %c4_114 = arith.constant 4 : index
    %c0_115 = arith.constant 0 : index
    %c0_116 = arith.constant 0 : index
    %126 = vector.load %arg6[%c4_114, %c0_115, %c0_116] : memref<9x128x128xbf16, #tpu.memory_space<vmem>>, vector<1x128x128xbf16>
    %127 = vector.shape_cast %126 : vector<1x128x128xbf16> to vector<128x128xbf16>
    %cst_117 = arith.constant dense<0.000000e+00> : vector<256x128xf32>
    %128 = tpu.matmul %125, %127, %cst_117 {dimension_numbers = #tpu.dot_dimension_numbers<[1], [0], [0], [1], [0, 0, 1, 1], [], []>} : vector<256x128xbf16>, vector<128x128xbf16>, vector<256x128xf32> -> vector<256x128xf32>
    %129 = arith.addf %123, %128 : vector<256x128xf32>
    %130 = vector.extract_strided_slice %117 {offsets = [2, 0, 0], sizes = [16, 16, 128], strides = [1, 1, 1]} : vector<18x16x128xbf16> to vector<16x16x128xbf16>
    %131 = vector.shape_cast %130 : vector<16x16x128xbf16> to vector<256x128xbf16>
    %c7_118 = arith.constant 7 : index
    %c0_119 = arith.constant 0 : index
    %c0_120 = arith.constant 0 : index
    %132 = vector.load %arg6[%c7_118, %c0_119, %c0_120] : memref<9x128x128xbf16, #tpu.memory_space<vmem>>, vector<1x128x128xbf16>
    %133 = vector.shape_cast %132 : vector<1x128x128xbf16> to vector<128x128xbf16>
    %cst_121 = arith.constant dense<0.000000e+00> : vector<256x128xf32>
    %134 = tpu.matmul %131, %133, %cst_121 {dimension_numbers = #tpu.dot_dimension_numbers<[1], [0], [0], [1], [0, 0, 1, 1], [], []>} : vector<256x128xbf16>, vector<128x128xbf16>, vector<256x128xf32> -> vector<256x128xf32>
    %135 = arith.addf %129, %134 : vector<256x128xf32>
    %c0_122 = arith.constant 0 : index
    %c2_123 = arith.constant 2 : index
    %c0_124 = arith.constant 0 : index
    %136 = vector.load %arg11[%c0_122, %c2_123, %c0_124] : memref<18x18x128xf32, #tpu.memory_space<vmem>>, vector<18x16x128xf32>
    %137 = arith.truncf %136 : vector<18x16x128xf32> to vector<18x16x128xbf16>
    %138 = vector.extract_strided_slice %137 {offsets = [0, 0, 0], sizes = [16, 16, 128], strides = [1, 1, 1]} : vector<18x16x128xbf16> to vector<16x16x128xbf16>
    %139 = vector.shape_cast %138 : vector<16x16x128xbf16> to vector<256x128xbf16>
    %c2_125 = arith.constant 2 : index
    %c0_126 = arith.constant 0 : index
    %c0_127 = arith.constant 0 : index
    %140 = vector.load %arg6[%c2_125, %c0_126, %c0_127] : memref<9x128x128xbf16, #tpu.memory_space<vmem>>, vector<1x128x128xbf16>
    %141 = vector.shape_cast %140 : vector<1x128x128xbf16> to vector<128x128xbf16>
    %cst_128 = arith.constant dense<0.000000e+00> : vector<256x128xf32>
    %142 = tpu.matmul %139, %141, %cst_128 {dimension_numbers = #tpu.dot_dimension_numbers<[1], [0], [0], [1], [0, 0, 1, 1], [], []>} : vector<256x128xbf16>, vector<128x128xbf16>, vector<256x128xf32> -> vector<256x128xf32>
    %143 = arith.addf %135, %142 : vector<256x128xf32>
    %144 = vector.extract_strided_slice %137 {offsets = [1, 0, 0], sizes = [16, 16, 128], strides = [1, 1, 1]} : vector<18x16x128xbf16> to vector<16x16x128xbf16>
    %145 = vector.shape_cast %144 : vector<16x16x128xbf16> to vector<256x128xbf16>
    %c5_129 = arith.constant 5 : index
    %c0_130 = arith.constant 0 : index
    %c0_131 = arith.constant 0 : index
    %146 = vector.load %arg6[%c5_129, %c0_130, %c0_131] : memref<9x128x128xbf16, #tpu.memory_space<vmem>>, vector<1x128x128xbf16>
    %147 = vector.shape_cast %146 : vector<1x128x128xbf16> to vector<128x128xbf16>
    %cst_132 = arith.constant dense<0.000000e+00> : vector<256x128xf32>
    %148 = tpu.matmul %145, %147, %cst_132 {dimension_numbers = #tpu.dot_dimension_numbers<[1], [0], [0], [1], [0, 0, 1, 1], [], []>} : vector<256x128xbf16>, vector<128x128xbf16>, vector<256x128xf32> -> vector<256x128xf32>
    %149 = arith.addf %143, %148 : vector<256x128xf32>
    %150 = vector.extract_strided_slice %137 {offsets = [2, 0, 0], sizes = [16, 16, 128], strides = [1, 1, 1]} : vector<18x16x128xbf16> to vector<16x16x128xbf16>
    %151 = vector.shape_cast %150 : vector<16x16x128xbf16> to vector<256x128xbf16>
    %c8_133 = arith.constant 8 : index
    %c0_134 = arith.constant 0 : index
    %c0_135 = arith.constant 0 : index
    %152 = vector.load %arg6[%c8_133, %c0_134, %c0_135] : memref<9x128x128xbf16, #tpu.memory_space<vmem>>, vector<1x128x128xbf16>
    %153 = vector.shape_cast %152 : vector<1x128x128xbf16> to vector<128x128xbf16>
    %cst_136 = arith.constant dense<0.000000e+00> : vector<256x128xf32>
    %154 = tpu.matmul %151, %153, %cst_136 {dimension_numbers = #tpu.dot_dimension_numbers<[1], [0], [0], [1], [0, 0, 1, 1], [], []>} : vector<256x128xbf16>, vector<128x128xbf16>, vector<256x128xf32> -> vector<256x128xf32>
    %155 = arith.addf %149, %154 : vector<256x128xf32>
    %156 = vector.broadcast %20 : vector<1x128xf32> to vector<256x128xf32>
    %157 = arith.mulf %155, %156 : vector<256x128xf32>
    %158 = vector.broadcast %21 : vector<1x128xf32> to vector<256x128xf32>
    %159 = arith.addf %157, %158 : vector<256x128xf32>
    %cst_137 = arith.constant 0.000000e+00 : f32
    %160 = vector.broadcast %cst_137 : f32 to vector<256x128xf32>
    %161 = arith.maximumf %159, %160 : vector<256x128xf32>
    %162 = vector.shape_cast %161 : vector<256x128xf32> to vector<16x16x128xf32>
    %163 = vector.extract_strided_slice %162 {offsets = [0, 0, 0], sizes = [16, 16, 8], strides = [1, 1, 1]} : vector<16x16x128xf32> to vector<16x16x8xf32>
    %c0_138 = arith.constant 0 : index
    %c0_139 = arith.constant 0 : index
    %c0_140 = arith.constant 0 : index
    %c0_141 = arith.constant 0 : index
    %164 = vector.load %arg9[%c0_138, %c0_139, %c0_140, %c0_141] : memref<1x16x16x8xf32, #tpu.memory_space<vmem>>, vector<1x16x16x8xf32>
    %165 = vector.shape_cast %164 : vector<1x16x16x8xf32> to vector<16x16x8xf32>
    %166 = vector.shape_cast %163 : vector<16x16x8xf32> to vector<1x16x16x8xf32>
    tpu.vector_store %arg9[%c0_138, %c0_139, %c0_140, %c0_141], %166 {strides = array<i32>} : memref<1x16x16x8xf32, #tpu.memory_space<vmem>>, vector<1x16x16x8xf32>,
    return
  }
  func.func @transform_0(%arg0: i32) -> (i32, i32, i32, i32) {
    %c0_i32 = arith.constant 0 : i32
    %c0_i32_0 = arith.constant 0 : i32
    %c0_i32_1 = arith.constant 0 : i32
    %c0_i32_2 = arith.constant 0 : i32
    return %arg0, %c0_i32, %c0_i32_0, %c0_i32_1 : i32, i32, i32, i32
  }
  func.func @transform_1(%arg0: i32) -> (i32, i32, i32, i32) {
    %c0_i32 = arith.constant 0 : i32
    %c0_i32_0 = arith.constant 0 : i32
    %c0_i32_1 = arith.constant 0 : i32
    %c0_i32_2 = arith.constant 0 : i32
    return %arg0, %c0_i32, %c0_i32_0, %c0_i32_1 : i32, i32, i32, i32
  }
  func.func @transform_2(%arg0: i32) -> (i32, i32, i32) {
    %c0_i32 = arith.constant 0 : i32
    %c0_i32_0 = arith.constant 0 : i32
    %c0_i32_1 = arith.constant 0 : i32
    %c0_i32_2 = arith.constant 0 : i32
    return %c0_i32, %c0_i32_0, %c0_i32_1 : i32, i32, i32
  }
  func.func @transform_3(%arg0: i32) -> (i32, i32) {
    %c0_i32 = arith.constant 0 : i32
    %c0_i32_0 = arith.constant 0 : i32
    %c0_i32_1 = arith.constant 0 : i32
    return %c0_i32, %c0_i32_0 : i32, i32
  }
  func.func @transform_4(%arg0: i32) -> (i32, i32) {
    %c0_i32 = arith.constant 0 : i32
    %c0_i32_0 = arith.constant 0 : i32
    %c0_i32_1 = arith.constant 0 : i32
    return %c0_i32, %c0_i32_0 : i32, i32
  }
  func.func @transform_5(%arg0: i32) -> (i32, i32, i32) {
    %c0_i32 = arith.constant 0 : i32
    %c0_i32_0 = arith.constant 0 : i32
    %c0_i32_1 = arith.constant 0 : i32
    %c0_i32_2 = arith.constant 0 : i32
    return %c0_i32, %c0_i32_0, %c0_i32_1 : i32, i32, i32
  }
  func.func @transform_6(%arg0: i32) -> (i32, i32) {
    %c0_i32 = arith.constant 0 : i32
    %c0_i32_0 = arith.constant 0 : i32
    %c0_i32_1 = arith.constant 0 : i32
    return %c0_i32, %c0_i32_0 : i32, i32
  }
  func.func @transform_7(%arg0: i32) -> (i32, i32) {
    %c0_i32 = arith.constant 0 : i32
    %c0_i32_0 = arith.constant 0 : i32
    %c0_i32_1 = arith.constant 0 : i32
    return %c0_i32, %c0_i32_0 : i32, i32
  }
  func.func @transform_8(%arg0: i32) -> (i32, i32, i32, i32) {
    %c0_i32 = arith.constant 0 : i32
    %c0_i32_0 = arith.constant 0 : i32
    %c0_i32_1 = arith.constant 0 : i32
    %c0_i32_2 = arith.constant 0 : i32
    return %arg0, %c0_i32, %c0_i32_0, %c0_i32_1 : i32, i32, i32, i32
  }
}

</mosaic_0001>

<bundles_post_ra>
// kernel: decoder_block_forward.1
= control target key start
LH: loop header
LB: loop body
LE: loop exit
PB: predicated region body
PF: predicated region fallthrough
CT: control target
= control target key end

     0   :  { %s5597_s27 = smov 0   ;;  %s7541_s0 = inlined_call_operand.vmem [shape: f32[2,8,16,4], index: 0, kind: input, shape index: {}]   ;;  %s7542_s1 = inlined_call_operand.vmem [shape: f32[2,16,16,4], index: 1, kind: input, shape index: {}]   ;;  %s7543_s2 = inlined_call_operand.vmem [shape: bf16[9,8,128], index: 2, kind: input, shape index: {}]   ;;  %s7544_s3 = inlined_call_operand.vmem [shape: f32[1,128], index: 3, kind: input, shape index: {}]   ;;  %s7545_s4 = inlined_call_operand.vmem [shape: f32[1,128], index: 4, kind: input, shape index: {}]   ;;  %s7546_s5 = inlined_call_operand.vmem [shape: bf16[9,128,128], index: 5, kind: input, shape index: {}]   ;;  %s7547_s6 = inlined_call_operand.vmem [shape: f32[1,128], index: 6, kind: input, shape index: {}]   ;;  %s7548_s7 = inlined_call_operand.vmem [shape: f32[1,128], index: 7, kind: input, shape index: {}]   ;;  %s7549_s8 = inlined_call_operand.vmem [shape: f32[2,16,16,8], index: 8, kind: output, shape index: {}]  }
   0x1 LB: > { %s4866_s28 = sadd.s32 4294967295, %s5548_s27   ;;  %p4870_p0 = scmp.ge.s32.totalorder %s5548_s27, 1  ;;  %s5548_s27 = sphi %s5597_s27, %s18_s27  }
   0x2   : > { %p272_p1 = scmp.lt.s32.totalorder %s5548_s27, 3 }
   0x4   : > { %p273_p2 = pnand %p4870_p0, %p272_p1 }
   0x6   : > { %276 = sbr.rel (%p273_p2) target bundleno = 1600 (0x640), region = 52 }
   0xb   : > { %p311_p3 = scmp.lt.s32.totalorder %s4866_s28, 1  ;;  %s5550_s11 = smov 4   ;;  %vm390_vm0 = vcmask 31744   ;;  %v692_v26 = vld [vmem:[%s7543_s2] sm:$0xf]  ;;  %vm823_vm1 = vcmask 1043456  }
   0xc   : > { %v925_v28 = vsel %vm823_vm1, %v692_v26, 0  ;;  %vm327_vm2 = vcmask 64512   ;;  %v5551_v29 = vmov 0.0   ;;  %vm336_vm3 = vcmask 57344   ;;  %v4877_v47 = vld [vmem:[%s7543_s2 + $0xc] sm:$0xf] }
   0xd   : > { %s7561_s28 = smov (!%p311_p3, %s4866_s28), 1  ;;  %934 = vmatpush.bf16.msra.mxu1 %v925_v28  ;;  %5523 = vmatpush.bf16.msra.mxu3 %v925_v28  ;;  %328 = vst.msk [vmem:[#allocation2] sm:$0xff] %vm327_vm2, %v5551_v29  ;;  %vm583_vm4 = vcmask 64544   ;;  %v825_v49 = vsel %vm823_vm1, %v4877_v47, 0  ;;  %v4910_v52 = vld [vmem:[%s7543_s2 + $0x18] sm:$0xf] }
   0xe   : > { %s5448_s29 = sshll.u32 %s7561_s28, 8  ;;  %s5447_s12 = sshll.u32 %s7561_s28, 7  ;;  %329 = vst.msk [vmem:[#allocation2 + $0x8] sm:$0xff] %vm327_vm2, %v5551_v29  ;;  %834 = vmatpush.bf16.msra.mxu0 %v825_v49  ;;  %5522 = vmatpush.bf16.msra.mxu2 %v825_v49  ;;  %v4927_v53 = vld [vmem:[%s7543_s2 + $0x4] sm:$0xf]  ;;  %v1027_v55 = vsel %vm823_vm1, %v4910_v52, 0 }
   0xf   : > { %s5613_s10 = scalar_lea.vmem %s7542_s1, %s5448_s29  ;;  %s5665_s15 = scalar_lea.vmem %s7541_s0, %s5447_s12  ;;  %337 = vst.msk [vmem:[#allocation2] sm:$0x1] %vm336_vm3, %v5551_v29  ;;  %v1353_v56 = vsel %vm823_vm1, %v4927_v53, 0  ;;  %v4944_v57 = vld [vmem:[%s7543_s2 + $0x10] sm:$0xf]  ;;  %vm330_vm5 = vcmask 58368  }
  0x10   : > { %v439_v0 = vld [vmem:[%s5613_s10 + $0x80] sm:$0xff]  ;;  %v437_v1 = vld [vmem:[%s5613_s10 + $0x70] sm:$0xff]  ;;  %v440_v3 = vld [vmem:[%s5613_s10 + $0x88] sm:$0xff]  ;;  %333 = vst.msk [vmem:[#allocation2 + $0x198] sm:$0xff] %vm327_vm2, %v5551_v29  ;;  %v1487_v59 = vsel %vm823_vm1, %v4944_v57, 0  ;;  %s7373_s21 = scalar_lea.vmem %s7549_s8, %s5448_s29 }
  0x11   : > { %519 = vrot.lane.b32.xlu0 %v439_v0, %s5550_s11  ;;  %515 = vrot.lane.b32.xlu1 %v437_v1, %s5550_s11  ;;  %v423_v2 = vld [vmem:[%s5613_s10] sm:$0xff]  ;;  %v438_v4 = vld [vmem:[%s5613_s10 + $0x78] sm:$0xff]  ;;  %334 = vst.msk [vmem:[#allocation2 + $0x1a0] sm:$0xff] %vm327_vm2, %v5551_v29 }
  0x12   : > { %487 = vrot.lane.b32.xlu2 %v423_v2, %s5550_s11  ;;  %v424_v5 = vld [vmem:[%s5613_s10 + $0x8] sm:$0xff]  ;;  %v441_v6 = vld [vmem:[%s5613_s10 + $0x90] sm:$0xff]  ;;  %v442_v7 = vld [vmem:[%s5613_s10 + $0x98] sm:$0xff]  ;;  %338 = vst.msk [vmem:[#allocation2 + $0x18] sm:$0x1] %vm336_vm3, %v5551_v29  ;;  %1036 = vmatpush.bf16.msrb.mxu2 %v1027_v55 }
  0x13   : > { %v425_v8 = vld [vmem:[%s5613_s10 + $0x10] sm:$0xff]  ;;  %v426_v9 = vld [vmem:[%s5613_s10 + $0x18] sm:$0xff]  ;;  %v443_v10 = vld [vmem:[%s5613_s10 + $0xa0] sm:$0xff]  ;;  %339 = vst.msk [vmem:[#allocation2 + $0x30] sm:$0x1] %vm336_vm3, %v5551_v29  ;;  %1362 = vmatpush.bf16.msrb.mxu3 %v1353_v56  ;;  %1496 = vmatpush.bf16.msrb.mxu0 %v1487_v59 }
  0x14   : > { %v444_v11 = vld [vmem:[%s5613_s10 + $0xa8] sm:$0xff]  ;;  %v427_v13 = vld [vmem:[%s5613_s10 + $0x20] sm:$0xff]  ;;  %v445_v14 = vld [vmem:[%s5613_s10 + $0xb0] sm:$0xff]  ;;  %340 = vst.msk [vmem:[#allocation2 + $0x48] sm:$0x1] %vm336_vm3, %v5551_v29 }
  0x15   : > { %v428_v12 = vld [vmem:[%s5613_s10 + $0x28] sm:$0xff]  ;;  %v429_v15 = vld [vmem:[%s5613_s10 + $0x30] sm:$0xff]  ;;  %v446_v16 = vld [vmem:[%s5613_s10 + $0xb8] sm:$0xff]  ;;  %341 = vst.msk [vmem:[#allocation2 + $0x60] sm:$0x1] %vm336_vm3, %v5551_v29 }
  0x16   : > { %v430_v17 = vld [vmem:[%s5613_s10 + $0x38] sm:$0xff]  ;;  %v447_v18 = vld [vmem:[%s5613_s10 + $0xc0] sm:$0xff]  ;;  %v448_v19 = vld [vmem:[%s5613_s10 + $0xc8] sm:$0xff]  ;;  %342 = vst.msk [vmem:[#allocation2 + $0x78] sm:$0x1] %vm336_vm3, %v5551_v29 }
  0x17   : > { %v431_v20 = vld [vmem:[%s5613_s10 + $0x40] sm:$0xff]  ;;  %v432_v21 = vld [vmem:[%s5613_s10 + $0x48] sm:$0xff]  ;;  %v449_v22 = vld [vmem:[%s5613_s10 + $0xd0] sm:$0xff]  ;;  %343 = vst.msk [vmem:[#allocation2 + $0x90] sm:$0x1] %vm336_vm3, %v5551_v29 }
  0x18   : > { %v434_v23 = vld [vmem:[%s5613_s10 + $0x58] sm:$0xff]  ;;  %v373_v24 = vld [vmem:[%s5665_s15] sm:$0xff]  ;;  %v433_v25 = vld [vmem:[%s5613_s10 + $0x50] sm:$0xff]  ;;  %344 = vst.msk [vmem:[#allocation2 + $0xa8] sm:$0x1] %vm336_vm3, %v5551_v29 }
  0x19   : > { %521 = vrot.lane.b32.xlu0 %v440_v3, %s5550_s11  ;;  %517 = vrot.lane.b32.xlu1 %v438_v4, %s5550_s11  ;;  %391 = vst.msk [vmem:[#allocation2 + $0x19] sm:$0xff] %vm390_vm0, %v373_v24  ;;  %v450_v27 = vld [vmem:[%s5613_s10 + $0xd8] sm:$0xff]  ;;  %v435_v30 = vld [vmem:[%s5613_s10 + $0x60] sm:$0xff]  ;;  %v621_v32 = vld [vmem:[#allocation2 + $0x8] sm:$0xff] }
  0x1a   : > { %489 = vrot.lane.b32.xlu2 %v424_v5, %s5550_s11  ;;  %393 = vst.msk [vmem:[#allocation2 + $0x31] sm:$0xff] %vm390_vm0, %v373_v24  ;;  %v452_v31 = vld [vmem:[%s5613_s10 + $0xe8] sm:$0xff]  ;;  %v620_v33 = vld [vmem:[#allocation2] sm:$0xff]  ;;  %v657_v34 = vpack.c.bf16 %v621_v32, %v621_v32  ;;  %v379_v40 = vld [vmem:[%s5665_s15 + $0x30] sm:$0xff] }
  0x1b   : > { %v656_v35 = vpack.c.bf16 %v620_v33, %v620_v33  ;;  %345 = vst.msk [vmem:[#allocation2 + $0xc0] sm:$0x1] %vm336_vm3, %v5551_v29  ;;  %v381_v38 = vld [vmem:[%s5665_s15 + $0x40] sm:$0xff]  ;;  %v454_v44 = vld [vmem:[%s5613_s10 + $0xf8] sm:$0xff]  ;;  %v453_v45 = vld [vmem:[%s5613_s10 + $0xf0] sm:$0xff] }
  0x1c   : > { %v919_v36 = vunpack.c.l.b16 %v657_v34  ;;  %346 = vst.msk [vmem:[#allocation2 + $0xd8] sm:$0x1] %vm336_vm3, %v5551_v29  ;;  %v451_v46 = vld [vmem:[%s5613_s10 + $0xe0] sm:$0xff]  ;;  %v436_v48 = vld [vmem:[%s5613_s10 + $0x68] sm:$0xff]  ;;  %v380_v2 = vld [vmem:[%s5665_s15 + $0x38] sm:$0xff] }
  0x1d   : > { %v918_v37 = vunpack.c.l.b16 %v656_v35  ;;  %407 = vst.msk [vmem:[#allocation2 + $0xd9] sm:$0xff] %vm390_vm0, %v381_v38  ;;  %v374_v58 = vld [vmem:[%s5665_s15 + $0x8] sm:$0xff]  ;;  %v384_v32 = vld [vmem:[%s5665_s15 + $0x58] sm:$0xff]  ;;  %v385_v49 = vld [vmem:[%s5665_s15 + $0x60] sm:$0xff] }
  0x1e   : > { %409 = vst.msk [vmem:[#allocation2 + $0xf1] sm:$0xff] %vm390_vm0, %v381_v38  ;;  %v382_v0 = vld [vmem:[%s5665_s15 + $0x48] sm:$0xff] }
  0x1f   : > { %v920_v39 = vpack.c.b16 %v919_v36, %v918_v37  ;;  %405 = vst.msk [vmem:[#allocation2 + $0xc1] sm:$0xff] %vm390_vm0, %v379_v40 }
  0x20   : > { %403 = vst.msk [vmem:[#allocation2 + $0xa9] sm:$0xff] %vm390_vm0, %v379_v40 }
  0x21   : > { %523 = vrot.lane.b32.xlu0 %v441_v6, %s5550_s11  ;;  %525 = vrot.lane.b32.xlu1 %v442_v7, %s5550_s11  ;;  %347 = vst.msk [vmem:[#allocation2 + $0xf0] sm:$0x1] %vm336_vm3, %v5551_v29 }
  0x22   : > { %491 = vrot.lane.b32.xlu2 %v425_v8, %s5550_s11  ;;  %4894 = vmatmul.msk.bf16.vlgmr.msra.gmra.mxu1 %vm327_vm2, %v920_v39  ;;  %348 = vst.msk [vmem:[#allocation2 + $0x108] sm:$0x1] %vm336_vm3, %v5551_v29 }
  0x23   : > { %349 = vst.msk [vmem:[#allocation2 + $0x120] sm:$0x1] %vm336_vm3, %v5551_v29 }
  0x24   : > { %350 = vst.msk [vmem:[#allocation2 + $0x138] sm:$0x1] %vm336_vm3, %v5551_v29 }
  0x25   : > { %351 = vst.msk [vmem:[#allocation2 + $0x150] sm:$0x1] %vm336_vm3, %v5551_v29 }
  0x26   : > { %352 = vst.msk [vmem:[#allocation2 + $0x168] sm:$0x1] %vm336_vm3, %v5551_v29 }
  0x27   : > { %353 = vst.msk [vmem:[#allocation2 + $0x180] sm:$0x1] %vm336_vm3, %v5551_v29 }
  0x28   : > { %356 = vst.msk [vmem:[#allocation2 + $0x29] sm:$0x1] %vm336_vm3, %v5551_v29 }
  0x29   : > { %493 = vrot.lane.b32.xlu0 %v426_v9, %s5550_s11  ;;  %527 = vrot.lane.b32.xlu1 %v443_v10, %s5550_s11  ;;  %357 = vst.msk [vmem:[#allocation2 + $0x41] sm:$0x1] %vm336_vm3, %v5551_v29 }
  0x2a   : > { %529 = vrot.lane.b32.xlu2 %v444_v11, %s5550_s11  ;;  %358 = vst.msk [vmem:[#allocation2 + $0x59] sm:$0x1] %vm336_vm3, %v5551_v29 }
  0x2b   : > { %359 = vst.msk [vmem:[#allocation2 + $0x71] sm:$0x1] %vm336_vm3, %v5551_v29 }
  0x2c   : > { %360 = vst.msk [vmem:[#allocation2 + $0x89] sm:$0x1] %vm336_vm3, %v5551_v29 }
  0x2d   : > { %361 = vst.msk [vmem:[#allocation2 + $0xa1] sm:$0x1] %vm336_vm3, %v5551_v29 }
  0x2e   : > { %362 = vst.msk [vmem:[#allocation2 + $0xb9] sm:$0x1] %vm336_vm3, %v5551_v29 }
  0x2f   : > { %363 = vst.msk [vmem:[#allocation2 + $0xd1] sm:$0x1] %vm336_vm3, %v5551_v29 }
  0x30   : > { %364 = vst.msk [vmem:[#allocation2 + $0xe9] sm:$0x1] %vm336_vm3, %v5551_v29 }
  0x31   : > { %497 = vrot.lane.b32.xlu1 %v428_v12, %s5550_s11  ;;  %495 = vrot.lane.b32.xlu0 %v427_v13, %s5550_s11  ;;  %365 = vst.msk [vmem:[#allocation2 + $0x101] sm:$0x1] %vm336_vm3, %v5551_v29 }
  0x32   : > { %531 = vrot.lane.b32.xlu2 %v445_v14, %s5550_s11  ;;  %366 = vst.msk [vmem:[#allocation2 + $0x119] sm:$0x1] %vm336_vm3, %v5551_v29  ;;  %v383_v14 = vld [vmem:[%s5665_s15 + $0x50] sm:$0xff] }
  0x33   : > { %367 = vst.msk [vmem:[#allocation2 + $0x131] sm:$0x1] %vm336_vm3, %v5551_v29 }
  0x34   : > { %368 = vst.msk [vmem:[#allocation2 + $0x149] sm:$0x1] %vm336_vm3, %v5551_v29 }
  0x35   : > { %369 = vst.msk [vmem:[#allocation2 + $0x161] sm:$0x1] %vm336_vm3, %v5551_v29 }
  0x36   : > { %370 = vst.msk [vmem:[#allocation2 + $0x179] sm:$0x1] %vm336_vm3, %v5551_v29 }
  0x37   : > { %371 = vst.msk [vmem:[#allocation2 + $0x191] sm:$0x1] %vm336_vm3, %v5551_v29 }
  0x38   : > { %2440 = vst [vmem:[#allocation3] sm:$0xff] %v5551_v29 }
  0x39   : > { %499 = vrot.lane.b32.xlu1 %v429_v15, %s5550_s11  ;;  %533 = vrot.lane.b32.xlu0 %v446_v16, %s5550_s11  ;;  %2441 = vst [vmem:[#allocation3 + $0x8] sm:$0xff] %v5551_v29 }
  0x3a   : > { %501 = vrot.lane.b32.xlu2 %v430_v17, %s5550_s11  ;;  %2442 = vst [vmem:[#allocation3 + $0x10] sm:$0x3] %v5551_v29 }
  0x3b   : > { %2444 = vst [vmem:[#allocation3 + $0x198] sm:$0xff] %v5551_v29 }
  0x3c   : > { %2445 = vst [vmem:[#allocation3 + $0x1a0] sm:$0xff] %v5551_v29 }
  0x3d   : > { %2446 = vst [vmem:[#allocation3 + $0x1a8] sm:$0x3] %v5551_v29 }
  0x3e   : > { %2448 = vst [vmem:[#allocation3 + $0x18] sm:$0x1] %v5551_v29 }
  0x3f   : > { %2449 = vst [vmem:[#allocation3 + $0x30] sm:$0x1] %v5551_v29 }
  0x40   : > { %2450 = vst [vmem:[#allocation3 + $0x48] sm:$0x1] %v5551_v29 }
  0x41   : > { %535 = vrot.lane.b32.xlu0 %v447_v18, %s5550_s11  ;;  %537 = vrot.lane.b32.xlu1 %v448_v19, %s5550_s11  ;;  %2451 = vst [vmem:[#allocation3 + $0x60] sm:$0x1] %v5551_v29  ;;  %v376_v18 = vld [vmem:[%s5665_s15 + $0x18] sm:$0xff] }
  0x42   : > { %503 = vrot.lane.b32.xlu2 %v431_v20, %s5550_s11  ;;  %2452 = vst [vmem:[#allocation3 + $0x78] sm:$0x1] %v5551_v29 }
  0x43   : > { %2453 = vst [vmem:[#allocation3 + $0x90] sm:$0x1] %v5551_v29 }
  0x44   : > { %2454 = vst [vmem:[#allocation3 + $0xa8] sm:$0x1] %v5551_v29 }
  0x45   : > { %2455 = vst [vmem:[#allocation3 + $0xc0] sm:$0x1] %v5551_v29 }
  0x46   : > { %2456 = vst [vmem:[#allocation3 + $0xd8] sm:$0x1] %v5551_v29 }
  0x47   : > { %2457 = vst [vmem:[#allocation3 + $0xf0] sm:$0x1] %v5551_v29 }
  0x48   : > { %2458 = vst [vmem:[#allocation3 + $0x108] sm:$0x1] %v5551_v29 }
  0x49   : > { %505 = vrot.lane.b32.xlu0 %v432_v21, %s5550_s11  ;;  %539 = vrot.lane.b32.xlu1 %v449_v22, %s5550_s11  ;;  %2459 = vst [vmem:[#allocation3 + $0x120] sm:$0x1] %v5551_v29 }
  0x4a   : > { %541 = vrot.lane.b32.xlu2 %v450_v27, %s5550_s11  ;;  %2460 = vst [vmem:[#allocation3 + $0x138] sm:$0x1] %v5551_v29  ;;  %v375_v27 = vld [vmem:[%s5665_s15 + $0x10] sm:$0xff] }
  0x4b   : > { %2461 = vst [vmem:[#allocation3 + $0x150] sm:$0x1] %v5551_v29 }
  0x4c   : > { %2462 = vst [vmem:[#allocation3 + $0x168] sm:$0x1] %v5551_v29 }
  0x4d   : > { %2463 = vst [vmem:[#allocation3 + $0x180] sm:$0x1] %v5551_v29 }
  0x4e   : > { %2466 = vst [vmem:[#allocation3 + $0x29] sm:$0x1] %v5551_v29 }
  0x4f   : > { %2467 = vst [vmem:[#allocation3 + $0x41] sm:$0x1] %v5551_v29 }
  0x50   : > { %2468 = vst [vmem:[#allocation3 + $0x59] sm:$0x1] %v5551_v29 }
  0x51   : > { %509 = vrot.lane.b32.xlu1 %v434_v23, %s5550_s11  ;;  %507 = vrot.lane.b32.xlu0 %v433_v25, %s5550_s11  ;;  %2469 = vst [vmem:[#allocation3 + $0x71] sm:$0x1] %v5551_v29 }
  0x52   : > { %543 = vrot.lane.b32.xlu2 %v451_v46, %s5550_s11  ;;  %2470 = vst [vmem:[#allocation3 + $0x89] sm:$0x1] %v5551_v29 }
  0x53   : > { %2471 = vst [vmem:[#allocation3 + $0xa1] sm:$0x1] %v5551_v29 }
  0x54   : > { %2472 = vst [vmem:[#allocation3 + $0xb9] sm:$0x1] %v5551_v29 }
  0x55   : > { %2473 = vst [vmem:[#allocation3 + $0xd1] sm:$0x1] %v5551_v29 }
  0x56   : > { %2474 = vst [vmem:[#allocation3 + $0xe9] sm:$0x1] %v5551_v29 }
  0x57   : > { %2475 = vst [vmem:[#allocation3 + $0x101] sm:$0x1] %v5551_v29 }
  0x58   : > { %2476 = vst [vmem:[#allocation3 + $0x119] sm:$0x1] %v5551_v29 }
  0x59   : > { %511 = vrot.lane.b32.xlu1 %v435_v30, %s5550_s11  ;;  %545 = vrot.lane.b32.xlu0 %v452_v31, %s5550_s11  ;;  %2477 = vst [vmem:[#allocation3 + $0x131] sm:$0x1] %v5551_v29 }
  0x5a   : > { %513 = vrot.lane.b32.xlu2 %v436_v48, %s5550_s11  ;;  %2478 = vst [vmem:[#allocation3 + $0x149] sm:$0x1] %v5551_v29 }
  0x5b   : > { %2479 = vst [vmem:[#allocation3 + $0x161] sm:$0x1] %v5551_v29 }
  0x5c   : > { %2480 = vst [vmem:[#allocation3 + $0x179] sm:$0x1] %v5551_v29 }
  0x5d   : > { %2481 = vst [vmem:[#allocation3 + $0x191] sm:$0x1] %v5551_v29 }
  0x5e   : > { %392 = vst.msk [vmem:[#allocation2 + $0x21] sm:$0xff] %vm390_vm0, %v374_v58 }
  0x5f   : > { %354 = vst.msk [vmem:[#allocation2 + $0x198] sm:$0x1] %vm336_vm3, %v5551_v29 }
  0x60   : > { %394 = vst.msk [vmem:[#allocation2 + $0x39] sm:$0xff] %vm390_vm0, %v374_v58 }
  0x61   : > { %549 = vrot.lane.b32.xlu1 %v454_v44, %s5550_s11  ;;  %547 = vrot.lane.b32.xlu0 %v453_v45, %s5550_s11  ;;  %2447 = vst [vmem:[#allocation3] sm:$0x1] %v5551_v29 }
  0x62   : > { %2464 = vst [vmem:[#allocation3 + $0x198] sm:$0x1] %v5551_v29 }
  0x63   : > { %2465 = vst [vmem:[#allocation3 + $0x11] sm:$0x1] %v5551_v29 }
  0x64   : > { %2482 = vst [vmem:[#allocation3 + $0x1a9] sm:$0x1] %v5551_v29 }
  0x65   : > { %408 = vst.msk [vmem:[#allocation2 + $0xe1] sm:$0xff] %vm390_vm0, %v382_v0 }
  0x66   : > { %410 = vst.msk [vmem:[#allocation2 + $0xf9] sm:$0xff] %vm390_vm0, %v382_v0 }
  0x67   : > { %406 = vst.msk [vmem:[#allocation2 + $0xc9] sm:$0xff] %vm390_vm0, %v380_v2 }
  0x68   : > { %404 = vst.msk [vmem:[#allocation2 + $0xb1] sm:$0xff] %vm390_vm0, %v380_v2 }
  0x69   : > { %411 = vst.msk [vmem:[#allocation2 + $0x109] sm:$0xff] %vm390_vm0, %v383_v14 }
  0x6a   : > { %413 = vst.msk [vmem:[#allocation2 + $0x121] sm:$0xff] %vm390_vm0, %v383_v14 }
  0x6b   : > { %396 = vst.msk [vmem:[#allocation2 + $0x51] sm:$0xff] %vm390_vm0, %v376_v18 }
  0x6c   : > { %v488_v41 = vpop.permute.xlu2 %487  ;;  %398 = vst.msk [vmem:[#allocation2 + $0x69] sm:$0xff] %vm390_vm0, %v376_v18 }
  0x6d   : > { %584 = vst.msk [vmem:[#allocation2 + $0x19] sm:$0xff] %vm583_vm4, %v488_v41 }
  0x6e   : > { %395 = vst.msk [vmem:[#allocation2 + $0x49] sm:$0xff] %vm390_vm0, %v375_v27 }
  0x6f   : > { %397 = vst.msk [vmem:[#allocation2 + $0x61] sm:$0xff] %vm390_vm0, %v375_v27 }
  0x70   : > { %412 = vst.msk [vmem:[#allocation2 + $0x111] sm:$0xff] %vm390_vm0, %v384_v32 }
  0x71   : > { %414 = vst.msk [vmem:[#allocation2 + $0x129] sm:$0xff] %vm390_vm0, %v384_v32 }
  0x72   : > { %415 = vst.msk [vmem:[#allocation2 + $0x139] sm:$0xff] %vm390_vm0, %v385_v49 }
  0x73   : > { %417 = vst.msk [vmem:[#allocation2 + $0x151] sm:$0xff] %vm390_vm0, %v385_v49 }
  0x74   : > { %v490_v54 = vpop.permute.xlu2 %489  ;;  %v622_v62 = vld [vmem:[#allocation2 + $0x18] sm:$0xff]  ;;  %331 = vst.msk [vmem:[#allocation2 + $0x10] sm:$0x3] %vm330_vm5, %v5551_v29 }
  0x75   : > { %585 = vst.msk [vmem:[#allocation2 + $0x21] sm:$0xff] %vm583_vm4, %v490_v54  ;;  %v658_v1 = vpack.c.bf16 %v622_v62, %v622_v62 }
  0x76   : > { %355 = vst.msk [vmem:[#allocation2 + $0x11] sm:$0x1] %vm336_vm3, %v5551_v29 }
  0x77   : > { %v727_v5 = vunpack.c.l.b16 %v658_v1  ;;  %v378_v1 = vld [vmem:[%s5665_s15 + $0x28] sm:$0xff]  ;;  %335 = vst.msk [vmem:[#allocation2 + $0x1a8] sm:$0x3] %vm330_vm5, %v5551_v29 }
  0x78   : > { %400 = vst.msk [vmem:[#allocation2 + $0x81] sm:$0xff] %vm390_vm0, %v378_v1 }
  0x79   : > { %402 = vst.msk [vmem:[#allocation2 + $0x99] sm:$0xff] %vm390_vm0, %v378_v1 }
  0x7a   : > { %372 = vst.msk [vmem:[#allocation2 + $0x1a9] sm:$0x1] %vm336_vm3, %v5551_v29  ;;  %v4978_v29 = vld [vmem:[%s7543_s2 + $0x8] sm:$0xf] }
  0x7c   : > { %v492_v63 = vpop.permute.xlu2 %491  ;;  %v623_v3 = vld [vmem:[#allocation2 + $0x20] sm:$0xff] }
  0x7d   : > { %v659_v4 = vpack.c.bf16 %v623_v3, %v623_v3  ;;  %586 = vst.msk [vmem:[#allocation2 + $0x31] sm:$0xff] %vm583_vm4, %v492_v63  ;;  %v377_v3 = vld [vmem:[%s5665_s15 + $0x20] sm:$0xff] }
  0x7e   : > { %399 = vst.msk [vmem:[#allocation2 + $0x79] sm:$0xff] %vm390_vm0, %v377_v3 }
  0x7f   : > { %v728_v8 = vunpack.c.l.b16 %v659_v4  ;;  %401 = vst.msk [vmem:[#allocation2 + $0x91] sm:$0xff] %vm390_vm0, %v377_v3 }
  0x81   : > { %v759_v11 = vpack.c.b16 %v728_v8, %v727_v5 }
  0x83   : > { %v520_v42 = vpop.permute.xlu0 %519  ;;  %v516_v43 = vpop.permute.xlu1 %515  ;;  %4878 = vmatmul.msk.bf16.vlgmr.msra.gmra.mxu0 %vm327_vm2, %v759_v11  ;;  %4895 = vmatmul.msk.bf16.gmra.mxu1 %vm327_vm2, %v759_v11 }
  0x84   : > { %600 = vst.msk [vmem:[#allocation2 + $0xd9] sm:$0xff] %vm583_vm4, %v520_v42  ;;  %v530_v9 = vpop.permute.xlu2 %529  ;;  %v624_v34 = vld [vmem:[#allocation2 + $0x30] sm:$0xff] }
  0x85   : > { %598 = vst.msk [vmem:[#allocation2 + $0xc1] sm:$0xff] %vm583_vm4, %v516_v43  ;;  %v660_v37 = vpack.c.bf16 %v624_v34, %v624_v34 }
  0x86   : > { %605 = vst.msk [vmem:[#allocation2 + $0x111] sm:$0xff] %vm583_vm4, %v530_v9 }
  0x87   : > { %v729_v40 = vunpack.c.l.b16 %v660_v37 }
  0x8b   : > { %v522_v50 = vpop.permute.xlu0 %521  ;;  %v518_v51 = vpop.permute.xlu1 %517  ;;  %v638_v10 = vld [vmem:[#allocation2 + $0xd8] sm:$0xff] }
  0x8c   : > { %601 = vst.msk [vmem:[#allocation2 + $0xe1] sm:$0xff] %vm583_vm4, %v522_v50  ;;  %v674_v12 = vpack.c.bf16 %v638_v10, %v638_v10  ;;  %v636_v13 = vld [vmem:[#allocation2 + $0xc0] sm:$0xff]  ;;  %v532_v25 = vpop.permute.xlu2 %531 }
  0x8d   : > { %599 = vst.msk [vmem:[#allocation2 + $0xc9] sm:$0xff] %vm583_vm4, %v518_v51  ;;  %v672_v17 = vpack.c.bf16 %v636_v13, %v636_v13 }
  0x8e   : > { %v743_v20 = vunpack.c.l.b16 %v674_v12  ;;  %606 = vst.msk [vmem:[#allocation2 + $0x121] sm:$0xff] %vm583_vm4, %v532_v25 }
  0x8f   : > { %v741_v28 = vunpack.c.l.b16 %v672_v17 }
  0x93   : > { %v526_v60 = vpop.permute.xlu1 %525  ;;  %v524_v61 = vpop.permute.xlu0 %523  ;;  %v639_v15 = vld [vmem:[#allocation2 + $0xe0] sm:$0xff] }
  0x94   : > { %602 = vst.msk [vmem:[#allocation2 + $0xf1] sm:$0xff] %vm583_vm4, %v524_v61  ;;  %v675_v16 = vpack.c.bf16 %v639_v15, %v639_v15  ;;  %v637_v22 = vld [vmem:[#allocation2 + $0xc8] sm:$0xff]  ;;  %v502_v46 = vpop.permute.xlu2 %501 }
  0x95   : > { %603 = vst.msk [vmem:[#allocation2 + $0xf9] sm:$0xff] %vm583_vm4, %v526_v60  ;;  %v673_v24 = vpack.c.bf16 %v637_v22, %v637_v22  ;;  %v386_v61 = vld [vmem:[%s5665_s15 + $0x68] sm:$0xff]  ;;  %v644_v15 = vld [vmem:[#allocation2 + $0x120] sm:$0xff] }
  0x96   : > { %v744_v21 = vunpack.c.l.b16 %v675_v16  ;;  %591 = vst.msk [vmem:[#allocation2 + $0x69] sm:$0xff] %vm583_vm4, %v502_v46 }
  0x97   : > { %v742_v30 = vunpack.c.l.b16 %v673_v24  ;;  %416 = vst.msk [vmem:[#allocation2 + $0x141] sm:$0xff] %vm390_vm0, %v386_v61 }
  0x98   : > { %v5859_v26 = vpack.c.b16 %v744_v21, %v743_v20  ;;  %418 = vst.msk [vmem:[#allocation2 + $0x159] sm:$0xff] %vm390_vm0, %v386_v61  ;;  %v680_v20 = vpack.c.bf16 %v644_v15, %v644_v15  ;;  %v4961_v61 = vld [vmem:[%s7543_s2 + $0x1c] sm:$0xf] }
  0x99   : > { %v5868_v33 = vpack.c.b16 %v742_v30, %v741_v28 }
  0x9a   : > { %4886 = vmatmul.msk.bf16.vlgmr.msra.gmra.mxu2 %vm327_vm2, %v5859_v26  ;;  %v749_v24 = vunpack.c.l.b16 %v680_v20 }
  0x9b   : > { %v528_v6 = vpop.permute.xlu1 %527  ;;  %v494_v7 = vpop.permute.xlu0 %493  ;;  %v640_v31 = vld [vmem:[#allocation2 + $0xf0] sm:$0xff]  ;;  %4902 = vmatmul.msk.bf16.vlgmr.msra.gmra.mxu3 %vm327_vm2, %v5868_v33 }
  0x9c   : > { %587 = vst.msk [vmem:[#allocation2 + $0x39] sm:$0xff] %vm583_vm4, %v494_v7  ;;  %v641_v36 = vld [vmem:[#allocation2 + $0xf8] sm:$0xff]  ;;  %v676_v42 = vpack.c.bf16 %v640_v31, %v640_v31 }
  0x9d   : > { %604 = vst.msk [vmem:[#allocation2 + $0x109] sm:$0xff] %vm583_vm4, %v528_v6  ;;  %v677_v43 = vpack.c.bf16 %v641_v36, %v641_v36  ;;  %v504_v6 = vpop.permute.xlu2 %503 }
  0x9e   : > { %v745_v47 = vunpack.c.l.b16 %v676_v42  ;;  %592 = vst.msk [vmem:[#allocation2 + $0x79] sm:$0xff] %vm583_vm4, %v504_v6 }
  0x9f   : > { %v746_v48 = vunpack.c.l.b16 %v677_v43 }
  0xa1   : > { %v5890_v53 = vpack.c.b16 %v746_v48, %v745_v47 }
  0xa3   : > { %v496_v19 = vpop.permute.xlu0 %495  ;;  %v498_v23 = vpop.permute.xlu1 %497  ;;  %v625_v35 = vld [vmem:[#allocation2 + $0x38] sm:$0xff] }
  0xa4   : > { %589 = vst.msk [vmem:[#allocation2 + $0x51] sm:$0xff] %vm583_vm4, %v498_v23  ;;  %v661_v38 = vpack.c.bf16 %v625_v35, %v625_v35  ;;  %v642_v58 = vld [vmem:[#allocation2 + $0x108] sm:$0xff]  ;;  %v643_v59 = vld [vmem:[#allocation2 + $0x110] sm:$0xff] }
  0xa5   : > { %588 = vst.msk [vmem:[#allocation2 + $0x49] sm:$0xff] %vm583_vm4, %v496_v19  ;;  %v678_v63 = vpack.c.bf16 %v642_v58, %v642_v58  ;;  %v679_v0 = vpack.c.bf16 %v643_v59, %v643_v59  ;;  %v542_v22 = vpop.permute.xlu2 %541  ;;  %v387_v23 = vld [vmem:[%s5665_s15 + $0x70] sm:$0xff]  ;;  %v630_v27 = vld [vmem:[#allocation2 + $0x78] sm:$0xff] }
  0xa6   : > { %v730_v41 = vunpack.c.l.b16 %v661_v38  ;;  %611 = vst.msk [vmem:[#allocation2 + $0x159] sm:$0xff] %vm583_vm4, %v542_v22  ;;  %v666_v31 = vpack.c.bf16 %v630_v27, %v630_v27  ;;  %v1155_v22 = vld [vmem:[#allocation2 + $0x39] sm:$0xff]  ;;  %v936_v27 = vpop.f32.mrf.mxu1 }
  0xa7   : > { %v747_v4 = vunpack.c.l.b16 %v678_v63  ;;  %v748_v5 = vunpack.c.l.b16 %v679_v0  ;;  %419 = vst.msk [vmem:[#allocation2 + $0x169] sm:$0xff] %vm390_vm0, %v387_v23 }
  0xa8   : > { %v5877_v45 = vpack.c.b16 %v730_v41, %v729_v40  ;;  %421 = vst.msk [vmem:[#allocation2 + $0x181] sm:$0xff] %vm390_vm0, %v387_v23  ;;  %v735_v35 = vunpack.c.l.b16 %v666_v31  ;;  %v388_v41 = vld [vmem:[%s5665_s15 + $0x78] sm:$0xff] }
  0xa9   : > { %v5915_v10 = vpack.c.b16 %v748_v5, %v747_v4  ;;  %420 = vst.msk [vmem:[#allocation2 + $0x171] sm:$0xff] %vm390_vm0, %v388_v41 }
  0xaa   : > { %4879 = vmatmul.msk.bf16.gmra.mxu0 %vm327_vm2, %v5877_v45  ;;  %4896 = vmatmul.msk.bf16.gmra.mxu1 %vm327_vm2, %v5877_v45  ;;  %422 = vst.msk [vmem:[#allocation2 + $0x189] sm:$0xff] %vm390_vm0, %v388_v41  ;;  %v5012_v41 = vld [vmem:[%s7543_s2 + $0x20] sm:$0xf] }
  0xab   : > { %v534_v39 = vpop.permute.xlu0 %533  ;;  %v500_v44 = vpop.permute.xlu1 %499  ;;  %4887 = vmatmul.msk.bf16.gmra.mxu2 %vm327_vm2, %v5890_v53  ;;  %4903 = vmatmul.msk.bf16.gmra.mxu3 %vm327_vm2, %v5859_v26 }
  0xac   : > { %590 = vst.msk [vmem:[#allocation2 + $0x61] sm:$0xff] %vm583_vm4, %v500_v44  ;;  %v626_v50 = vld [vmem:[#allocation2 + $0x48] sm:$0xff]  ;;  %v627_v51 = vld [vmem:[#allocation2 + $0x50] sm:$0xff] }
  0xad   : > { %607 = vst.msk [vmem:[#allocation2 + $0x129] sm:$0xff] %vm583_vm4, %v534_v39  ;;  %v662_v54 = vpack.c.bf16 %v626_v50, %v626_v50  ;;  %v663_v55 = vpack.c.bf16 %v627_v51, %v627_v51  ;;  %v544_v34 = vpop.permute.xlu2 %543 }
  0xae   : > { %612 = vst.msk [vmem:[#allocation2 + $0x169] sm:$0xff] %vm583_vm4, %v544_v34 }
  0xaf   : > { %v731_v56 = vunpack.c.l.b16 %v662_v54  ;;  %v732_v57 = vunpack.c.l.b16 %v663_v55 }
  0xb1   : > { %v5899_v62 = vpack.c.b16 %v732_v57, %v731_v56 }
  0xb3   : > { %v536_v52 = vpop.permute.xlu0 %535  ;;  %v538_v60 = vpop.permute.xlu1 %537  ;;  %v628_v7 = vld [vmem:[#allocation2 + $0x60] sm:$0xff]  ;;  %v629_v8 = vld [vmem:[#allocation2 + $0x68] sm:$0xff] }
  0xb4   : > { %608 = vst.msk [vmem:[#allocation2 + $0x139] sm:$0xff] %vm583_vm4, %v536_v52  ;;  %v664_v11 = vpack.c.bf16 %v628_v7, %v628_v7  ;;  %v665_v12 = vpack.c.bf16 %v629_v8, %v629_v8  ;;  %v645_v16 = vld [vmem:[#allocation2 + $0x128] sm:$0xff] }
  0xb5   : > { %609 = vst.msk [vmem:[#allocation2 + $0x141] sm:$0xff] %vm583_vm4, %v538_v60  ;;  %v681_v21 = vpack.c.bf16 %v645_v16, %v645_v16  ;;  %v514_v46 = vpop.permute.xlu2 %513 }
  0xb6   : > { %v733_v13 = vunpack.c.l.b16 %v664_v11  ;;  %v734_v14 = vunpack.c.l.b16 %v665_v12  ;;  %597 = vst.msk [vmem:[#allocation2 + $0xb1] sm:$0xff] %vm583_vm4, %v514_v46  ;;  %v2215_v46 = vsel %vm823_vm1, %v5012_v41, 0 }
  0xb7   : > { %v750_v25 = vunpack.c.l.b16 %v681_v21  ;;  %v1154_v21 = vld [vmem:[#allocation2 + $0x31] sm:$0xff]  ;;  %2224 = vmatpush.bf16.msra.mxu0 %v2215_v46 }
  0xb8   : > { %v5923_v19 = vpack.c.b16 %v734_v14, %v733_v13  ;;  %v650_v13 = vld [vmem:[#allocation2 + $0x168] sm:$0xff] }
  0xb9   : > { %v5935_v30 = vpack.c.b16 %v750_v25, %v749_v24  ;;  %v686_v16 = vpack.c.bf16 %v650_v13, %v650_v13  ;;  %v1190_v24 = vpack.c.bf16 %v1154_v21, %v1154_v21  ;;  %v1191_v25 = vpack.c.bf16 %v1155_v22, %v1155_v22 }
  0xba   : > { %4880 = vmatmul.msk.bf16.gmra.mxu0 %vm327_vm2, %v5899_v62  ;;  %4897 = vmatmul.msk.bf16.gmra.mxu1 %vm327_vm2, %v5899_v62 }
  0xbb   : > { %v506_v2 = vpop.permute.xlu0 %505  ;;  %v540_v9 = vpop.permute.xlu1 %539  ;;  %4888 = vmatmul.msk.bf16.gmra.mxu2 %vm327_vm2, %v5915_v10  ;;  %4904 = vmatmul.msk.bf16.gmra.mxu3 %vm327_vm2, %v5890_v53  ;;  %v646_v37 = vld [vmem:[#allocation2 + $0x138] sm:$0xff]  ;;  %v1261_v34 = vunpack.c.l.b16 %v1191_v25 }
  0xbc   : > { %593 = vst.msk [vmem:[#allocation2 + $0x81] sm:$0xff] %vm583_vm4, %v506_v2  ;;  %v647_v38 = vld [vmem:[#allocation2 + $0x140] sm:$0xff]  ;;  %v682_v43 = vpack.c.bf16 %v646_v37, %v646_v37  ;;  %v1621_v2 = vsel %vm823_vm1, %v4961_v61, 0 }
  0xbd   : > { %610 = vst.msk [vmem:[#allocation2 + $0x151] sm:$0xff] %vm583_vm4, %v540_v9  ;;  %v683_v44 = vpack.c.bf16 %v647_v38, %v647_v38  ;;  %1630 = vmatpush.bf16.msrb.mxu1 %v1621_v2  ;;  %v1947_v38 = vsel %vm823_vm1, %v4978_v29, 0  ;;  %v1151_v2 = vld [vmem:[#allocation2 + $0x9] sm:$0xff] }
  0xbe   : > { %v751_v47 = vunpack.c.l.b16 %v682_v43  ;;  %1956 = vmatpush.bf16.msra.mxu2 %v1947_v38 }
  0xbf   : > { %v752_v48 = vunpack.c.l.b16 %v683_v44 }
  0xc1   : > { %v5954_v51 = vpack.c.b16 %v752_v48, %v751_v47  ;;  %v1152_v47 = vld [vmem:[#allocation2 + $0x19] sm:$0xff]  ;;  %v938_v48 = vpop.f32.mrf.mxu1 }
  0xc3   : > { %v510_v17 = vpop.permute.xlu1 %509  ;;  %v508_v18 = vpop.permute.xlu0 %507  ;;  %v631_v28 = vld [vmem:[#allocation2 + $0x80] sm:$0xff] }
  0xc4   : > { %595 = vst.msk [vmem:[#allocation2 + $0x99] sm:$0xff] %vm583_vm4, %v510_v17  ;;  %v667_v32 = vpack.c.bf16 %v631_v28, %v631_v28  ;;  %v648_v57 = vld [vmem:[#allocation2 + $0x150] sm:$0xff]  ;;  %v649_v58 = vld [vmem:[#allocation2 + $0x158] sm:$0xff]  ;;  %v1161_v38 = vld [vmem:[#allocation2 + $0x81] sm:$0xff] }
  0xc5   : > { %594 = vst.msk [vmem:[#allocation2 + $0x91] sm:$0xff] %vm583_vm4, %v508_v18  ;;  %v684_v0 = vpack.c.bf16 %v648_v57, %v648_v57  ;;  %v685_v1 = vpack.c.bf16 %v649_v58, %v649_v58  ;;  %v755_v18 = vunpack.c.l.b16 %v686_v16  ;;  %v1159_v16 = vld [vmem:[#allocation2 + $0x69] sm:$0xff] }
  0xc6   : > { %v736_v36 = vunpack.c.l.b16 %v667_v32  ;;  %v1260_v32 = vunpack.c.l.b16 %v1190_v24  ;;  %v1195_v22 = vpack.c.bf16 %v1159_v16, %v1159_v16 }
  0xc7   : > { %v753_v3 = vunpack.c.l.b16 %v684_v0  ;;  %v754_v4 = vunpack.c.l.b16 %v685_v1  ;;  %v1150_v1 = vld [vmem:[#allocation2 + $0x1] sm:$0xff] }
  0xc8   : > { %v5943_v42 = vpack.c.b16 %v736_v36, %v735_v35  ;;  %v4995_v35 = vld [vmem:[%s7543_s2 + $0x14] sm:$0xf] }
  0xc9   : > { %v5972_v7 = vpack.c.b16 %v754_v4, %v753_v3 }
  0xca   : > { %4881 = vmatmul.msk.bf16.gmra.mxu0 %vm327_vm2, %v5923_v19  ;;  %4898 = vmatmul.msk.bf16.gmra.mxu1 %vm327_vm2, %v5923_v19 }
  0xcb   : > { %4889 = vmatmul.msk.bf16.gmra.mxu2 %vm327_vm2, %v5935_v30  ;;  %4905 = vmatmul.msk.bf16.gmra.mxu3 %vm327_vm2, %v5915_v10  ;;  %v512_v39 = vpop.permute.xlu1 %511  ;;  %v546_v40 = vpop.permute.xlu0 %545 }
  0xcc   : > { %596 = vst.msk [vmem:[#allocation2 + $0xa9] sm:$0xff] %vm583_vm4, %v512_v39  ;;  %v632_v49 = vld [vmem:[#allocation2 + $0x90] sm:$0xff]  ;;  %v633_v50 = vld [vmem:[#allocation2 + $0x98] sm:$0xff]  ;;  %v2081_v39 = vsel %vm823_vm1, %v4995_v35, 0 }
  0xcd   : > { %613 = vst.msk [vmem:[#allocation2 + $0x171] sm:$0xff] %vm583_vm4, %v546_v40  ;;  %v668_v52 = vpack.c.bf16 %v632_v49, %v632_v49  ;;  %v669_v54 = vpack.c.bf16 %v633_v50, %v633_v50  ;;  %2090 = vmatpush.bf16.msra.mxu3 %v2081_v39  ;;  %v6004_v40 = vpack.c.b16 %v1261_v34, %v1260_v32  ;;  %v1153_v49 = vld [vmem:[#allocation2 + $0x21] sm:$0xff]  ;;  %v1156_v50 = vld [vmem:[#allocation2 + $0x49] sm:$0xff] }
  0xce   : > { %v1192_v57 = vpack.c.bf16 %v1156_v50, %v1156_v50 }
  0xcf   : > { %v737_v55 = vunpack.c.l.b16 %v668_v52  ;;  %v738_v56 = vunpack.c.l.b16 %v669_v54  ;;  %v1157_v52 = vld [vmem:[#allocation2 + $0x51] sm:$0xff] }
  0xd0   : > { %v1193_v58 = vpack.c.bf16 %v1157_v52, %v1157_v52  ;;  %v1262_v61 = vunpack.c.l.b16 %v1192_v57 }
  0xd1   : > { %v5963_v63 = vpack.c.b16 %v738_v56, %v737_v55  ;;  %v1188_v55 = vpack.c.bf16 %v1152_v47, %v1152_v47  ;;  %v1189_v56 = vpack.c.bf16 %v1153_v49, %v1153_v49  ;;  %v1197_v47 = vpack.c.bf16 %v1161_v38, %v1161_v38 }
  0xd2   : > { %v1263_v0 = vunpack.c.l.b16 %v1193_v58 }
  0xd3   : > { %v550_v59 = vpop.permute.xlu1 %549  ;;  %v548_v60 = vpop.permute.xlu0 %547  ;;  %v634_v5 = vld [vmem:[#allocation2 + $0xa8] sm:$0xff]  ;;  %v635_v6 = vld [vmem:[#allocation2 + $0xb0] sm:$0xff]  ;;  %v1267_v50 = vunpack.c.l.b16 %v1197_v47 }
  0xd4   : > { %615 = vst.msk [vmem:[#allocation2 + $0x189] sm:$0xff] %vm583_vm4, %v550_v59  ;;  %v670_v8 = vpack.c.bf16 %v634_v5, %v634_v5  ;;  %v671_v9 = vpack.c.bf16 %v635_v6, %v635_v6  ;;  %v651_v14 = vld [vmem:[#allocation2 + $0x170] sm:$0xff]  ;;  %v1258_v59 = vunpack.c.l.b16 %v1188_v55 }
  0xd5   : > { %614 = vst.msk [vmem:[#allocation2 + $0x181] sm:$0xff] %vm583_vm4, %v548_v60  ;;  %v687_v17 = vpack.c.bf16 %v651_v14, %v651_v14  ;;  %v1259_v60 = vunpack.c.l.b16 %v1189_v56  ;;  %v1158_v14 = vld [vmem:[#allocation2 + $0x61] sm:$0xff] }
  0xd6   : > { %v739_v11 = vunpack.c.l.b16 %v670_v8  ;;  %v740_v12 = vunpack.c.l.b16 %v671_v9  ;;  %v6022_v8 = vpack.c.b16 %v1263_v0, %v1262_v61  ;;  %v1186_v9 = vpack.c.bf16 %v1150_v1, %v1150_v1  ;;  %v1162_v61 = vld [vmem:[#allocation2 + $0x91] sm:$0xff]  ;;  %v1163_v0 = vld [vmem:[#allocation2 + $0x99] sm:$0xff] }
  0xd7   : > { %v756_v20 = vunpack.c.l.b16 %v687_v17  ;;  %v1289_v6 = vpack.c.b16 %v1259_v60, %v1258_v59  ;;  %v1194_v21 = vpack.c.bf16 %v1158_v14, %v1158_v14 }
  0xd8   : > { %v5978_v15 = vpack.c.b16 %v740_v12, %v739_v11  ;;  %v1187_v11 = vpack.c.bf16 %v1151_v2, %v1151_v2  ;;  %v1256_v12 = vunpack.c.l.b16 %v1186_v9  ;;  %v1199_v9 = vpack.c.bf16 %v1163_v0, %v1163_v0 }
  0xd9   : > { %v5990_v23 = vpack.c.b16 %v756_v20, %v755_v18  ;;  %v1264_v25 = vunpack.c.l.b16 %v1194_v21 }
  0xda   : > { %4882 = vmatmul.msk.bf16.gmra.mxu0 %vm327_vm2, %v5943_v42  ;;  %4899 = vmatmul.msk.bf16.gmra.mxu1 %vm327_vm2, %v5943_v42  ;;  %v1257_v13 = vunpack.c.l.b16 %v1187_v11 }
  0xdb   : > { %4890 = vmatmul.msk.bf16.gmra.mxu2 %vm327_vm2, %v5954_v51  ;;  %4906 = vmatmul.msk.bf16.gmra.mxu3 %vm327_vm2, %v5935_v30 }
  0xdc   : > { %v652_v28 = vld [vmem:[#allocation2 + $0x180] sm:$0xff]  ;;  %v653_v31 = vld [vmem:[#allocation2 + $0x188] sm:$0xff]  ;;  %v1288_v24 = vpack.c.b16 %v1257_v13, %v1256_v12  ;;  %v1269_v13 = vunpack.c.l.b16 %v1199_v9 }
  0xdd   : > { %v688_v36 = vpack.c.bf16 %v652_v28, %v652_v28  ;;  %v689_v37 = vpack.c.bf16 %v653_v31, %v653_v31 }
  0xdf   : > { %v757_v43 = vunpack.c.l.b16 %v688_v36  ;;  %v758_v44 = vunpack.c.l.b16 %v689_v37  ;;  %v1160_v37 = vld [vmem:[#allocation2 + $0x79] sm:$0xff] }
  0xe0   : > { %v1196_v46 = vpack.c.bf16 %v1160_v37, %v1160_v37 }
  0xe1   : > { %v6014_v54 = vpack.c.b16 %v758_v44, %v757_v43 }
  0xe2   : > { %v1266_v49 = vunpack.c.l.b16 %v1196_v46 }
  0xe4   : > { %v6051_v59 = vpack.c.b16 %v1267_v50, %v1266_v49 }
  0xea   : > { %4883 = vmatmul.msk.bf16.gmra.mxu0 %vm327_vm2, %v5963_v63  ;;  %4900 = vmatmul.msk.bf16.gmra.mxu1 %vm327_vm2, %v5963_v63 }
  0xeb   : > { %4891 = vmatmul.msk.bf16.gmra.mxu2 %vm327_vm2, %v5972_v7  ;;  %4907 = vmatmul.msk.bf16.gmra.mxu3 %vm327_vm2, %v5954_v51 }
  0xfa   : > { %4884 = vmatmul.msk.bf16.gmra.mxu0 %vm327_vm2, %v5978_v15  ;;  %4901 = vmatmul.msk.bf16.gmra.mxu1 %vm327_vm2, %v5978_v15 }
  0xfb   : > { %4892 = vmatmul.msk.bf16.gmra.mxu2 %vm327_vm2, %v5990_v23  ;;  %4908 = vmatmul.msk.bf16.gmra.mxu3 %vm327_vm2, %v5972_v7 }
 0x100   : > { %v836_v3 = vpop.f32.mrf.mxu0  ;;  %v941_v4 = vpop.f32.mrf.mxu1 }
 0x101   : > { %v6020_v5 = vadd.f32 %v936_v27, %v836_v3  ;;  %v1265_v27 = vunpack.c.l.b16 %v1195_v22 }
 0x103   : > { %v6034_v35 = vpack.c.b16 %v1265_v27, %v1264_v25  ;;  %v1164_v25 = vld [vmem:[#allocation2 + $0xa9] sm:$0xff]  ;;  %v1165_v27 = vld [vmem:[#allocation2 + $0xb1] sm:$0xff] }
 0x108   : > { %v838_v17 = vpop.f32.mrf.mxu0  ;;  %v943_v18 = vpop.f32.mrf.mxu1 }
 0x109   : > { %v6027_v20 = vadd.f32 %v938_v48, %v838_v17 }
 0x10a   : > { %4885 = vmatmul.msk.bf16.gmra.mxu0 %vm327_vm2, %v5868_v33  ;;  %4962 = vmatmul.msk.bf16.vlgmr.msrb.gmra.mxu1 %vm327_vm2, %v6004_v40 }
 0x10b   : > { %4893 = vmatmul.msk.bf16.gmra.mxu2 %vm327_vm2, %v6014_v54  ;;  %4909 = vmatmul.msk.bf16.gmra.mxu3 %vm327_vm2, %v5990_v23 }
 0x11a   : > { %4945 = vmatmul.msk.bf16.vlgmr.msrb.gmra.mxu0 %vm327_vm2, %v1289_v6  ;;  %4963 = vmatmul.msk.bf16.gmra.mxu1 %vm327_vm2, %v6022_v8 }
 0x11b   : > { %4911 = vmatmul.msk.bf16.vlgmr.msrb.gmra.mxu2 %vm327_vm2, %v5877_v45  ;;  %4928 = vmatmul.msk.bf16.vlgmr.msrb.gmra.mxu3 %vm327_vm2, %v1288_v24 }
 0x11d   : > { %v876_v28 = vpop.f32.mrf.mxu2 }
 0x11e   : > { %v976_v34 = vpop.f32.mrf.mxu3 }
 0x11f   : > { %v6036_v36 = vadd.f32 %v976_v34, %v876_v28  ;;  %v1200_v34 = vpack.c.bf16 %v1164_v25, %v1164_v25 }
 0x121   : > { %v1270_v38 = vunpack.c.l.b16 %v1200_v34 }
 0x125   : > { %v878_v45 = vpop.f32.mrf.mxu2 }
 0x126   : > { %v978_v43 = vpop.f32.mrf.mxu3 }
 0x127   : > { %v841_v31 = vpop.f32.mrf.mxu0  ;;  %v946_v32 = vpop.f32.mrf.mxu1  ;;  %v6044_v48 = vadd.f32 %v978_v43, %v878_v45  ;;  %v1201_v45 = vpack.c.bf16 %v1165_v27, %v1165_v27  ;;  %v1168_v27 = vld [vmem:[#allocation2 + $0xd9] sm:$0xff] }
 0x128   : > { %v6032_v29 = vadd.f32 %v941_v4, %v841_v31 }
 0x12a   : > { %4946 = vmatmul.msk.bf16.gmra.mxu0 %vm327_vm2, %v6004_v40  ;;  %4964 = vmatmul.msk.bf16.gmra.mxu1 %vm327_vm2, %v6034_v35 }
 0x12b   : > { %4912 = vmatmul.msk.bf16.gmra.mxu2 %vm327_vm2, %v5899_v62  ;;  %4929 = vmatmul.msk.bf16.gmra.mxu3 %vm327_vm2, %v1289_v6  ;;  %v1198_v6 = vpack.c.bf16 %v1162_v61, %v1162_v61 }
 0x12d   : > { %v1268_v12 = vunpack.c.l.b16 %v1198_v6 }
 0x12e   : > { %v881_v52 = vpop.f32.mrf.mxu2  ;;  %v981_v57 = vpop.f32.mrf.mxu3 }
 0x12f   : > { %v843_v39 = vpop.f32.mrf.mxu0  ;;  %v948_v41 = vpop.f32.mrf.mxu1  ;;  %v6053_v60 = vadd.f32 %v981_v57, %v881_v52  ;;  %v6069_v22 = vpack.c.b16 %v1269_v13, %v1268_v12  ;;  %v1166_v57 = vld [vmem:[#allocation2 + $0xc1] sm:$0xff] }
 0x130   : > { %v6042_v44 = vadd.f32 %v943_v18, %v843_v39  ;;  %v1271_v39 = vunpack.c.l.b16 %v1201_v45  ;;  %v1204_v45 = vpack.c.bf16 %v1168_v27, %v1168_v27 }
 0x132   : > { %v6087_v50 = vpack.c.b16 %v1271_v39, %v1270_v38 }
 0x136   : > { %v883_v62 = vpop.f32.mrf.mxu2  ;;  %v983_v3 = vpop.f32.mrf.mxu3 }
 0x137   : > { %v846_v55 = vpop.f32.mrf.mxu0  ;;  %v951_v56 = vpop.f32.mrf.mxu1  ;;  %v6061_v11 = vadd.f32 %v983_v3, %v883_v62 }
 0x138   : > { %v6049_v58 = vadd.f32 %v946_v32, %v846_v55  ;;  %v1167_v55 = vld [vmem:[#allocation2 + $0xc9] sm:$0xff] }
 0x139   : > { %v1203_v0 = vpack.c.bf16 %v1167_v55, %v1167_v55 }
 0x13a   : > { %4947 = vmatmul.msk.bf16.gmra.mxu0 %vm327_vm2, %v6022_v8  ;;  %4965 = vmatmul.msk.bf16.gmra.mxu1 %vm327_vm2, %v6051_v59 }
 0x13b   : > { %4913 = vmatmul.msk.bf16.gmra.mxu2 %vm327_vm2, %v5923_v19  ;;  %4930 = vmatmul.msk.bf16.gmra.mxu3 %vm327_vm2, %v6004_v40  ;;  %v1273_v3 = vunpack.c.l.b16 %v1203_v0 }
 0x13e   : > { %v886_v14 = vpop.f32.mrf.mxu2  ;;  %v986_v18 = vpop.f32.mrf.mxu3 }
 0x13f   : > { %v848_v1 = vpop.f32.mrf.mxu0  ;;  %v953_v2 = vpop.f32.mrf.mxu1  ;;  %v6071_v24 = vadd.f32 %v986_v18, %v886_v14 }
 0x140   : > { %v6059_v4 = vadd.f32 %v948_v41, %v848_v1 }
 0x146   : > { %v888_v19 = vpop.f32.mrf.mxu2  ;;  %v988_v31 = vpop.f32.mrf.mxu3 }
 0x147   : > { %v851_v16 = vpop.f32.mrf.mxu0  ;;  %v956_v17 = vpop.f32.mrf.mxu1  ;;  %v6079_v37 = vadd.f32 %v988_v31, %v888_v19  ;;  %v1169_v19 = vld [vmem:[#allocation2 + $0xe1] sm:$0xff] }
 0x148   : > { %v6067_v21 = vadd.f32 %v951_v56, %v851_v16  ;;  %v1205_v31 = vpack.c.bf16 %v1169_v19, %v1169_v19 }
 0x14a   : > { %4948 = vmatmul.msk.bf16.gmra.mxu0 %vm327_vm2, %v6034_v35  ;;  %4966 = vmatmul.msk.bf16.gmra.mxu1 %vm327_vm2, %v6069_v22  ;;  %v1275_v38 = vunpack.c.l.b16 %v1205_v31  ;;  %v1172_v31 = vld [vmem:[#allocation2 + $0x109] sm:$0xff] }
 0x14b   : > { %4914 = vmatmul.msk.bf16.gmra.mxu2 %vm327_vm2, %v5943_v42  ;;  %4931 = vmatmul.msk.bf16.gmra.mxu3 %vm327_vm2, %v6022_v8 }
 0x14e   : > { %v891_v41 = vpop.f32.mrf.mxu2  ;;  %v991_v47 = vpop.f32.mrf.mxu3 }
 0x14f   : > { %v853_v40 = vpop.f32.mrf.mxu0  ;;  %v958_v28 = vpop.f32.mrf.mxu1  ;;  %v6089_v52 = vadd.f32 %v991_v47, %v891_v41  ;;  %v1274_v41 = vunpack.c.l.b16 %v1204_v45  ;;  %v1173_v45 = vld [vmem:[#allocation2 + $0x111] sm:$0xff] }
 0x150   : > { %v6077_v32 = vadd.f32 %v953_v2, %v853_v40  ;;  %v1202_v2 = vpack.c.bf16 %v1166_v57, %v1166_v57 }
 0x151   : > { %v6123_v55 = vpack.c.b16 %v1275_v38, %v1274_v41 }
 0x152   : > { %v1272_v9 = vunpack.c.l.b16 %v1202_v2 }
 0x156   : > { %v893_v42 = vpop.f32.mrf.mxu2  ;;  %v993_v62 = vpop.f32.mrf.mxu3 }
 0x157   : > { %v856_v43 = vpop.f32.mrf.mxu0  ;;  %v961_v46 = vpop.f32.mrf.mxu1  ;;  %v6097_v1 = vadd.f32 %v993_v62, %v893_v42 }
 0x158   : > { %v6085_v49 = vadd.f32 %v956_v17, %v856_v43  ;;  %v6105_v17 = vpack.c.b16 %v1273_v3, %v1272_v9 }
 0x15a   : > { %4949 = vmatmul.msk.bf16.gmra.mxu0 %vm327_vm2, %v6051_v59  ;;  %4967 = vmatmul.msk.bf16.gmra.mxu1 %vm327_vm2, %v6087_v50 }
 0x15b   : > { %4915 = vmatmul.msk.bf16.gmra.mxu2 %vm327_vm2, %v5963_v63  ;;  %4932 = vmatmul.msk.bf16.gmra.mxu3 %vm327_vm2, %v6034_v35 }
 0x15e   : > { %v896_v6 = vpop.f32.mrf.mxu2  ;;  %v996_v14 = vpop.f32.mrf.mxu3 }
 0x15f   : > { %v858_v56 = vpop.f32.mrf.mxu0  ;;  %v963_v8 = vpop.f32.mrf.mxu1  ;;  %v6107_v18 = vadd.f32 %v996_v14, %v896_v6 }
 0x160   : > { %v6095_v61 = vadd.f32 %v958_v28, %v858_v56 }
 0x166   : > { %v898_v63 = vpop.f32.mrf.mxu2  ;;  %v998_v40 = vpop.f32.mrf.mxu3 }
 0x167   : > { %v861_v12 = vpop.f32.mrf.mxu0  ;;  %v966_v13 = vpop.f32.mrf.mxu1  ;;  %v6115_v34 = vadd.f32 %v998_v40, %v898_v63 }
 0x168   : > { %v6103_v16 = vadd.f32 %v961_v46, %v861_v12 }
 0x16a   : > { %4950 = vmatmul.msk.bf16.gmra.mxu0 %vm327_vm2, %v6069_v22  ;;  %4968 = vmatmul.msk.bf16.gmra.mxu1 %vm327_vm2, %v6105_v17 }
 0x16b   : > { %4916 = vmatmul.msk.bf16.gmra.mxu2 %vm327_vm2, %v5978_v15  ;;  %4933 = vmatmul.msk.bf16.gmra.mxu3 %vm327_vm2, %v6051_v59  ;;  %v1171_v59 = vld [vmem:[#allocation2 + $0xf9] sm:$0xff] }
 0x16c   : > { %v1207_v6 = vpack.c.bf16 %v1171_v59, %v1171_v59 }
 0x16e   : > { %v901_v39 = vpop.f32.mrf.mxu2  ;;  %v1001_v47 = vpop.f32.mrf.mxu3 }
 0x16f   : > { %v863_v35 = vpop.f32.mrf.mxu0  ;;  %v968_v25 = vpop.f32.mrf.mxu1  ;;  %v6125_v56 = vadd.f32 %v1001_v47, %v901_v39 }
 0x170   : > { %v6113_v28 = vadd.f32 %v963_v8, %v863_v35  ;;  %v1170_v8 = vld [vmem:[#allocation2 + $0xf1] sm:$0xff] }
 0x171   : > { %v1206_v3 = vpack.c.bf16 %v1170_v8, %v1170_v8 }
 0x173   : > { %v1276_v12 = vunpack.c.l.b16 %v1206_v3 }
 0x176   : > { %v903_v15 = vpop.f32.mrf.mxu2  ;;  %v1003_v0 = vpop.f32.mrf.mxu3 }
 0x177   : > { %v866_v43 = vpop.f32.mrf.mxu0  ;;  %v971_v46 = vpop.f32.mrf.mxu1  ;;  %v6133_v9 = vadd.f32 %v1003_v0, %v903_v15 }
 0x178   : > { %v6121_v42 = vadd.f32 %v966_v13, %v866_v43  ;;  %v1277_v13 = vunpack.c.l.b16 %v1207_v6  ;;  %v1208_v43 = vpack.c.bf16 %v1172_v31, %v1172_v31 }
 0x17a   : > { %4951 = vmatmul.msk.bf16.gmra.mxu0 %vm327_vm2, %v6087_v50  ;;  %4969 = vmatmul.msk.bf16.gmra.mxu1 %vm327_vm2, %v6123_v55  ;;  %v1278_v15 = vunpack.c.l.b16 %v1208_v43 }
 0x17b   : > { %4917 = vmatmul.msk.bf16.gmra.mxu2 %vm327_vm2, %v5868_v33  ;;  %4934 = vmatmul.msk.bf16.gmra.mxu3 %vm327_vm2, %v6069_v22 }
 0x17e   : > { %v906_v14 = vpop.f32.mrf.mxu2  ;;  %v1006_v35 = vpop.f32.mrf.mxu3 }
 0x17f   : > { %v868_v57 = vpop.f32.mrf.mxu0  ;;  %v973_v62 = vpop.f32.mrf.mxu1  ;;  %v6143_v40 = vadd.f32 %v1006_v35, %v906_v14 }
 0x180   : > { %v6131_v2 = vadd.f32 %v968_v25, %v868_v57  ;;  %v6141_v25 = vpack.c.b16 %v1277_v13, %v1276_v12  ;;  %v1174_v12 = vld [vmem:[#allocation2 + $0x121] sm:$0xff]  ;;  %v1175_v13 = vld [vmem:[#allocation2 + $0x129] sm:$0xff] }
 0x181   : > { %v1210_v35 = vpack.c.bf16 %v1174_v12, %v1174_v12  ;;  %v1177_v12 = vld [vmem:[#allocation2 + $0x141] sm:$0xff] }
 0x186   : > { %v908_v33 = vpop.f32.mrf.mxu2  ;;  %v1008_v39 = vpop.f32.mrf.mxu3 }
 0x187   : > { %v871_v63 = vpop.f32.mrf.mxu0  ;;  %v1632_v19 = vpop.f32.mrf.mxu1  ;;  %v6151_v47 = vadd.f32 %v1008_v39, %v908_v33  ;;  %v1211_v33 = vpack.c.bf16 %v1175_v13, %v1175_v13 }
 0x188   : > { %v6139_v27 = vadd.f32 %v971_v46, %v871_v63  ;;  %v1209_v46 = vpack.c.bf16 %v1173_v45, %v1173_v45  ;;  %v1280_v45 = vunpack.c.l.b16 %v1210_v35 }
 0x18a   : > { %4952 = vmatmul.msk.bf16.gmra.mxu0 %vm327_vm2, %v6105_v17  ;;  %4970 = vmatmul.msk.bf16.gmra.mxu1 %vm327_vm2, %v6141_v25  ;;  %v1279_v8 = vunpack.c.l.b16 %v1209_v46 }
 0x18b   : > { %4918 = vmatmul.msk.bf16.gmra.mxu2 %vm327_vm2, %v5859_v26  ;;  %4935 = vmatmul.msk.bf16.gmra.mxu3 %vm327_vm2, %v6087_v50 }
 0x18c   : > { %v6157_v6 = vpack.c.b16 %v1279_v8, %v1278_v15 }
 0x18e   : > { %v911_v59 = vpop.f32.mrf.mxu2  ;;  %v1011_v3 = vpop.f32.mrf.mxu3 }
 0x18f   : > { %v873_v22 = vpop.f32.mrf.mxu0  ;;  %v1634_v38 = vpop.f32.mrf.mxu1 }
 0x190   : > { %v6149_v41 = vadd.f32 %v973_v62, %v873_v22  ;;  %v6159_v62 = vadd.f32 %v1011_v3, %v911_v59  ;;  %v1281_v22 = vunpack.c.l.b16 %v1211_v33 }
 0x192   : > { %v6176_v59 = vpack.c.b16 %v1281_v22, %v1280_v45 }
 0x196   : > { %v913_v26 = vpop.f32.mrf.mxu2  ;;  %v1013_v50 = vpop.f32.mrf.mxu3 }
 0x197   : > { %v1498_v57 = vpop.f32.mrf.mxu0  ;;  %v1637_v0 = vpop.f32.mrf.mxu1  ;;  %v6167_v31 = vadd.f32 %v1013_v50, %v913_v26 }
 0x19a   : > { %4953 = vmatmul.msk.bf16.gmra.mxu0 %vm327_vm2, %v6123_v55  ;;  %4971 = vmatmul.msk.bf16.gmra.mxu1 %vm327_vm2, %v6157_v6 }
 0x19b   : > { %4919 = vmatmul.msk.bf16.gmra.mxu2 %vm327_vm2, %v5890_v53  ;;  %4936 = vmatmul.msk.bf16.gmra.mxu3 %vm327_vm2, %v6105_v17  ;;  %v5465_v17 = vld [vmem:[%s7546_s5 + $0xf8] sm:$0xff] }
 0x19c   : > { %2765 = vmatpush.bf16.msra.mxu1 %v5465_v17 }
 0x19e   : > { %v1038_v39 = vpop.f32.mrf.mxu2  ;;  %v1364_v8 = vpop.f32.mrf.mxu3 }
 0x19f   : > { %v1500_v14 = vpop.f32.mrf.mxu0  ;;  %v6165_v63 = vpop.f32.mrf.mxu1  ;;  %v1118_v43 = vadd.f32 %v1038_v39, %v6020_v5  ;;  %v1176_v5 = vld [vmem:[#allocation2 + $0x139] sm:$0xff]  ;;  %v1213_v39 = vpack.c.bf16 %v1177_v12, %v1177_v12 }
 0x1a0   : > { %v1212_v22 = vpack.c.bf16 %v1176_v5, %v1176_v5 }
 0x1a1   : > { %v1444_v3 = vadd.f32 %v1364_v8, %v1118_v43 }
 0x1a2   : > { %v1282_v8 = vunpack.c.l.b16 %v1212_v22 }
 0x1a3   : > { %v1578_v53 = vadd.f32 %v1498_v57, %v1444_v3  ;;  %v1283_v3 = vunpack.c.l.b16 %v1213_v39 }
 0x1a5   : > { %v6185_v13 = vadd.f32 %v1632_v19, %v1578_v53  ;;  %v6199_v12 = vpack.c.b16 %v1283_v3, %v1282_v8 }
 0x1a6   : > { %v1040_v26 = vpop.f32.mrf.mxu2  ;;  %v1366_v45 = vpop.f32.mrf.mxu3 }
 0x1a7   : > { %v1503_v46 = vpop.f32.mrf.mxu0  ;;  %v6174_v15 = vpop.f32.mrf.mxu1  ;;  %v1119_v50 = vadd.f32 %v1040_v26, %v6027_v20 }
 0x1a9   : > { %v1445_v43 = vadd.f32 %v1366_v45, %v1119_v50 }
 0x1aa   : > { %4954 = vmatmul.msk.bf16.gmra.mxu0 %vm327_vm2, %v6141_v25  ;;  %4972 = vmatmul.msk.bf16.gmra.mxu1 %vm327_vm2, %v6176_v59 }
 0x1ab   : > { %4920 = vmatmul.msk.bf16.gmra.mxu2 %vm327_vm2, %v5915_v10  ;;  %v1579_v57 = vadd.f32 %v1500_v14, %v1445_v43  ;;  %4937 = vmatmul.msk.bf16.gmra.mxu3 %vm327_vm2, %v6123_v55  ;;  %v1178_v14 = vld [vmem:[#allocation2 + $0x151] sm:$0xff] }
 0x1ad   : > { %v6194_v53 = vadd.f32 %v1634_v38, %v1579_v57  ;;  %v1179_v38 = vld [vmem:[#allocation2 + $0x159] sm:$0xff]  ;;  %v1214_v57 = vpack.c.bf16 %v1178_v14, %v1178_v14 }
 0x1ae   : > { %v1043_v19 = vpop.f32.mrf.mxu2  ;;  %v1369_v5 = vpop.f32.mrf.mxu3  ;;  %v1215_v8 = vpack.c.bf16 %v1179_v38, %v1179_v38 }
 0x1af   : > { %v1505_v35 = vpop.f32.mrf.mxu0  ;;  %v6188_v33 = vpop.f32.mrf.mxu1  ;;  %v1120_v20 = vadd.f32 %v1043_v19, %v6032_v29 }
 0x1b1   : > { %v1446_v50 = vadd.f32 %v1369_v5, %v1120_v20  ;;  %v1284_v20 = vunpack.c.l.b16 %v1214_v57 }
 0x1b3   : > { %v1580_v10 = vadd.f32 %v1503_v46, %v1446_v50  ;;  %v1285_v46 = vunpack.c.l.b16 %v1215_v8 }
 0x1b5   : > { %v6205_v45 = vadd.f32 %v1637_v0, %v1580_v10  ;;  %v6220_v14 = vpack.c.b16 %v1285_v46, %v1284_v20 }
 0x1b6   : > { %v1045_v55 = vpop.f32.mrf.mxu2  ;;  %v1371_v43 = vpop.f32.mrf.mxu3 }
 0x1b7   : > { %v1508_v17 = vpop.f32.mrf.mxu0  ;;  %v6197_v26 = vpop.f32.mrf.mxu1  ;;  %v1121_v29 = vadd.f32 %v1045_v55, %v6042_v44 }
 0x1b9   : > { %v1447_v3 = vadd.f32 %v1371_v43, %v1121_v29 }
 0x1ba   : > { %4955 = vmatmul.msk.bf16.gmra.mxu0 %vm327_vm2, %v6157_v6  ;;  %4973 = vmatmul.msk.bf16.gmra.mxu1 %vm327_vm2, %v6199_v12 }
 0x1bb   : > { %4921 = vmatmul.msk.bf16.gmra.mxu2 %vm327_vm2, %v5935_v30  ;;  %v1581_v19 = vadd.f32 %v1505_v35, %v1447_v3  ;;  %4938 = vmatmul.msk.bf16.gmra.mxu3 %vm327_vm2, %v6141_v25  ;;  %v5464_v25 = vld [vmem:[%s7546_s5 + $0xf0] sm:$0xff] }
 0x1bc   : > { %v1181_v35 = vld [vmem:[#allocation2 + $0x171] sm:$0xff]  ;;  %2766 = vmatpush.bf16.msra.mxu1 %v5464_v25 }
 0x1bd   : > { %v6215_v5 = vadd.f32 %v6165_v63, %v1581_v19  ;;  %v1217_v20 = vpack.c.bf16 %v1181_v35, %v1181_v35  ;;  %v1183_v35 = vld [vmem:[#allocation2 + $0x189] sm:$0xff] }
 0x1be   : > { %v1048_v0 = vpop.f32.mrf.mxu2  ;;  %v1374_v55 = vpop.f32.mrf.mxu3 }
 0x1bf   : > { %v1510_v22 = vpop.f32.mrf.mxu0  ;;  %v6208_v39 = vpop.f32.mrf.mxu1  ;;  %v1122_v44 = vadd.f32 %v1048_v0, %v6049_v58  ;;  %v1180_v58 = vld [vmem:[#allocation2 + $0x169] sm:$0xff] }
 0x1c0   : > { %v1216_v19 = vpack.c.bf16 %v1180_v58, %v1180_v58 }
 0x1c1   : > { %v1448_v38 = vadd.f32 %v1374_v55, %v1122_v44  ;;  %v1287_v44 = vunpack.c.l.b16 %v1217_v20 }
 0x1c2   : > { %v1286_v0 = vunpack.c.l.b16 %v1216_v19 }
 0x1c3   : > { %v1582_v30 = vadd.f32 %v1508_v17, %v1448_v38 }
 0x1c5   : > { %v6230_v29 = vadd.f32 %v6174_v15, %v1582_v30 }
 0x1c6   : > { %v1050_v63 = vpop.f32.mrf.mxu2  ;;  %v1376_v3 = vpop.f32.mrf.mxu3 }
 0x1c7   : > { %v1513_v50 = vpop.f32.mrf.mxu0  ;;  %v6218_v10 = vpop.f32.mrf.mxu1  ;;  %v1123_v43 = vadd.f32 %v1050_v63, %v6059_v4  ;;  %v6243_v63 = vpack.c.b16 %v1287_v44, %v1286_v0 }
 0x1c9   : > { %v1449_v17 = vadd.f32 %v1376_v3, %v1123_v43 }
 0x1ca   : > { %4956 = vmatmul.msk.bf16.gmra.mxu0 %vm327_vm2, %v6176_v59  ;;  %4974 = vmatmul.msk.bf16.gmra.mxu1 %vm327_vm2, %v6220_v14 }
 0x1cb   : > { %4922 = vmatmul.msk.bf16.gmra.mxu2 %vm327_vm2, %v5954_v51  ;;  %v1583_v46 = vadd.f32 %v1510_v22, %v1449_v17  ;;  %4939 = vmatmul.msk.bf16.gmra.mxu3 %vm327_vm2, %v6157_v6  ;;  %v1182_v22 = vld [vmem:[#allocation2 + $0x181] sm:$0xff]  ;;  %v1219_v17 = vpack.c.bf16 %v1183_v35, %v1183_v35 }
 0x1cc   : > { %v1218_v20 = vpack.c.bf16 %v1182_v22, %v1182_v22 }
 0x1cd   : > { %v6240_v55 = vadd.f32 %v6188_v33, %v1583_v46  ;;  %v1481_v44 = vunpack.c.l.b16 %v1219_v17 }
 0x1ce   : > { %v1053_v15 = vpop.f32.mrf.mxu2  ;;  %v1379_v25 = vpop.f32.mrf.mxu3 }
 0x1cf   : > { %v1515_v57 = vpop.f32.mrf.mxu0  ;;  %v6233_v8 = vpop.f32.mrf.mxu1  ;;  %v1124_v4 = vadd.f32 %v1053_v15, %v6067_v21 }
 0x1d1   : > { %v1450_v58 = vadd.f32 %v1379_v25, %v1124_v4 }
 0x1d3   : > { %v1584_v51 = vadd.f32 %v1513_v50, %v1450_v58  ;;  %v1480_v50 = vunpack.c.l.b16 %v1218_v20 }
 0x1d5   : > { %v6250_v33 = vadd.f32 %v6197_v26, %v1584_v51  ;;  %v1482_v51 = vpack.c.b16 %v1481_v44, %v1480_v50  ;;  %v1185_v50 = vld [vmem:[#allocation2 + $0x1a1] sm:$0xff] }
 0x1d6   : > { %v1055_v6 = vpop.f32.mrf.mxu2  ;;  %v1381_v19 = vpop.f32.mrf.mxu3 }
 0x1d7   : > { %v1518_v38 = vpop.f32.mrf.mxu0  ;;  %v1657_v30 = vpop.f32.mrf.mxu1  ;;  %v1125_v21 = vadd.f32 %v1055_v6, %v6077_v32 }
 0x1d9   : > { %v1451_v46 = vadd.f32 %v1381_v19, %v1125_v21 }
 0x1da   : > { %4957 = vmatmul.msk.bf16.gmra.mxu0 %vm327_vm2, %v6199_v12  ;;  %4975 = vmatmul.msk.bf16.gmra.mxu1 %vm327_vm2, %v6243_v63 }
 0x1db   : > { %4923 = vmatmul.msk.bf16.gmra.mxu2 %vm327_vm2, %v5972_v7  ;;  %v1585_v0 = vadd.f32 %v1515_v57, %v1451_v46  ;;  %4940 = vmatmul.msk.bf16.gmra.mxu3 %vm327_vm2, %v6176_v59  ;;  %v5463_v59 = vld [vmem:[%s7546_s5 + $0xe8] sm:$0xff] }
 0x1dc   : > { %2767 = vmatpush.bf16.msra.mxu1 %v5463_v59 }
 0x1dd   : > { %v6260_v15 = vadd.f32 %v6208_v39, %v1585_v0 }
 0x1de   : > { %v1058_v26 = vpop.f32.mrf.mxu2  ;;  %v1384_v25 = vpop.f32.mrf.mxu3 }
 0x1df   : > { %v1520_v43 = vpop.f32.mrf.mxu0  ;;  %v6253_v3 = vpop.f32.mrf.mxu1  ;;  %v1126_v32 = vadd.f32 %v1058_v26, %v6085_v49  ;;  %v1221_v26 = vpack.c.bf16 %v1185_v50, %v1185_v50 }
 0x1e1   : > { %v1452_v6 = vadd.f32 %v1384_v25, %v1126_v32 }
 0x1e3   : > { %v1586_v7 = vadd.f32 %v1518_v38, %v1452_v6  ;;  %v1615_v6 = vunpack.c.l.b16 %v1221_v26  ;;  %v1748_v26 = vld [vmem:[#allocation2 + $0x32] sm:$0xff] }
 0x1e5   : > { %v6270_v39 = vadd.f32 %v6218_v10, %v1586_v7 }
 0x1e6   : > { %v1060_v57 = vpop.f32.mrf.mxu2  ;;  %v1386_v35 = vpop.f32.mrf.mxu3 }
 0x1e7   : > { %v1523_v4 = vpop.f32.mrf.mxu0  ;;  %v1662_v58 = vpop.f32.mrf.mxu1  ;;  %v1127_v49 = vadd.f32 %v1060_v57, %v6095_v61  ;;  %v1184_v61 = vld [vmem:[#allocation2 + $0x199] sm:$0xff] }
 0x1e9   : > { %v1453_v21 = vadd.f32 %v1386_v35, %v1127_v49  ;;  %v654_v35 = vld [vmem:[#allocation2 + $0x198] sm:$0xff] }
 0x1ea   : > { %4958 = vmatmul.msk.bf16.gmra.mxu0 %vm327_vm2, %v6220_v14  ;;  %4976 = vmatmul.msk.bf16.gmra.mxu1 %vm327_vm2, %v1482_v51 }
 0x1eb   : > { %4924 = vmatmul.msk.bf16.gmra.mxu2 %vm327_vm2, %v5990_v23  ;;  %v6277_v38 = vadd.f32 %v1520_v43, %v1453_v21  ;;  %4941 = vmatmul.msk.bf16.gmra.mxu3 %vm327_vm2, %v6199_v12  ;;  %v1220_v23 = vpack.c.bf16 %v1184_v61, %v1184_v61  ;;  %v655_v21 = vld [vmem:[#allocation2 + $0x1a0] sm:$0xff] }
 0x1ed   : > { %v1614_v25 = vunpack.c.l.b16 %v1220_v23 }
 0x1ee   : > { %v1063_v20 = vpop.f32.mrf.mxu2  ;;  %v1389_v46 = vpop.f32.mrf.mxu3 }
 0x1ef   : > { %v1525_v22 = vpop.f32.mrf.mxu0  ;;  %v6275_v19 = vpop.f32.mrf.mxu1  ;;  %v1128_v17 = vadd.f32 %v1063_v20, %v6103_v16  ;;  %v1616_v59 = vpack.c.b16 %v1615_v6, %v1614_v25 }
 0x1f1   : > { %v1454_v0 = vadd.f32 %v1389_v46, %v1128_v17  ;;  %v690_v17 = vpack.c.bf16 %v654_v35, %v654_v35  ;;  %v691_v46 = vpack.c.bf16 %v655_v21, %v655_v21  ;;  %v1744_v21 = vld [vmem:[#allocation2 + $0x2] sm:$0xff] }
 0x1f3   : > { %v1588_v44 = vadd.f32 %v1523_v4, %v1454_v0  ;;  %v1021_v23 = vunpack.c.l.b16 %v691_v46  ;;  %v1780_v46 = vpack.c.bf16 %v1744_v21, %v1744_v21 }
 0x1f5   : > { %v6286_v12 = vadd.f32 %v1657_v30, %v1588_v44  ;;  %v1020_v44 = vunpack.c.l.b16 %v690_v17 }
 0x1f6   : > { %v1065_v43 = vpop.f32.mrf.mxu2  ;;  %v1391_v57 = vpop.f32.mrf.mxu3 }
 0x1f7   : > { %v1528_v10 = vpop.f32.mrf.mxu0  ;;  %v6284_v32 = vpop.f32.mrf.mxu1  ;;  %v1129_v16 = vadd.f32 %v1065_v43, %v6113_v28  ;;  %v1749_v43 = vld [vmem:[#allocation2 + $0x3a] sm:$0xff]  ;;  %v1022_v6 = vpack.c.b16 %v1021_v23, %v1020_v44 }
 0x1f8   : > { %v1785_v35 = vpack.c.bf16 %v1749_v43, %v1749_v43  ;;  %v1746_v23 = vld [vmem:[#allocation2 + $0x1a] sm:$0xff] }
 0x1f9   : > { %v1455_v49 = vadd.f32 %v1391_v57, %v1129_v16 }
 0x1fa   : > { %4959 = vmatmul.msk.bf16.gmra.mxu0 %vm327_vm2, %v6243_v63  ;;  %4977 = vmatmul.msk.bf16.gmra.mxu1 %vm327_vm2, %v1616_v59  ;;  %v1855_v17 = vunpack.c.l.b16 %v1785_v35 }
 0x1fb   : > { %4925 = vmatmul.msk.bf16.gmra.mxu2 %vm327_vm2, %v6014_v54  ;;  %v6292_v4 = vadd.f32 %v1525_v22, %v1455_v49  ;;  %4942 = vmatmul.msk.bf16.gmra.mxu3 %vm327_vm2, %v6220_v14  ;;  %v5462_v22 = vld [vmem:[%s7546_s5 + $0xe0] sm:$0xff]  ;;  %v1784_v49 = vpack.c.bf16 %v1748_v26, %v1748_v26  ;;  %v1850_v26 = vunpack.c.l.b16 %v1780_v46 }
 0x1fc   : > { %2768 = vmatpush.bf16.msra.mxu1 %v5462_v22 }
 0x1fe   : > { %v1068_v30 = vpop.f32.mrf.mxu2  ;;  %v1394_v61 = vpop.f32.mrf.mxu3 }
 0x1ff   : > { %v1530_v7 = vpop.f32.mrf.mxu0  ;;  %v1130_v20 = vadd.f32 %v1068_v30, %v6121_v42  ;;  %v6297_v28 = vpop.f32.mrf.mxu1  ;;  %v1745_v30 = vld [vmem:[#allocation2 + $0xa] sm:$0xff] }
 0x201   : > { %v1456_v50 = vadd.f32 %v1394_v61, %v1130_v20  ;;  %v1854_v20 = vunpack.c.l.b16 %v1784_v49  ;;  %v1781_v61 = vpack.c.bf16 %v1745_v30, %v1745_v30  ;;  %v1751_v49 = vld [vmem:[#allocation2 + $0x52] sm:$0xff] }
 0x202   : > { %v1787_v46 = vpack.c.bf16 %v1751_v49, %v1751_v49  ;;  %v1753_v49 = vld [vmem:[#allocation2 + $0x6a] sm:$0xff] }
 0x203   : > { %v1590_v54 = vadd.f32 %v1528_v10, %v1456_v50  ;;  %v6312_v22 = vpack.c.b16 %v1855_v17, %v1854_v20  ;;  %v1851_v43 = vunpack.c.l.b16 %v1781_v61 }
 0x205   : > { %v6303_v42 = vadd.f32 %v1662_v58, %v1590_v54  ;;  %v1747_v54 = vld [vmem:[#allocation2 + $0x22] sm:$0xff]  ;;  %v1882_v21 = vpack.c.b16 %v1851_v43, %v1850_v26 }
 0x206   : > { %v1070_v14 = vpop.f32.mrf.mxu2  ;;  %v1396_v59 = vpop.f32.mrf.mxu3 }
 0x207   : > { %v1533_v0 = vpop.f32.mrf.mxu0  ;;  %v1131_v25 = vadd.f32 %v1070_v14, %v6131_v2  ;;  %v1672_v57 = vpop.f32.mrf.mxu1 }
 0x20a   : > { %4960 = vmatmul.msk.bf16.gmra.mxu0 %vm327_vm2, %v1482_v51  ;;  %v1457_v51 = vadd.f32 %v1396_v59, %v1131_v25  ;;  %v1782_v25 = vpack.c.bf16 %v1746_v23, %v1746_v23  ;;  %v1750_v59 = vld [vmem:[#allocation2 + $0x4a] sm:$0xff] }
 0x20b   : > { %4926 = vmatmul.msk.bf16.gmra.mxu2 %vm327_vm2, %v1022_v6  ;;  %4943 = vmatmul.msk.bf16.gmra.mxu3 %vm327_vm2, %v6243_v63  ;;  %v1783_v6 = vpack.c.bf16 %v1747_v54, %v1747_v54 }
 0x20c   : > { %v6307_v10 = vadd.f32 %v1530_v7, %v1457_v51  ;;  %v1852_v30 = vunpack.c.l.b16 %v1782_v25 }
 0x20d   : > { %v1853_v20 = vunpack.c.l.b16 %v1783_v6 }
 0x20e   : > { %v1073_v58 = vpop.f32.mrf.mxu2  ;;  %v1399_v44 = vpop.f32.mrf.mxu3 }
 0x20f   : > { %v1535_v16 = vpop.f32.mrf.mxu0  ;;  %v1132_v2 = vadd.f32 %v1073_v58, %v6139_v27  ;;  %v6314_v14 = vpop.f32.mrf.mxu1 }
 0x211   : > { %v1458_v7 = vadd.f32 %v1399_v44, %v1132_v2  ;;  %v1786_v2 = vpack.c.bf16 %v1750_v59, %v1750_v59  ;;  %v1883_v44 = vpack.c.b16 %v1853_v20, %v1852_v30  ;;  %v1752_v59 = vld [vmem:[#allocation2 + $0x62] sm:$0xff] }
 0x213   : > { %v1592_v63 = vadd.f32 %v1533_v0, %v1458_v7  ;;  %v1856_v54 = vunpack.c.l.b16 %v1786_v2  ;;  %v1857_v7 = vunpack.c.l.b16 %v1787_v46  ;;  %v1789_v2 = vpack.c.bf16 %v1753_v49, %v1753_v49 }
 0x215   : > { %v6319_v35 = vadd.f32 %v6284_v32, %v1592_v63  ;;  %v6327_v63 = vpack.c.b16 %v1857_v7, %v1856_v54  ;;  %v1859_v54 = vunpack.c.l.b16 %v1789_v2 }
 0x216   : > { %v1075_v27 = vpop.f32.mrf.mxu2  ;;  %v1401_v58 = vpop.f32.mrf.mxu3 }
 0x217   : > { %v1538_v50 = vpop.f32.mrf.mxu0  ;;  %v1133_v51 = vadd.f32 %v1075_v27, %v6149_v41  ;;  %v1677_v23 = vpop.f32.mrf.mxu1 }
 0x219   : > { %v1459_v61 = vadd.f32 %v1401_v58, %v1133_v51  ;;  %v1788_v58 = vpack.c.bf16 %v1752_v59, %v1752_v59 }
 0x21a   : > { %5013 = vmatmul.msk.bf16.vlgmr.msra.gmra.mxu0 %vm327_vm2, %v6312_v22 }
 0x21b   : > { %4979 = vmatmul.msk.bf16.vlgmr.msra.gmra.mxu2 %vm327_vm2, %v1882_v21  ;;  %v6323_v0 = vadd.f32 %v1535_v16, %v1459_v61  ;;  %4996 = vmatmul.msk.bf16.vlgmr.msra.gmra.mxu3 %vm327_vm2, %v1883_v44  ;;  %v5461_v16 = vld [vmem:[%s7546_s5 + $0xd8] sm:$0xff]  ;;  %v1858_v61 = vunpack.c.l.b16 %v1788_v58 }
 0x21c   : > { %2769 = vmatpush.bf16.msra.mxu1 %v5461_v16  ;;  %v1755_v16 = vld [vmem:[#allocation2 + $0x82] sm:$0xff] }
 0x21e   : > { %v1078_v32 = vpop.f32.mrf.mxu2  ;;  %v1404_v43 = vpop.f32.mrf.mxu3 }
 0x21f   : > { %v1540_v17 = vpop.f32.mrf.mxu0  ;;  %v1134_v41 = vadd.f32 %v1078_v32, %v6036_v36  ;;  %v6336_v36 = vpop.f32.mrf.mxu1 }
 0x221   : > { %v1460_v25 = vadd.f32 %v1404_v43, %v1134_v41  ;;  %v6345_v43 = vpack.c.b16 %v1859_v54, %v1858_v61 }
 0x223   : > { %v1594_v6 = vadd.f32 %v1538_v50, %v1460_v25 }
 0x225   : > { %v6334_v51 = vadd.f32 %v1672_v57, %v1594_v6  ;;  %v1754_v6 = vld [vmem:[#allocation2 + $0x7a] sm:$0xff] }
 0x226   : > { %v1080_v27 = vpop.f32.mrf.mxu2  ;;  %v1406_v20 = vpop.f32.mrf.mxu3 }
 0x227   : > { %v1543_v26 = vpop.f32.mrf.mxu0  ;;  %v1135_v21 = vadd.f32 %v1080_v27, %v6044_v48  ;;  %v1682_v41 = vpop.f32.mrf.mxu1 }
 0x229   : > { %v1461_v46 = vadd.f32 %v1406_v20, %v1135_v21  ;;  %v1791_v20 = vpack.c.bf16 %v1755_v16, %v1755_v16 }
 0x22a   : > { %5014 = vmatmul.msk.bf16.gmra.mxu0 %vm327_vm2, %v6327_v63 }
 0x22b   : > { %4980 = vmatmul.msk.bf16.gmra.mxu2 %vm327_vm2, %v1883_v44  ;;  %v6340_v50 = vadd.f32 %v1540_v17, %v1461_v46  ;;  %4997 = vmatmul.msk.bf16.gmra.mxu3 %vm327_vm2, %v6312_v22  ;;  %v1861_v61 = vunpack.c.l.b16 %v1791_v20 }
 0x22e   : > { %v1083_v57 = vpop.f32.mrf.mxu2  ;;  %v1409_v48 = vpop.f32.mrf.mxu3 }
 0x22f   : > { %v1545_v30 = vpop.f32.mrf.mxu0  ;;  %v1136_v7 = vadd.f32 %v1083_v57, %v6053_v60  ;;  %v1790_v60 = vpack.c.bf16 %v1754_v6, %v1754_v6  ;;  %v6352_v2 = vpop.f32.mrf.mxu1  ;;  %v1757_v6 = vld [vmem:[#allocation2 + $0x9a] sm:$0xff] }
 0x230   : > { %v1793_v20 = vpack.c.bf16 %v1757_v6, %v1757_v6 }
 0x231   : > { %v1462_v25 = vadd.f32 %v1409_v48, %v1136_v7 }
 0x233   : > { %v1596_v44 = vadd.f32 %v1543_v26, %v1462_v25  ;;  %v1860_v26 = vunpack.c.l.b16 %v1790_v60 }
 0x235   : > { %v6349_v27 = vadd.f32 %v1677_v23, %v1596_v44  ;;  %v6361_v7 = vpack.c.b16 %v1861_v61, %v1860_v26  ;;  %v1863_v61 = vunpack.c.l.b16 %v1793_v20 }
 0x236   : > { %v1085_v17 = vpop.f32.mrf.mxu2  ;;  %v1411_v21 = vpop.f32.mrf.mxu3 }
 0x237   : > { %v1548_v32 = vpop.f32.mrf.mxu0  ;;  %v1137_v59 = vadd.f32 %v1085_v17, %v6061_v11  ;;  %v1756_v17 = vld [vmem:[#allocation2 + $0x92] sm:$0xff] }
 0x238   : > { %v1792_v60 = vpack.c.bf16 %v1756_v17, %v1756_v17 }
 0x239   : > { %v1463_v58 = vadd.f32 %v1411_v21, %v1137_v59 }
 0x23a   : > { %5015 = vmatmul.msk.bf16.gmra.mxu0 %vm327_vm2, %v6345_v43  ;;  %v1862_v26 = vunpack.c.l.b16 %v1792_v60 }
 0x23b   : > { %4981 = vmatmul.msk.bf16.gmra.mxu2 %vm327_vm2, %v6312_v22  ;;  %v6356_v46 = vadd.f32 %v1545_v30, %v1463_v58  ;;  %4998 = vmatmul.msk.bf16.gmra.mxu3 %vm327_vm2, %v6327_v63  ;;  %v5460_v22 = vld [vmem:[%s7546_s5 + $0xd0] sm:$0xff]  ;;  %v1687_v30 = vpop.f32.mrf.mxu1 }
 0x23c   : > { %2770 = vmatpush.bf16.msra.mxu1 %v5460_v22  ;;  %v1758_v22 = vld [vmem:[#allocation2 + $0xaa] sm:$0xff] }
 0x23e   : > { %v1088_v23 = vpop.f32.mrf.mxu2  ;;  %v1414_v57 = vpop.f32.mrf.mxu3 }
 0x23f   : > { %v1550_v49 = vpop.f32.mrf.mxu0  ;;  %v1138_v11 = vadd.f32 %v1088_v23, %v6071_v24 }
 0x241   : > { %v1464_v48 = vadd.f32 %v1414_v57, %v1138_v11 }
 0x243   : > { %v1598_v25 = vadd.f32 %v1548_v32, %v1464_v48  ;;  %v6380_v48 = vpack.c.b16 %v1863_v61, %v1862_v26 }
 0x245   : > { %v6368_v16 = vadd.f32 %v1682_v41, %v1598_v25  ;;  %v6377_v41 = vpop.f32.mrf.mxu1 }
 0x246   : > { %v1090_v44 = vpop.f32.mrf.mxu2  ;;  %v1416_v21 = vpop.f32.mrf.mxu3 }
 0x247   : > { %v1553_v54 = vpop.f32.mrf.mxu0  ;;  %v1139_v24 = vadd.f32 %v1090_v44, %v6079_v37  ;;  %v1759_v44 = vld [vmem:[#allocation2 + $0xb2] sm:$0xff] }
 0x248   : > { %v1795_v20 = vpack.c.bf16 %v1759_v44, %v1759_v44  ;;  %v1761_v44 = vld [vmem:[#allocation2 + $0xca] sm:$0xff] }
 0x249   : > { %v1465_v58 = vadd.f32 %v1416_v21, %v1139_v24 }
 0x24a   : > { %5016 = vmatmul.msk.bf16.gmra.mxu0 %vm327_vm2, %v6361_v7 }
 0x24b   : > { %4982 = vmatmul.msk.bf16.gmra.mxu2 %vm327_vm2, %v6327_v63  ;;  %v6373_v32 = vadd.f32 %v1550_v49, %v1465_v58  ;;  %4999 = vmatmul.msk.bf16.gmra.mxu3 %vm327_vm2, %v6345_v43 }
 0x24d   : > { %v1692_v21 = vpop.f32.mrf.mxu1 }
 0x24e   : > { %v1093_v23 = vpop.f32.mrf.mxu2  ;;  %v1419_v57 = vpop.f32.mrf.mxu3 }
 0x24f   : > { %v1555_v59 = vpop.f32.mrf.mxu0  ;;  %v1140_v37 = vadd.f32 %v1093_v23, %v6089_v52  ;;  %v1794_v52 = vpack.c.bf16 %v1758_v22, %v1758_v22  ;;  %v1760_v22 = vld [vmem:[#allocation2 + $0xc2] sm:$0xff] }
 0x251   : > { %v1466_v25 = vadd.f32 %v1419_v57, %v1140_v37  ;;  %v1864_v61 = vunpack.c.l.b16 %v1794_v52 }
 0x253   : > { %v1600_v63 = vadd.f32 %v1553_v54, %v1466_v25  ;;  %v1865_v54 = vunpack.c.l.b16 %v1795_v20  ;;  %v1796_v20 = vpack.c.bf16 %v1760_v22, %v1760_v22  ;;  %v1763_v22 = vld [vmem:[#allocation2 + $0xe2] sm:$0xff] }
 0x255   : > { %v6384_v17 = vadd.f32 %v1687_v30, %v1600_v63  ;;  %v6394_v57 = vpack.c.b16 %v1865_v54, %v1864_v61  ;;  %v6396_v63 = vpop.f32.mrf.mxu1 }
 0x256   : > { %v1095_v49 = vpop.f32.mrf.mxu2  ;;  %v1421_v60 = vpop.f32.mrf.mxu3 }
 0x257   : > { %v1558_v11 = vpop.f32.mrf.mxu0  ;;  %v1141_v6 = vadd.f32 %v1095_v49, %v6097_v1 }
 0x259   : > { %v1467_v58 = vadd.f32 %v1421_v60, %v1141_v6 }
 0x25a   : > { %5017 = vmatmul.msk.bf16.gmra.mxu0 %vm327_vm2, %v6380_v48 }
 0x25b   : > { %4983 = vmatmul.msk.bf16.gmra.mxu2 %vm327_vm2, %v6345_v43  ;;  %v6389_v26 = vadd.f32 %v1555_v59, %v1467_v58  ;;  %5000 = vmatmul.msk.bf16.gmra.mxu3 %vm327_vm2, %v6361_v7  ;;  %v5459_v59 = vld [vmem:[%s7546_s5 + $0xc8] sm:$0xff]  ;;  %v1797_v58 = vpack.c.bf16 %v1761_v44, %v1761_v44 }
 0x25c   : > { %2771 = vmatpush.bf16.msra.mxu1 %v5459_v59 }
 0x25d   : > { %v1697_v54 = vpop.f32.mrf.mxu1 }
 0x25e   : > { %v1098_v30 = vpop.f32.mrf.mxu2  ;;  %v1424_v37 = vpop.f32.mrf.mxu3 }
 0x25f   : > { %v1560_v24 = vpop.f32.mrf.mxu0  ;;  %v1142_v23 = vadd.f32 %v1098_v30, %v6107_v18  ;;  %v1866_v30 = vunpack.c.l.b16 %v1796_v20 }
 0x261   : > { %v1468_v25 = vadd.f32 %v1424_v37, %v1142_v23  ;;  %v1867_v23 = vunpack.c.l.b16 %v1797_v58 }
 0x263   : > { %v1602_v43 = vadd.f32 %v1558_v11, %v1468_v25 }
 0x265   : > { %v6403_v18 = vadd.f32 %v1692_v21, %v1602_v43  ;;  %v6413_v43 = vpack.c.b16 %v1867_v23, %v1866_v30 }
 0x266   : > { %v1100_v49 = vpop.f32.mrf.mxu2  ;;  %v1426_v52 = vpop.f32.mrf.mxu3 }
 0x267   : > { %v1563_v1 = vpop.f32.mrf.mxu0  ;;  %v1143_v6 = vadd.f32 %v1100_v49, %v6115_v34  ;;  %v1762_v49 = vld [vmem:[#allocation2 + $0xda] sm:$0xff] }
 0x268   : > { %v1798_v58 = vpack.c.bf16 %v1762_v49, %v1762_v49  ;;  %v1764_v49 = vld [vmem:[#allocation2 + $0xf2] sm:$0xff] }
 0x269   : > { %v1469_v61 = vadd.f32 %v1426_v52, %v1143_v6  ;;  %v6419_v6 = vpop.f32.mrf.mxu1 }
 0x26a   : > { %5018 = vmatmul.msk.bf16.gmra.mxu0 %vm327_vm2, %v6394_v57  ;;  %7550 = vst [vmem:[#allocation4_spill] sm:$0xff] %v6419_v6 }
 0x26b   : > { %4984 = vmatmul.msk.bf16.gmra.mxu2 %vm327_vm2, %v6361_v7  ;;  %v6408_v11 = vadd.f32 %v1560_v24, %v1469_v61  ;;  %5001 = vmatmul.msk.bf16.gmra.mxu3 %vm327_vm2, %v6380_v48  ;;  %v1799_v61 = vpack.c.bf16 %v1763_v22, %v1763_v22  ;;  %v1765_v22 = vld [vmem:[#allocation2 + $0xfa] sm:$0xff] }
 0x26e   : > { %v1103_v21 = vpop.f32.mrf.mxu2  ;;  %v1429_v25 = vpop.f32.mrf.mxu3 }
 0x26f   : > { %v1565_v60 = vpop.f32.mrf.mxu0  ;;  %v1144_v37 = vadd.f32 %v1103_v21, %v6125_v56  ;;  %v1869_v21 = vunpack.c.l.b16 %v1799_v61 }
 0x271   : > { %v1470_v59 = vadd.f32 %v1429_v25, %v1144_v37 }
 0x273   : > { %v1604_v7 = vadd.f32 %v1563_v1, %v1470_v59  ;;  %v1868_v1 = vunpack.c.l.b16 %v1798_v58 }
 0x275   : > { %v6417_v44 = vadd.f32 %v1697_v54, %v1604_v7  ;;  %v6429_v7 = vpack.c.b16 %v1869_v21, %v1868_v1 }
 0x276   : > { %v1105_v24 = vpop.f32.mrf.mxu2  ;;  %v1431_v56 = vpop.f32.mrf.mxu3 }
 0x277   : > { %v1568_v34 = vpop.f32.mrf.mxu0  ;;  %v1145_v52 = vadd.f32 %v1105_v24, %v6133_v9  ;;  %v1702_v9 = vpop.f32.mrf.mxu1 }
 0x279   : > { %v1471_v30 = vadd.f32 %v1431_v56, %v1145_v52 }
 0x27a   : > { %5019 = vmatmul.msk.bf16.gmra.mxu0 %vm327_vm2, %v6413_v43 }
 0x27b   : > { %4985 = vmatmul.msk.bf16.gmra.mxu2 %vm327_vm2, %v6380_v48  ;;  %v6424_v23 = vadd.f32 %v1565_v60, %v1471_v30  ;;  %5002 = vmatmul.msk.bf16.gmra.mxu3 %vm327_vm2, %v6394_v57  ;;  %v1801_v30 = vpack.c.bf16 %v1765_v22, %v1765_v22 }
 0x27e   : > { %v1108_v54 = vpop.f32.mrf.mxu2  ;;  %v1434_v59 = vpop.f32.mrf.mxu3 }
 0x27f   : > { %v1570_v20 = vpop.f32.mrf.mxu0  ;;  %v1146_v37 = vadd.f32 %v1108_v54, %v6143_v40  ;;  %v1800_v40 = vpack.c.bf16 %v1764_v49, %v1764_v49  ;;  %v6436_v6 = vpop.f32.mrf.mxu1 }
 0x281   : > { %v1472_v24 = vadd.f32 %v1434_v59, %v1146_v37  ;;  %v1870_v21 = vunpack.c.l.b16 %v1800_v40  ;;  %v1871_v37 = vunpack.c.l.b16 %v1801_v30 }
 0x283   : > { %v1606_v48 = vadd.f32 %v1568_v34, %v1472_v24  ;;  %v5458_v34 = vld [vmem:[%s7546_s5 + $0xc0] sm:$0xff] }
 0x284   : > { %2772 = vmatpush.bf16.msra.mxu1 %v5458_v34 }
 0x285   : > { %v6433_v52 = vadd.f32 %v1702_v9, %v1606_v48  ;;  %v6448_v48 = vpack.c.b16 %v1871_v37, %v1870_v21 }
 0x286   : > { %v1110_v60 = vpop.f32.mrf.mxu2  ;;  %v1436_v61 = vpop.f32.mrf.mxu3 }
 0x287   : > { %v1573_v25 = vpop.f32.mrf.mxu0  ;;  %v1147_v56 = vadd.f32 %v1110_v60, %v6151_v47 }
 0x289   : > { %v1473_v54 = vadd.f32 %v1436_v61, %v1147_v56  ;;  %v1766_v56 = vld [vmem:[#allocation2 + $0x10a] sm:$0xff]  ;;  %v1767_v61 = vld [vmem:[#allocation2 + $0x112] sm:$0xff] }
 0x28a   : > { %5020 = vmatmul.msk.bf16.gmra.mxu0 %vm327_vm2, %v6429_v7  ;;  %v1803_v34 = vpack.c.bf16 %v1767_v61, %v1767_v61 }
 0x28b   : > { %4986 = vmatmul.msk.bf16.gmra.mxu2 %vm327_vm2, %v6394_v57  ;;  %v6440_v1 = vadd.f32 %v1570_v20, %v1473_v54  ;;  %5003 = vmatmul.msk.bf16.gmra.mxu3 %vm327_vm2, %v6413_v43  ;;  %v1707_v20 = vpop.f32.mrf.mxu1 }
 0x28e   : > { %v1113_v47 = vpop.f32.mrf.mxu2  ;;  %v1439_v24 = vpop.f32.mrf.mxu3 }
 0x28f   : > { %v1575_v58 = vpop.f32.mrf.mxu0  ;;  %v1148_v9 = vadd.f32 %v1113_v47, %v6159_v62  ;;  %v1802_v62 = vpack.c.bf16 %v1766_v56, %v1766_v56  ;;  %v6477_v56 = vld [vmem:[%s7545_s4] ss:$0 sm:$0xff] }
 0x291   : > { %v1474_v57 = vadd.f32 %v1439_v24, %v1148_v9  ;;  %v1872_v37 = vunpack.c.l.b16 %v1802_v62  ;;  %v1873_v9 = vunpack.c.l.b16 %v1803_v34  ;;  %v1769_v62 = vld [vmem:[#allocation2 + $0x12a] sm:$0xff] }
 0x293   : > { %v1608_v60 = vadd.f32 %v1573_v25, %v1474_v57  ;;  %v5457_v25 = vld [vmem:[%s7546_s5 + $0x38] sm:$0xff] }
 0x294   : > { %2908 = vmatpush.bf16.msrb.mxu2 %v5457_v25 }
 0x295   : > { %v6452_v49 = vadd.f32 %v1707_v20, %v1608_v60  ;;  %v6465_v60 = vpack.c.b16 %v1873_v9, %v1872_v37  ;;  %v1805_v9 = vpack.c.bf16 %v1769_v62, %v1769_v62 }
 0x296   : > { %v1115_v22 = vpop.f32.mrf.mxu2  ;;  %v1441_v54 = vpop.f32.mrf.mxu3 }
 0x297   : > { %v2226_v59 = vpop.f32.mrf.mxu0  ;;  %7551 = vst [vmem:[#allocation5_spill] sm:$0xff] %v6452_v49  ;;  %v1149_v40 = vadd.f32 %v1115_v22, %v6167_v31 }
 0x299   : > { %v1475_v47 = vadd.f32 %v1441_v54, %v1149_v40  ;;  %v1768_v54 = vld [vmem:[#allocation2 + $0x122] sm:$0xff] }
 0x29a   : > { %5021 = vmatmul.msk.bf16.gmra.mxu0 %vm327_vm2, %v6448_v48  ;;  %v1804_v37 = vpack.c.bf16 %v1768_v54, %v1768_v54 }
 0x29b   : > { %4987 = vmatmul.msk.bf16.gmra.mxu2 %vm327_vm2, %v6413_v43  ;;  %v6457_v21 = vadd.f32 %v1575_v58, %v1475_v47  ;;  %5004 = vmatmul.msk.bf16.gmra.mxu3 %vm327_vm2, %v6429_v7  ;;  %v6470_v58 = vld [vmem:[%s7544_s3] ss:$0 sm:$0xff] }
 0x29d   : > { %7552 = vst [vmem:[#allocation6_spill] sm:$0xff] %v6457_v21 }
 0x29e   : > { %v1958_v31 = vpop.f32.mrf.mxu2  ;;  %v2092_v20 = vpop.f32.mrf.mxu3 }
 0x29f   : > { %v2228_v30 = vpop.f32.mrf.mxu0  ;;  %v2038_v24 = vadd.f32 %v1958_v31, %v6185_v13  ;;  %v5473_v13 = vld [vmem:[%s7546_s5 + $0x1b8] sm:$0xff] }
 0x2a0   : > { %3068 = vmatpush.bf16.msrb.mxu3 %v5473_v13  ;;  %v1875_v13 = vunpack.c.l.b16 %v1805_v9 }
 0x2a1   : > { %v2172_v43 = vadd.f32 %v2092_v20, %v2038_v24 }
 0x2a3   : > { %v2306_v22 = vadd.f32 %v2226_v59, %v2172_v43  ;;  %v5481_v43 = vld [vmem:[%s7546_s5 + $0x78] sm:$0xff] }
 0x2a4   : > { %3422 = vmatpush.bf16.msrb.mxu0 %v5481_v43 }
 0x2a5   : > { %v2341_v61 = vmul.f32 %v6470_v58, %v2306_v22  ;;  %v1874_v22 = vunpack.c.l.b16 %v1804_v37 }
 0x2a6   : > { %v1960_v40 = vpop.f32.mrf.mxu2  ;;  %v2094_v25 = vpop.f32.mrf.mxu3 }
 0x2a7   : > { %v2231_v57 = vpop.f32.mrf.mxu0  ;;  %v2039_v34 = vadd.f32 %v1960_v40, %v6194_v53  ;;  %v2376_v47 = vadd.f32 %v6477_v56, %v2341_v61  ;;  %v5489_v53 = vld [vmem:[%s7546_s5 + $0x138] sm:$0xff] }
 0x2a8   : > { %3614 = vmatpush.bf16.msrb.mxu1 %v5489_v53  ;;  %v1771_v53 = vld [vmem:[#allocation2 + $0x142] sm:$0xff] }
 0x2a9   : > { %v2408_v31 = vmax.f32 %v2376_v47, 0.0  ;;  %v2173_v24 = vadd.f32 %v2094_v25, %v2039_v34  ;;  %v6498_v34 = vpack.c.b16 %v1875_v13, %v1874_v22  ;;  %v1807_v49 = vpack.c.bf16 %v1771_v53, %v1771_v53 }
 0x2aa   : > { %5022 = vmatmul.msk.bf16.gmra.mxu0 %vm327_vm2, %v6465_v60 }
 0x2ab   : > { %4988 = vmatmul.msk.bf16.gmra.mxu2 %vm327_vm2, %v6429_v7  ;;  %2484 = vst [vmem:[#allocation3 + $0x19] sm:$0xff] %v2408_v31  ;;  %v2307_v20 = vadd.f32 %v2228_v30, %v2173_v24  ;;  %5005 = vmatmul.msk.bf16.gmra.mxu3 %vm327_vm2, %v6448_v48  ;;  %v3227_v37 = vpack.c.bf16 %v2408_v31, %v2408_v31 }
 0x2ad   : > { %v2342_v61 = vmul.f32 %v6470_v58, %v2307_v20 }
 0x2ae   : > { %v1963_v40 = vpop.f32.mrf.mxu2  ;;  %v2097_v62 = vpop.f32.mrf.mxu3 }
 0x2af   : > { %v2233_v59 = vpop.f32.mrf.mxu0  ;;  %v2040_v7 = vadd.f32 %v1963_v40, %v6205_v45  ;;  %v2377_v30 = vadd.f32 %v6477_v56, %v2342_v61  ;;  %v1770_v45 = vld [vmem:[#allocation2 + $0x13a] sm:$0xff]  ;;  %v3312_v40 = vunpack.c.l.b16 %v3227_v37 }
 0x2b1   : > { %v2409_v47 = vmax.f32 %v2377_v30, 0.0  ;;  %v2174_v25 = vadd.f32 %v2097_v62, %v2040_v7  ;;  %v1806_v62 = vpack.c.bf16 %v1770_v45, %v1770_v45 }
 0x2b2   : > { %v2518_v22 = vld [vmem:[#allocation3 + $0x18] sm:$0xff] }
 0x2b3   : > { %2485 = vst [vmem:[#allocation3 + $0x21] sm:$0xff] %v2409_v47  ;;  %v2308_v9 = vadd.f32 %v2231_v57, %v2174_v25  ;;  %v3228_v24 = vpack.c.bf16 %v2409_v47, %v2409_v47  ;;  %v2554_v25 = vpack.c.bf16 %v2518_v22, %v2518_v22 }
 0x2b5   : > { %v2343_v20 = vmul.f32 %v6470_v58, %v2308_v9  ;;  %v3313_v61 = vunpack.c.l.b16 %v3228_v24  ;;  %v2653_v45 = vunpack.c.l.b16 %v2554_v25 }
 0x2b6   : > { %v1965_v43 = vpop.f32.mrf.mxu2  ;;  %v2099_v30 = vpop.f32.mrf.mxu3 }
 0x2b7   : > { %v2236_v54 = vpop.f32.mrf.mxu0  ;;  %v2041_v21 = vadd.f32 %v1965_v43, %v6215_v5  ;;  %v2378_v13 = vadd.f32 %v6477_v56, %v2343_v20  ;;  %v6505_v31 = vpack.c.b16 %v3313_v61, %v3312_v40  ;;  %v5456_v5 = vld [vmem:[%s7546_s5 + $0x30] sm:$0xff]  ;;  %v1876_v20 = vunpack.c.l.b16 %v1806_v62 }
 0x2b8   : > { %v1877_v43 = vunpack.c.l.b16 %v1807_v49  ;;  %2909 = vmatpush.bf16.msrb.mxu2 %v5456_v5  ;;  %v1772_v5 = vld [vmem:[#allocation2 + $0x152] sm:$0xff] }
 0x2b9   : > { %v2410_v57 = vmax.f32 %v2378_v13, 0.0  ;;  %v2175_v47 = vadd.f32 %v2099_v30, %v2041_v21 }
 0x2ba   : > { %5023 = vmatmul.msk.bf16.gmra.mxu0 %vm327_vm2, %v6498_v34  ;;  %v2519_v9 = vld [vmem:[#allocation3 + $0x20] sm:$0xff]  ;;  %v6519_v30 = vpack.c.b16 %v1877_v43, %v1876_v20  ;;  %v1773_v20 = vld [vmem:[#allocation2 + $0x15a] sm:$0xff] }
 0x2bb   : > { %4989 = vmatmul.msk.bf16.gmra.mxu2 %vm327_vm2, %v6448_v48  ;;  %2486 = vst [vmem:[#allocation3 + $0x31] sm:$0xff] %v2410_v57  ;;  %v2309_v37 = vadd.f32 %v2233_v59, %v2175_v47  ;;  %v2555_v24 = vpack.c.bf16 %v2519_v9, %v2519_v9  ;;  %5006 = vmatmul.msk.bf16.gmra.mxu3 %vm327_vm2, %v6465_v60 }
 0x2bc   : > { %v3229_v47 = vpack.c.bf16 %v2410_v57, %v2410_v57 }
 0x2bd   : > { %v2344_v40 = vmul.f32 %v6470_v58, %v2309_v37  ;;  %v2654_v53 = vunpack.c.l.b16 %v2555_v24 }
 0x2be   : > { %v1968_v21 = vpop.f32.mrf.mxu2  ;;  %v2102_v13 = vpop.f32.mrf.mxu3  ;;  %v3314_v43 = vunpack.c.l.b16 %v3229_v47 }
 0x2bf   : > { %v2238_v7 = vpop.f32.mrf.mxu0  ;;  %v2042_v48 = vadd.f32 %v1968_v21, %v6230_v29  ;;  %v2379_v59 = vadd.f32 %v6477_v56, %v2344_v40  ;;  %v6517_v61 = vpack.c.b16 %v2654_v53, %v2653_v45  ;;  %v5472_v29 = vld [vmem:[%s7546_s5 + $0x1b0] sm:$0xff] }
 0x2c0   : > { %3069 = vmatpush.bf16.msrb.mxu3 %v5472_v29 }
 0x2c1   : > { %v2411_v49 = vmax.f32 %v2379_v59, 0.0  ;;  %v2176_v62 = vadd.f32 %v2102_v13, %v2042_v48  ;;  %2773 = vmatmul.bf16.vlgmr.msra.gmra.mxu1 %v6517_v61  ;;  %v1808_v59 = vpack.c.bf16 %v1772_v5, %v1772_v5  ;;  %v1809_v13 = vpack.c.bf16 %v1773_v20, %v1773_v20 }
 0x2c2   : > { %v2520_v21 = vld [vmem:[#allocation3 + $0x30] sm:$0xff] }
 0x2c3   : > { %2487 = vst [vmem:[#allocation3 + $0x39] sm:$0xff] %v2411_v49  ;;  %v2310_v25 = vadd.f32 %v2236_v54, %v2176_v62  ;;  %v3230_v9 = vpack.c.bf16 %v2411_v49, %v2411_v49  ;;  %v1879_v5 = vunpack.c.l.b16 %v1809_v13 }
 0x2c5   : > { %v2345_v37 = vmul.f32 %v6470_v58, %v2310_v25  ;;  %v3315_v40 = vunpack.c.l.b16 %v3230_v9  ;;  %v2556_v25 = vpack.c.bf16 %v2520_v21, %v2520_v21 }
 0x2c6   : > { %v1970_v24 = vpop.f32.mrf.mxu2  ;;  %v2104_v48 = vpop.f32.mrf.mxu3 }
 0x2c7   : > { %v2241_v22 = vpop.f32.mrf.mxu0  ;;  %v2043_v57 = vadd.f32 %v1970_v24, %v6240_v55  ;;  %v2380_v45 = vadd.f32 %v6477_v56, %v2345_v37  ;;  %v6530_v54 = vpack.c.b16 %v3315_v40, %v3314_v43  ;;  %v5480_v55 = vld [vmem:[%s7546_s5 + $0x70] sm:$0xff]  ;;  %v1878_v24 = vunpack.c.l.b16 %v1808_v59 }
 0x2c8   : > { %v5488_v37 = vld [vmem:[%s7546_s5 + $0x130] sm:$0xff]  ;;  %v2655_v43 = vunpack.c.l.b16 %v2556_v25  ;;  %3423 = vmatpush.bf16.msrb.mxu0 %v5480_v55 }
 0x2c9   : > { %v2412_v49 = vmax.f32 %v2380_v45, 0.0  ;;  %v2177_v62 = vadd.f32 %v2104_v48, %v2043_v57  ;;  %3615 = vmatpush.bf16.msrb.mxu1 %v5488_v37  ;;  %v6547_v59 = vpack.c.b16 %v1879_v5, %v1878_v24  ;;  %v1774_v55 = vld [vmem:[#allocation2 + $0x16a] sm:$0xff]  ;;  %v1775_v37 = vld [vmem:[#allocation2 + $0x172] sm:$0xff] }
 0x2ca   : > { %5024 = vmatmul.msk.bf16.gmra.mxu0 %vm327_vm2, %v6519_v30  ;;  %v2521_v29 = vld [vmem:[#allocation3 + $0x38] sm:$0xff] }
 0x2cb   : > { %4990 = vmatmul.msk.bf16.gmra.mxu2 %vm327_vm2, %v6465_v60  ;;  %2488 = vst [vmem:[#allocation3 + $0x49] sm:$0xff] %v2412_v49  ;;  %v2311_v47 = vadd.f32 %v2238_v7, %v2177_v62  ;;  %v2557_v9 = vpack.c.bf16 %v2521_v29, %v2521_v29  ;;  %5007 = vmatmul.msk.bf16.gmra.mxu3 %vm327_vm2, %v6498_v34 }
 0x2cc   : > { %v3231_v29 = vpack.c.bf16 %v2412_v49, %v2412_v49 }
 0x2cd   : > { %v2346_v20 = vmul.f32 %v6470_v58, %v2311_v47  ;;  %v2656_v40 = vunpack.c.l.b16 %v2557_v9 }
 0x2ce   : > { %v1973_v60 = vpop.f32.mrf.mxu2  ;;  %v2107_v48 = vpop.f32.mrf.mxu3 }
 0x2cf   : > { %v2243_v53 = vpop.f32.mrf.mxu0  ;;  %v2044_v7 = vadd.f32 %v1973_v60, %v6250_v33  ;;  %v2381_v57 = vadd.f32 %v6477_v56, %v2346_v20  ;;  %v6545_v21 = vpack.c.b16 %v2656_v40, %v2655_v43  ;;  %v3316_v20 = vunpack.c.l.b16 %v3231_v29 }
 0x2d1   : > { %v2413_v13 = vmax.f32 %v2381_v57, 0.0  ;;  %v2178_v62 = vadd.f32 %v2107_v48, %v2044_v7  ;;  %2778 = vmatmul.bf16.gmra.mxu1 %v6545_v21  ;;  %v1810_v57 = vpack.c.bf16 %v1774_v55, %v1774_v55  ;;  %v1811_v48 = vpack.c.bf16 %v1775_v37, %v1775_v37 }
 0x2d2   : > { %v2522_v5 = vld [vmem:[#allocation3 + $0x48] sm:$0xff] }
 0x2d3   : > { %2489 = vst [vmem:[#allocation3 + $0x51] sm:$0xff] %v2413_v13  ;;  %v2312_v25 = vadd.f32 %v2241_v22, %v2178_v62  ;;  %v3232_v33 = vpack.c.bf16 %v2413_v13, %v2413_v13  ;;  %v2558_v62 = vpack.c.bf16 %v2522_v5, %v2522_v5 }
 0x2d5   : > { %v2347_v47 = vmul.f32 %v6470_v58, %v2312_v25  ;;  %v3317_v60 = vunpack.c.l.b16 %v3232_v33  ;;  %v2657_v37 = vunpack.c.l.b16 %v2558_v62 }
 0x2d6   : > { %v1975_v9 = vpop.f32.mrf.mxu2  ;;  %v2109_v7 = vpop.f32.mrf.mxu3 }
 0x2d7   : > { %v2246_v45 = vpop.f32.mrf.mxu0  ;;  %v2045_v24 = vadd.f32 %v1975_v9, %v6260_v15  ;;  %v2382_v43 = vadd.f32 %v6477_v56, %v2347_v47  ;;  %v6555_v49 = vpack.c.b16 %v3317_v60, %v3316_v20  ;;  %v5455_v15 = vld [vmem:[%s7546_s5 + $0x28] sm:$0xff]  ;;  %v1880_v47 = vunpack.c.l.b16 %v1810_v57 }
 0x2d8   : > { %v1881_v9 = vunpack.c.l.b16 %v1811_v48  ;;  %2910 = vmatpush.bf16.msrb.mxu2 %v5455_v15 }
 0x2d9   : > { %v2414_v22 = vmax.f32 %v2382_v43, 0.0  ;;  %v2179_v13 = vadd.f32 %v2109_v7, %v2045_v24 }
 0x2da   : > { %5025 = vmatmul.msk.bf16.gmra.mxu0 %vm327_vm2, %v6547_v59  ;;  %v2523_v25 = vld [vmem:[#allocation3 + $0x50] sm:$0xff]  ;;  %v6571_v7 = vpack.c.b16 %v1881_v9, %v1880_v47  ;;  %v1777_v9 = vld [vmem:[#allocation2 + $0x18a] sm:$0xff] }
 0x2db   : > { %4991 = vmatmul.msk.bf16.gmra.mxu2 %vm327_vm2, %v6498_v34  ;;  %2490 = vst [vmem:[#allocation3 + $0x61] sm:$0xff] %v2414_v22  ;;  %v2313_v29 = vadd.f32 %v2243_v53, %v2179_v13  ;;  %v2559_v33 = vpack.c.bf16 %v2523_v25, %v2523_v25  ;;  %5008 = vmatmul.msk.bf16.gmra.mxu3 %vm327_vm2, %v6519_v30  ;;  %v1776_v47 = vld [vmem:[#allocation2 + $0x182] sm:$0xff] }
 0x2dc   : > { %v3233_v13 = vpack.c.bf16 %v2414_v22, %v2414_v22 }
 0x2dd   : > { %v2348_v20 = vmul.f32 %v6470_v58, %v2313_v29  ;;  %v2658_v60 = vunpack.c.l.b16 %v2559_v33  ;;  %v1721_v29 = vadd.f32 %v6233_v8, %v6277_v38 }
 0x2de   : > { %v1978_v55 = vpop.f32.mrf.mxu2  ;;  %v2112_v43 = vpop.f32.mrf.mxu3  ;;  %v3318_v22 = vunpack.c.l.b16 %v3233_v13 }
 0x2df   : > { %v2248_v40 = vpop.f32.mrf.mxu0  ;;  %v2046_v34 = vadd.f32 %v1978_v55, %v6270_v39  ;;  %v2383_v53 = vadd.f32 %v6477_v56, %v2348_v20  ;;  %v6567_v24 = vpack.c.b16 %v2658_v60, %v2657_v37  ;;  %v5471_v39 = vld [vmem:[%s7546_s5 + $0x1a8] sm:$0xff] }
 0x2e0   : > { %3070 = vmatpush.bf16.msrb.mxu3 %v5471_v39 }
 0x2e1   : > { %v2415_v57 = vmax.f32 %v2383_v53, 0.0  ;;  %v2180_v48 = vadd.f32 %v2112_v43, %v2046_v34  ;;  %2783 = vmatmul.bf16.gmra.mxu1 %v6567_v24  ;;  %v1812_v43 = vpack.c.bf16 %v1776_v47, %v1776_v47 }
 0x2e2   : > { %v2524_v37 = vld [vmem:[#allocation3 + $0x60] sm:$0xff] }
 0x2e3   : > { %2491 = vst [vmem:[#allocation3 + $0x69] sm:$0xff] %v2415_v57  ;;  %v2314_v62 = vadd.f32 %v2246_v45, %v2180_v48  ;;  %v3234_v25 = vpack.c.bf16 %v2415_v57, %v2415_v57  ;;  %v1813_v57 = vpack.c.bf16 %v1777_v9, %v1777_v9  ;;  %v2560_v48 = vpack.c.bf16 %v2524_v37, %v2524_v37 }
 0x2e5   : > { %v2349_v33 = vmul.f32 %v6470_v58, %v2314_v62  ;;  %v3319_v20 = vunpack.c.l.b16 %v3234_v25  ;;  %v5479_v25 = vld [vmem:[%s7546_s5 + $0x68] sm:$0xff]  ;;  %v2659_v9 = vunpack.c.l.b16 %v2560_v48 }
 0x2e6   : > { %v1980_v15 = vpop.f32.mrf.mxu2  ;;  %v2114_v53 = vpop.f32.mrf.mxu3  ;;  %3424 = vmatpush.bf16.msrb.mxu0 %v5479_v25 }
 0x2e7   : > { %v6569_v5 = vpop.f32.mrf.mxu0  ;;  %v2047_v55 = vadd.f32 %v1980_v15, %v1721_v29  ;;  %v2384_v45 = vadd.f32 %v6477_v56, %v2349_v33  ;;  %v6585_v34 = vpack.c.b16 %v3319_v20, %v3318_v22  ;;  %v5487_v29 = vld [vmem:[%s7546_s5 + $0x128] sm:$0xff]  ;;  %v2074_v33 = vunpack.c.l.b16 %v1812_v43  ;;  %v5478_v43 = vld [vmem:[%s7546_s5 + $0x60] sm:$0xff] }
 0x2e8   : > { %v2075_v15 = vunpack.c.l.b16 %v1813_v57  ;;  %3616 = vmatpush.bf16.msrb.mxu1 %v5487_v29  ;;  %v5453_v29 = vld [vmem:[%s7546_s5 + $0x18] sm:$0xff] }
 0x2e9   : > { %v2416_v8 = vmax.f32 %v2384_v45, 0.0  ;;  %v2181_v38 = vadd.f32 %v2114_v53, %v2047_v55  ;;  %v5454_v45 = vld [vmem:[%s7546_s5 + $0x20] sm:$0xff] }
 0x2ea   : > { %5026 = vmatmul.msk.bf16.gmra.mxu0 %vm327_vm2, %v6571_v7  ;;  %v2525_v62 = vld [vmem:[#allocation3 + $0x68] sm:$0xff]  ;;  %v5470_v53 = vld [vmem:[%s7546_s5 + $0x1a0] sm:$0xff]  ;;  %v6613_v57 = vpack.c.b16 %v2075_v15, %v2074_v33  ;;  %2911 = vmatpush.bf16.msrb.mxu2 %v5454_v45 }
 0x2eb   : > { %4992 = vmatmul.msk.bf16.gmra.mxu2 %vm327_vm2, %v6519_v30  ;;  %2492 = vst [vmem:[#allocation3 + $0x79] sm:$0xff] %v2416_v8  ;;  %v2315_v13 = vadd.f32 %v2248_v40, %v2181_v38  ;;  %v2561_v39 = vpack.c.bf16 %v2525_v62, %v2525_v62  ;;  %5009 = vmatmul.msk.bf16.gmra.mxu3 %vm327_vm2, %v6547_v59  ;;  %v5469_v33 = vld [vmem:[%s7546_s5 + $0x198] sm:$0xff] }
 0x2ec   : > { %v3235_v62 = vpack.c.bf16 %v2416_v8, %v2416_v8  ;;  %3071 = vmatpush.bf16.msrb.mxu3 %v5470_v53  ;;  %3425 = vmatpush.bf16.msrb.mxu0 %v5478_v43  ;;  %v5477_v8 = vld [vmem:[%s7546_s5 + $0x58] sm:$0xff] }
 0x2ed   : > { %v2350_v47 = vmul.f32 %v6470_v58, %v2315_v13  ;;  %v2660_v22 = vunpack.c.l.b16 %v2561_v39  ;;  %v1778_v13 = vld [vmem:[#allocation2 + $0x19a] sm:$0xff]  ;;  %v1779_v39 = vld [vmem:[#allocation2 + $0x1a2] sm:$0xff] }
 0x2ee   : > { %v1983_v30 = vpop.f32.mrf.mxu2  ;;  %2912 = vmatpush.bf16.msrb.mxu2 %v5453_v29  ;;  %v1814_v45 = vpack.c.bf16 %v1778_v13, %v1778_v13  ;;  %v1815_v53 = vpack.c.bf16 %v1779_v39, %v1779_v39 }
 0x2ef   : > { %v6583_v60 = vpop.f32.mrf.mxu0  ;;  %v2048_v40 = vadd.f32 %v1983_v30, %v6286_v12  ;;  %v2385_v20 = vadd.f32 %v6477_v56, %v2350_v47  ;;  %v6600_v55 = vpack.c.b16 %v2660_v22, %v2659_v9  ;;  %v2117_v12 = vpop.f32.mrf.mxu3  ;;  %v1723_v47 = vadd.f32 %v6253_v3, %v6292_v4  ;;  %v5452_v3 = vld [vmem:[%s7546_s5 + $0x10] sm:$0xff] }
 0x2f0   : > { %v3320_v9 = vunpack.c.l.b16 %v3235_v62  ;;  %3072 = vmatpush.bf16.msrb.mxu3 %v5469_v33  ;;  %3426 = vmatpush.bf16.msrb.mxu0 %v5477_v8  ;;  %v5468_v4 = vld [vmem:[%s7546_s5 + $0x190] sm:$0xff]  ;;  %v2208_v33 = vunpack.c.l.b16 %v1814_v45  ;;  %v2209_v8 = vunpack.c.l.b16 %v1815_v53 }
 0x2f1   : > { %v2417_v38 = vmax.f32 %v2385_v20, 0.0  ;;  %v2182_v48 = vadd.f32 %v2117_v12, %v2048_v40  ;;  %2788 = vmatmul.bf16.gmra.mxu1 %v6600_v55 }
 0x2f2   : > { %v2526_v20 = vld [vmem:[#allocation3 + $0x78] sm:$0xff]  ;;  %2913 = vmatpush.bf16.msrb.mxu2 %v5452_v3  ;;  %v2210_v45 = vpack.c.b16 %v2209_v8, %v2208_v33  ;;  %v3189_v8 = vld [vmem:[#allocation3 + $0x1] sm:$0xff] }
 0x2f3   : > { %2493 = vst [vmem:[#allocation3 + $0x81] sm:$0xff] %v2417_v38  ;;  %v2316_v25 = vadd.f32 %v6569_v5, %v2182_v48  ;;  %v3236_v15 = vpack.c.bf16 %v2417_v38, %v2417_v38  ;;  %v5476_v38 = vld [vmem:[%s7546_s5 + $0x50] sm:$0xff] }
 0x2f4   : > { %3073 = vmatpush.bf16.msrb.mxu3 %v5468_v4  ;;  %3427 = vmatpush.bf16.msrb.mxu0 %v5476_v38  ;;  %v5450_v4 = vld [vmem:[%s7546_s5] sm:$0xff] }
 0x2f5   : > { %v2351_v30 = vmul.f32 %v6470_v58, %v2316_v25  ;;  %v3321_v22 = vunpack.c.l.b16 %v3236_v15  ;;  %v2562_v25 = vpack.c.bf16 %v2526_v20, %v2526_v20  ;;  %v5466_v38 = vld [vmem:[%s7546_s5 + $0x180] sm:$0xff] }
 0x2f6   : > { %v1985_v5 = vpop.f32.mrf.mxu2 }
 0x2f7   : > { %v6602_v37 = vpop.f32.mrf.mxu0  ;;  %v2049_v40 = vadd.f32 %v1985_v5, %v1723_v47  ;;  %v2386_v43 = vadd.f32 %v6477_v56, %v2351_v30  ;;  %v6643_v48 = vpack.c.b16 %v3321_v22, %v3320_v9  ;;  %v2119_v62 = vpop.f32.mrf.mxu3  ;;  %v5451_v30 = vld [vmem:[%s7546_s5 + $0x8] sm:$0xff]  ;;  %v2661_v22 = vunpack.c.l.b16 %v2562_v25 }
 0x2f8   : > { %v5467_v5 = vld [vmem:[%s7546_s5 + $0x188] sm:$0xff]  ;;  %2914 = vmatpush.bf16.msrb.mxu2 %v5451_v30 }
 0x2f9   : > { %v2418_v13 = vmax.f32 %v2386_v43, 0.0  ;;  %v2183_v39 = vadd.f32 %v2119_v62, %v2049_v40  ;;  %3074 = vmatpush.bf16.msrb.mxu3 %v5467_v5 }
 0x2fa   : > { %5027 = vmatmul.msk.bf16.gmra.mxu0 %vm327_vm2, %v6613_v57  ;;  %v2527_v29 = vld [vmem:[#allocation3 + $0x80] sm:$0xff] }
 0x2fb   : > { %4993 = vmatmul.msk.bf16.gmra.mxu2 %vm327_vm2, %v6547_v59  ;;  %2494 = vst [vmem:[#allocation3 + $0x91] sm:$0xff] %v2418_v13  ;;  %v2317_v15 = vadd.f32 %v6583_v60, %v2183_v39  ;;  %v2563_v47 = vpack.c.bf16 %v2527_v29, %v2527_v29  ;;  %v5475_v59 = vld [vmem:[%s7546_s5 + $0x48] sm:$0xff]  ;;  %5010 = vmatmul.msk.bf16.gmra.mxu3 %vm327_vm2, %v6571_v7 }
 0x2fc   : > { %3428 = vmatpush.bf16.msrb.mxu0 %v5475_v59  ;;  %2915 = vmatpush.bf16.msrb.mxu2 %v5450_v4  ;;  %v3237_v29 = vpack.c.bf16 %v2418_v13, %v2418_v13  ;;  %v3225_v13 = vpack.c.bf16 %v3189_v8, %v3189_v8  ;;  %v5486_v8 = vld [vmem:[%s7546_s5 + $0x120] sm:$0xff] }
 0x2fd   : > { %v2352_v9 = vmul.f32 %v6470_v58, %v2317_v15  ;;  %v2662_v40 = vunpack.c.l.b16 %v2563_v47  ;;  %3075 = vmatpush.bf16.msrb.mxu3 %v5466_v38  ;;  %v3190_v15 = vld [vmem:[#allocation3 + $0x9] sm:$0xff]  ;;  %v1725_v47 = vadd.f32 %v6275_v19, %v6307_v10  ;;  %3617 = vmatpush.bf16.msrb.mxu1 %v5486_v8 }
 0x2fe   : > { %v1988_v60 = vpop.f32.mrf.mxu2  ;;  %v3310_v10 = vunpack.c.l.b16 %v3225_v13 }
 0x2ff   : > { %v6632_v12 = vpop.f32.mrf.mxu0  ;;  %v2050_v20 = vadd.f32 %v1988_v60, %v6303_v42  ;;  %v2387_v53 = vadd.f32 %v6477_v56, %v2352_v9  ;;  %v6662_v43 = vpack.c.b16 %v2662_v40, %v2661_v22  ;;  %v5474_v42 = vld [vmem:[%s7546_s5 + $0x40] sm:$0xff]  ;;  %v2122_v62 = vpop.f32.mrf.mxu3  ;;  %v3322_v9 = vunpack.c.l.b16 %v3237_v29 }
 0x300   : > { %3429 = vmatpush.bf16.msrb.mxu0 %v5474_v42  ;;  %v3226_v40 = vpack.c.bf16 %v3190_v15, %v3190_v15 }
 0x301   : > { %v2419_v39 = vmax.f32 %v2387_v53, 0.0  ;;  %v2184_v25 = vadd.f32 %v2122_v62, %v2050_v20  ;;  %2793 = vmatmul.bf16.gmra.mxu1 %v6662_v43 }
 0x302   : > { %v2528_v22 = vld [vmem:[#allocation3 + $0x90] sm:$0xff] }
 0x303   : > { %2495 = vst [vmem:[#allocation3 + $0x99] sm:$0xff] %v2419_v39  ;;  %v2318_v33 = vadd.f32 %v6602_v37, %v2184_v25  ;;  %v3238_v30 = vpack.c.bf16 %v2419_v39, %v2419_v39  ;;  %v2564_v62 = vpack.c.bf16 %v2528_v22, %v2528_v22  ;;  %v3311_v39 = vunpack.c.l.b16 %v3226_v40 }
 0x305   : > { %v2353_v5 = vmul.f32 %v6470_v58, %v2318_v33  ;;  %v3323_v20 = vunpack.c.l.b16 %v3238_v30  ;;  %v2516_v33 = vld [vmem:[#allocation3] sm:$0xff]  ;;  %v2663_v30 = vunpack.c.l.b16 %v2564_v62 }
 0x306   : > { %v1990_v59 = vpop.f32.mrf.mxu2 }
 0x307   : > { %v6664_v3 = vpop.f32.mrf.mxu0  ;;  %v2051_v60 = vadd.f32 %v1990_v59, %v1725_v47  ;;  %v2124_v37 = vpop.f32.mrf.mxu3  ;;  %v6682_v4 = vpack.c.b16 %v3323_v20, %v3322_v9  ;;  %v2552_v59 = vpack.c.bf16 %v2516_v33, %v2516_v33  ;;  %v5538_v9 = vld [vmem:[#allocation3 + $0x8] sm:$0xff] }
 0x309   : > { %v2185_v42 = vadd.f32 %v2124_v37, %v2051_v60  ;;  %v3342_v60 = vpack.c.b16 %v3311_v39, %v3310_v10  ;;  %v1727_v10 = vadd.f32 %v6297_v28, %v6323_v0 }
 0x30a   : > { %5028 = vmatmul.msk.bf16.gmra.mxu0 %vm327_vm2, %v2210_v45  ;;  %v2388_v45 = vadd.f32 %v6477_v56, %v2353_v5  ;;  %v2529_v19 = vld [vmem:[#allocation3 + $0x98] sm:$0xff] }
 0x30b   : > { %4994 = vmatmul.msk.bf16.gmra.mxu2 %vm327_vm2, %v6571_v7  ;;  %v2319_v25 = vadd.f32 %v6632_v12, %v2185_v42  ;;  %v2565_v29 = vpack.c.bf16 %v2529_v19, %v2529_v19  ;;  %5011 = vmatmul.msk.bf16.gmra.mxu3 %vm327_vm2, %v6613_v57  ;;  %v2553_v12 = vpack.c.bf16 %v5538_v9, %v5538_v9  ;;  %v2856_v42 = vunpack.c.l.b16 %v2552_v59 }
 0x30c   : > { %v2420_v38 = vmax.f32 %v2388_v45, 0.0 }
 0x30d   : > { %v2354_v15 = vmul.f32 %v6470_v58, %v2319_v25  ;;  %v2664_v7 = vunpack.c.l.b16 %v2565_v29  ;;  %v2857_v62 = vunpack.c.l.b16 %v2553_v12 }
 0x30e   : > { %2496 = vst [vmem:[#allocation3 + $0xa9] sm:$0xff] %v2420_v38  ;;  %v1993_v47 = vpop.f32.mrf.mxu2  ;;  %v3239_v57 = vpack.c.bf16 %v2420_v38, %v2420_v38 }
 0x30f   : > { %v2263_v53 = vpop.f32.mrf.mxu0  ;;  %v2052_v5 = vadd.f32 %v1993_v47, %v6319_v35  ;;  %v2389_v22 = vadd.f32 %v6477_v56, %v2354_v15  ;;  %v6695_v13 = vpack.c.b16 %v2664_v7, %v2663_v30  ;;  %v2127_v20 = vpop.f32.mrf.mxu3  ;;  %v2858_v15 = vpack.c.b16 %v2857_v62, %v2856_v42 }
 0x310   : > { %v3324_v29 = vunpack.c.l.b16 %v3239_v57 }
 0x311   : > { %v2421_v45 = vmax.f32 %v2389_v22, 0.0  ;;  %v2186_v37 = vadd.f32 %v2127_v20, %v2052_v5  ;;  %2798 = vmatmul.bf16.gmra.mxu1 %v6695_v13 }
 0x313   : > { %2497 = vst [vmem:[#allocation3 + $0xb1] sm:$0xff] %v2421_v45  ;;  %v2320_v35 = vadd.f32 %v6664_v3, %v2186_v37  ;;  %v3240_v19 = vpack.c.bf16 %v2421_v45, %v2421_v45 }
 0x315   : > { %v2355_v39 = vmul.f32 %v6470_v58, %v2320_v35  ;;  %v3325_v33 = vunpack.c.l.b16 %v3240_v19  ;;  %v2530_v47 = vld [vmem:[#allocation3 + $0xa8] sm:$0xff] }
 0x316   : > { %v1995_v25 = vpop.f32.mrf.mxu2  ;;  %v2566_v9 = vpack.c.bf16 %v2530_v47, %v2530_v47 }
 0x317   : > { %v2266_v40 = vpop.f32.mrf.mxu0  ;;  %v2053_v8 = vadd.f32 %v1995_v25, %v1727_v10  ;;  %v2390_v38 = vadd.f32 %v6477_v56, %v2355_v39  ;;  %v6703_v7 = vpack.c.b16 %v3325_v33, %v3324_v29  ;;  %v2129_v5 = vpop.f32.mrf.mxu3  ;;  %v1729_v29 = vadd.f32 %v6314_v14, %v6340_v50 }
 0x318   : > { %v2665_v20 = vunpack.c.l.b16 %v2566_v9 }
 0x319   : > { %v2422_v59 = vmax.f32 %v2390_v38, 0.0  ;;  %v2187_v3 = vadd.f32 %v2129_v5, %v2053_v8 }
 0x31a   : > { %3430 = vmatmul.bf16.vlgmr.msrb.gmra.mxu0 %v3342_v60  ;;  %v2531_v12 = vld [vmem:[#allocation3 + $0xb0] sm:$0xff] }
 0x31b   : > { %2916 = vmatmul.bf16.vlgmr.msrb.gmra.mxu2 %v2858_v15  ;;  %2498 = vst [vmem:[#allocation3 + $0xc1] sm:$0xff] %v2422_v59  ;;  %v2321_v28 = vadd.f32 %v2263_v53, %v2187_v3  ;;  %v2567_v0 = vpack.c.bf16 %v2531_v12, %v2531_v12  ;;  %3076 = vmatmul.bf16.vlgmr.msrb.gmra.mxu3 %v6545_v21 }
 0x31c   : > { %v3241_v53 = vpack.c.bf16 %v2422_v59, %v2422_v59 }
 0x31d   : > { %v2356_v60 = vmul.f32 %v6470_v58, %v2321_v28  ;;  %v2666_v45 = vunpack.c.l.b16 %v2567_v0 }
 0x31e   : > { %v1998_v22 = vpop.f32.mrf.mxu2  ;;  %v3326_v8 = vunpack.c.l.b16 %v3241_v53 }
 0x31f   : > { %v2268_v30 = vpop.f32.mrf.mxu0  ;;  %v2054_v37 = vadd.f32 %v1998_v22, %v6334_v51  ;;  %v2391_v57 = vadd.f32 %v6477_v56, %v2356_v60  ;;  %v6709_v42 = vpack.c.b16 %v2666_v45, %v2665_v20  ;;  %v2132_v35 = vpop.f32.mrf.mxu3  ;;  %v5485_v60 = vld [vmem:[%s7546_s5 + $0x118] sm:$0xff] }
 0x320   : > { %3618 = vmatpush.bf16.msrb.mxu1 %v5485_v60 }
 0x321   : > { %v2423_v19 = vmax.f32 %v2391_v57, 0.0  ;;  %v2188_v10 = vadd.f32 %v2132_v35, %v2054_v37  ;;  %2803 = vmatmul.bf16.gmra.mxu1 %v6709_v42 }
 0x322   : > { %v2532_v38 = vld [vmem:[#allocation3 + $0xc0] sm:$0xff] }
 0x323   : > { %2499 = vst [vmem:[#allocation3 + $0xc9] sm:$0xff] %v2423_v19  ;;  %v2322_v39 = vadd.f32 %v2266_v40, %v2188_v10  ;;  %v3242_v25 = vpack.c.bf16 %v2423_v19, %v2423_v19  ;;  %v2568_v40 = vpack.c.bf16 %v2532_v38, %v2532_v38 }
 0x325   : > { %v2357_v51 = vmul.f32 %v6470_v58, %v2322_v39  ;;  %v3327_v15 = vunpack.c.l.b16 %v3242_v25  ;;  %v2667_v45 = vunpack.c.l.b16 %v2568_v40 }
 0x326   : > { %v2000_v33 = vpop.f32.mrf.mxu2 }
 0x327   : > { %v2271_v62 = vpop.f32.mrf.mxu0  ;;  %v2055_v47 = vadd.f32 %v2000_v33, %v1729_v29  ;;  %v2392_v5 = vadd.f32 %v6477_v56, %v2357_v51  ;;  %v6717_v9 = vpack.c.b16 %v3327_v15, %v3326_v8  ;;  %v2134_v59 = vpop.f32.mrf.mxu3  ;;  %v1731_v51 = vadd.f32 %v6336_v36, %v6356_v46 }
 0x329   : > { %v2424_v12 = vmax.f32 %v2392_v5, 0.0  ;;  %v2189_v28 = vadd.f32 %v2134_v59, %v2055_v47  ;;  %v6734_v47 = vpop.f32.mrf.mxu1 }
 0x32a   : > { %3435 = vmatmul.bf16.gmra.mxu0 %v6505_v31  ;;  %v2533_v0 = vld [vmem:[#allocation3 + $0xc8] sm:$0xff] }
 0x32b   : > { %2921 = vmatmul.bf16.gmra.mxu2 %v6517_v61  ;;  %2500 = vst [vmem:[#allocation3 + $0xd9] sm:$0xff] %v2424_v12  ;;  %v2323_v14 = vadd.f32 %v2268_v30, %v2189_v28  ;;  %v2569_v50 = vpack.c.bf16 %v2533_v0, %v2533_v0  ;;  %3081 = vmatmul.bf16.gmra.mxu3 %v6567_v24 }
 0x32c   : > { %v3243_v39 = vpack.c.bf16 %v2424_v12, %v2424_v12 }
 0x32d   : > { %v2358_v22 = vmul.f32 %v6470_v58, %v2323_v14  ;;  %v2668_v37 = vunpack.c.l.b16 %v2569_v50 }
 0x32e   : > { %v2003_v20 = vpop.f32.mrf.mxu2  ;;  %v3328_v8 = vunpack.c.l.b16 %v3243_v39 }
 0x32f   : > { %v2273_v3 = vpop.f32.mrf.mxu0  ;;  %v2056_v57 = vadd.f32 %v2003_v20, %v6349_v27  ;;  %v2393_v61 = vadd.f32 %v6477_v56, %v2358_v22  ;;  %v6727_v35 = vpack.c.b16 %v2668_v37, %v2667_v45  ;;  %v2137_v19 = vpop.f32.mrf.mxu3 }
 0x331   : > { %v2425_v10 = vmax.f32 %v2393_v61, 0.0  ;;  %v2190_v53 = vadd.f32 %v2137_v19, %v2056_v57  ;;  %2808 = vmatmul.bf16.gmra.mxu1 %v6727_v35 }
 0x332   : > { %v2534_v5 = vld [vmem:[#allocation3 + $0xd8] sm:$0xff] }
 0x333   : > { %2501 = vst [vmem:[#allocation3 + $0xe1] sm:$0xff] %v2425_v10  ;;  %v2324_v25 = vadd.f32 %v2271_v62, %v2190_v53  ;;  %v3244_v29 = vpack.c.bf16 %v2425_v10, %v2425_v10  ;;  %v2570_v14 = vpack.c.bf16 %v2534_v5, %v2534_v5 }
 0x335   : > { %v2359_v27 = vmul.f32 %v6470_v58, %v2324_v25  ;;  %v3329_v15 = vunpack.c.l.b16 %v3244_v29  ;;  %v2669_v20 = vunpack.c.l.b16 %v2570_v14 }
 0x336   : > { %v2005_v33 = vpop.f32.mrf.mxu2 }
 0x337   : > { %v2276_v30 = vpop.f32.mrf.mxu0  ;;  %v2057_v38 = vadd.f32 %v2005_v33, %v1731_v51  ;;  %v2394_v59 = vadd.f32 %v6477_v56, %v2359_v27  ;;  %v6737_v28 = vpack.c.b16 %v3329_v15, %v3328_v8  ;;  %v2139_v40 = vpop.f32.mrf.mxu3 }
 0x339   : > { %v2426_v62 = vmax.f32 %v2394_v59, 0.0  ;;  %v2191_v0 = vadd.f32 %v2139_v40, %v2057_v38 }
 0x33a   : > { %3440 = vmatmul.bf16.gmra.mxu0 %v6530_v54  ;;  %v2535_v36 = vld [vmem:[#allocation3 + $0xe0] sm:$0xff] }
 0x33b   : > { %2926 = vmatmul.bf16.gmra.mxu2 %v6545_v21  ;;  %2502 = vst [vmem:[#allocation3 + $0xf1] sm:$0xff] %v2426_v62  ;;  %v2325_v46 = vadd.f32 %v2273_v3, %v2191_v0  ;;  %v2571_v50 = vpack.c.bf16 %v2535_v36, %v2535_v36  ;;  %3086 = vmatmul.bf16.gmra.mxu3 %v6600_v55 }
 0x33c   : > { %v3245_v39 = vpack.c.bf16 %v2426_v62, %v2426_v62 }
 0x33d   : > { %v2360_v60 = vmul.f32 %v6470_v58, %v2325_v46  ;;  %v2670_v45 = vunpack.c.l.b16 %v2571_v50  ;;  %v5484_v50 = vld [vmem:[%s7546_s5 + $0x110] sm:$0xff] }
 0x33e   : > { %v2008_v22 = vpop.f32.mrf.mxu2  ;;  %v6743_v57 = vpop.f32.mrf.mxu1  ;;  %v3330_v33 = vunpack.c.l.b16 %v3245_v39  ;;  %3619 = vmatpush.bf16.msrb.mxu1 %v5484_v50 }
 0x33f   : > { %v2278_v12 = vpop.f32.mrf.mxu0  ;;  %v2058_v37 = vadd.f32 %v2008_v22, %v6368_v16  ;;  %v2395_v61 = vadd.f32 %v6477_v56, %v2360_v60  ;;  %v6746_v19 = vpack.c.b16 %v2670_v45, %v2669_v20  ;;  %v2142_v10 = vpop.f32.mrf.mxu3  ;;  %v1733_v16 = vadd.f32 %v6352_v2, %v6373_v32 }
 0x341   : > { %v2427_v53 = vmax.f32 %v2395_v61, 0.0  ;;  %v2192_v3 = vadd.f32 %v2142_v10, %v2058_v37  ;;  %2813 = vmatmul.bf16.gmra.mxu1 %v6746_v19 }
 0x342   : > { %v2536_v5 = vld [vmem:[#allocation3 + $0xf0] sm:$0xff] }
 0x343   : > { %2503 = vst [vmem:[#allocation3 + $0xf9] sm:$0xff] %v2427_v53  ;;  %v2326_v25 = vadd.f32 %v2276_v30, %v2192_v3  ;;  %v3246_v29 = vpack.c.bf16 %v2427_v53, %v2427_v53  ;;  %v2572_v36 = vpack.c.bf16 %v2536_v5, %v2536_v5 }
 0x345   : > { %v2361_v51 = vmul.f32 %v6470_v58, %v2326_v25  ;;  %v3331_v8 = vunpack.c.l.b16 %v3246_v29  ;;  %v2671_v20 = vunpack.c.l.b16 %v2572_v36 }
 0x346   : > { %v2010_v27 = vpop.f32.mrf.mxu2  ;;  %v6753_v38 = vpop.f32.mrf.mxu1 }
 0x347   : > { %v2281_v21 = vpop.f32.mrf.mxu0  ;;  %v2059_v15 = vadd.f32 %v2010_v27, %v1733_v16  ;;  %v2396_v59 = vadd.f32 %v6477_v56, %v2361_v51  ;;  %v6756_v62 = vpack.c.b16 %v3331_v8, %v3330_v33  ;;  %v2144_v0 = vpop.f32.mrf.mxu3 }
 0x349   : > { %v2428_v30 = vmax.f32 %v2396_v59, 0.0  ;;  %v2193_v14 = vadd.f32 %v2144_v0, %v2059_v15 }
 0x34a   : > { %3445 = vmatmul.bf16.gmra.mxu0 %v6555_v49  ;;  %v2537_v2 = vld [vmem:[#allocation3 + $0xf8] sm:$0xff] }
 0x34b   : > { %2931 = vmatmul.bf16.gmra.mxu2 %v6567_v24  ;;  %2504 = vst [vmem:[#allocation3 + $0x109] sm:$0xff] %v2428_v30  ;;  %v2327_v32 = vadd.f32 %v2278_v12, %v2193_v14  ;;  %v2573_v46 = vpack.c.bf16 %v2537_v2, %v2537_v2  ;;  %3091 = vmatmul.bf16.gmra.mxu3 %v6662_v43 }
 0x34d   : > { %v2362_v60 = vmul.f32 %v6470_v58, %v2327_v32  ;;  %v2672_v45 = vunpack.c.l.b16 %v2573_v46  ;;  %v3247_v58 = vpack.c.bf16 %v2428_v30, %v2428_v30 }
 0x34e   : > { %v2013_v22 = vpop.f32.mrf.mxu2  ;;  %v6765_v61 = vpop.f32.mrf.mxu1 }
 0x34f   : > { %v2283_v40 = vpop.f32.mrf.mxu0  ;;  %v2060_v37 = vadd.f32 %v2013_v22, %v6384_v17  ;;  %v2397_v24 = vadd.f32 %v6477_v56, %v2362_v60  ;;  %v6768_v12 = vpack.c.b16 %v2672_v45, %v2671_v20  ;;  %v2147_v53 = vpop.f32.mrf.mxu3  ;;  %v1735_v17 = vadd.f32 %v6377_v41, %v6389_v26  ;;  %v6777_v56 = vld [vmem:[%s7544_s3] ss:$0 sm:$0xff] }
 0x350   : > { %v3332_v27 = vunpack.c.l.b16 %v3247_v58 }
 0x351   : > { %v2429_v3 = vmax.f32 %v2397_v24, 0.0  ;;  %v2194_v39 = vadd.f32 %v2147_v53, %v2060_v37  ;;  %2818 = vmatmul.bf16.gmra.mxu1 %v6768_v12 }
 0x352   : > { %v2538_v5 = vld [vmem:[#allocation3 + $0x108] sm:$0xff] }
 0x353   : > { %2505 = vst [vmem:[#allocation3 + $0x111] sm:$0xff] %v2429_v3  ;;  %v2328_v25 = vadd.f32 %v2281_v21, %v2194_v39  ;;  %v3248_v29 = vpack.c.bf16 %v2429_v3, %v2429_v3  ;;  %v6785_v21 = vld [vmem:[%s7545_s4] ss:$0 sm:$0xff]  ;;  %v2574_v36 = vpack.c.bf16 %v2538_v5, %v2538_v5 }
 0x355   : > { %v2363_v16 = vmul.f32 %v6777_v56, %v2328_v25  ;;  %v3333_v33 = vunpack.c.l.b16 %v3248_v29  ;;  %v2673_v22 = vunpack.c.l.b16 %v2574_v36 }
 0x356   : > { %v2015_v51 = vpop.f32.mrf.mxu2  ;;  %v6780_v15 = vpop.f32.mrf.mxu1 }
 0x357   : > { %v2286_v10 = vpop.f32.mrf.mxu0  ;;  %v2061_v8 = vadd.f32 %v2015_v51, %v1735_v17  ;;  %v2398_v41 = vadd.f32 %v6785_v21, %v2363_v16  ;;  %v6788_v59 = vpack.c.b16 %v3333_v33, %v3332_v27  ;;  %v2149_v0 = vpop.f32.mrf.mxu3 }
 0x359   : > { %v2430_v30 = vmax.f32 %v2398_v41, 0.0  ;;  %v2195_v14 = vadd.f32 %v2149_v0, %v2061_v8 }
 0x35a   : > { %3450 = vmatmul.bf16.gmra.mxu0 %v6585_v34  ;;  %v2539_v2 = vld [vmem:[#allocation3 + $0x110] sm:$0xff] }
 0x35b   : > { %2936 = vmatmul.bf16.gmra.mxu2 %v6600_v55  ;;  %2506 = vst [vmem:[#allocation3 + $0x121] sm:$0xff] %v2430_v30  ;;  %v2329_v32 = vadd.f32 %v2283_v40, %v2195_v14  ;;  %v2575_v46 = vpack.c.bf16 %v2539_v2, %v2539_v2  ;;  %3096 = vmatmul.bf16.gmra.mxu3 %v6695_v13 }
 0x35c   : > { %v3249_v58 = vpack.c.bf16 %v2430_v30, %v2430_v30 }
 0x35d   : > { %v2364_v50 = vmul.f32 %v6777_v56, %v2329_v32  ;;  %v2674_v20 = vunpack.c.l.b16 %v2575_v46  ;;  %v5483_v46 = vld [vmem:[%s7546_s5 + $0x108] sm:$0xff] }
 0x35e   : > { %v2018_v60 = vpop.f32.mrf.mxu2  ;;  %v6794_v37 = vpop.f32.mrf.mxu1  ;;  %v3334_v51 = vunpack.c.l.b16 %v3249_v58  ;;  %3620 = vmatpush.bf16.msrb.mxu1 %v5483_v46 }
 0x35f   : > { %v2288_v26 = vpop.f32.mrf.mxu0  ;;  %v2062_v45 = vadd.f32 %v2018_v60, %v6403_v18  ;;  %v2399_v24 = vadd.f32 %v6785_v21, %v2364_v50  ;;  %v6797_v53 = vpack.c.b16 %v2674_v20, %v2673_v22  ;;  %v2152_v3 = vpop.f32.mrf.mxu3  ;;  %v1737_v18 = vadd.f32 %v6396_v63, %v6408_v11 }
 0x361   : > { %v2431_v39 = vmax.f32 %v2399_v24, 0.0  ;;  %v2196_v40 = vadd.f32 %v2152_v3, %v2062_v45  ;;  %2823 = vmatmul.bf16.gmra.mxu1 %v6797_v53 }
 0x362   : > { %v2540_v5 = vld [vmem:[#allocation3 + $0x120] sm:$0xff] }
 0x363   : > { %2507 = vst [vmem:[#allocation3 + $0x129] sm:$0xff] %v2431_v39  ;;  %v2330_v25 = vadd.f32 %v2286_v10, %v2196_v40  ;;  %v3250_v29 = vpack.c.bf16 %v2431_v39, %v2431_v39  ;;  %v2576_v2 = vpack.c.bf16 %v2540_v5, %v2540_v5 }
 0x365   : > { %v2365_v17 = vmul.f32 %v6777_v56, %v2330_v25  ;;  %v3335_v27 = vunpack.c.l.b16 %v3250_v29  ;;  %v2675_v22 = vunpack.c.l.b16 %v2576_v2 }
 0x366   : > { %v2020_v16 = vpop.f32.mrf.mxu2  ;;  %v6804_v8 = vpop.f32.mrf.mxu1 }
 0x367   : > { %v2291_v55 = vpop.f32.mrf.mxu0  ;;  %v2063_v33 = vadd.f32 %v2020_v16, %v1737_v18  ;;  %v2400_v41 = vadd.f32 %v6785_v21, %v2365_v17  ;;  %v6807_v30 = vpack.c.b16 %v3335_v27, %v3334_v51  ;;  %v2154_v14 = vpop.f32.mrf.mxu3 }
 0x369   : > { %v2432_v10 = vmax.f32 %v2400_v41, 0.0  ;;  %v2197_v36 = vadd.f32 %v2154_v14, %v2063_v33 }
 0x36a   : > { %3455 = vmatmul.bf16.gmra.mxu0 %v6643_v48  ;;  %v2541_v63 = vld [vmem:[#allocation3 + $0x128] sm:$0xff] }
 0x36b   : > { %2941 = vmatmul.bf16.gmra.mxu2 %v6662_v43  ;;  %2508 = vst [vmem:[#allocation3 + $0x139] sm:$0xff] %v2432_v10  ;;  %v2331_v11 = vadd.f32 %v2288_v26, %v2197_v36  ;;  %v2577_v32 = vpack.c.bf16 %v2541_v63, %v2541_v63  ;;  %3101 = vmatmul.bf16.gmra.mxu3 %v6709_v42 }
 0x36c   : > { %v3251_v25 = vpack.c.bf16 %v2432_v10, %v2432_v10 }
 0x36d   : > { %v2366_v50 = vmul.f32 %v6777_v56, %v2331_v11  ;;  %v2676_v20 = vunpack.c.l.b16 %v2577_v32 }
 0x36e   : > { %v2023_v60 = vpop.f32.mrf.mxu2  ;;  %v6816_v24 = vpop.f32.mrf.mxu1  ;;  %v3336_v27 = vunpack.c.l.b16 %v3251_v25 }
 0x36f   : > { %v2293_v0 = vpop.f32.mrf.mxu0  ;;  %v2064_v45 = vadd.f32 %v2023_v60, %v6417_v44  ;;  %v2401_v43 = vadd.f32 %v6785_v21, %v2366_v50  ;;  %v6819_v26 = vpack.c.b16 %v2676_v20, %v2675_v22  ;;  %v2157_v39 = vpop.f32.mrf.mxu3  ;;  %v7553_v44 = vld [vmem:[#allocation4_spill] sm:$0xff] }
 0x370   : > { %v1739_v17 = vadd.f32 %v7553_v44, %v6424_v23 }
 0x371   : > { %v2433_v40 = vmax.f32 %v2401_v43, 0.0  ;;  %v2198_v58 = vadd.f32 %v2157_v39, %v2064_v45  ;;  %2828 = vmatmul.bf16.gmra.mxu1 %v6819_v26 }
 0x372   : > { %v2542_v14 = vld [vmem:[#allocation3 + $0x138] sm:$0xff] }
 0x373   : > { %2509 = vst [vmem:[#allocation3 + $0x141] sm:$0xff] %v2433_v40  ;;  %v2332_v29 = vadd.f32 %v2291_v55, %v2198_v58  ;;  %v3252_v18 = vpack.c.bf16 %v2433_v40, %v2433_v40  ;;  %v2578_v32 = vpack.c.bf16 %v2542_v14, %v2542_v14 }
 0x375   : > { %v2367_v16 = vmul.f32 %v6777_v56, %v2332_v29  ;;  %v3337_v33 = vunpack.c.l.b16 %v3252_v18  ;;  %v2677_v20 = vunpack.c.l.b16 %v2578_v32 }
 0x376   : > { %v2025_v51 = vpop.f32.mrf.mxu2  ;;  %v6826_v41 = vpop.f32.mrf.mxu1 }
 0x377   : > { %v2296_v3 = vpop.f32.mrf.mxu0  ;;  %v2065_v5 = vadd.f32 %v2025_v51, %v1739_v17  ;;  %v2402_v36 = vadd.f32 %v6785_v21, %v2367_v16  ;;  %v6829_v2 = vpack.c.b16 %v3337_v33, %v3336_v27  ;;  %v2159_v63 = vpop.f32.mrf.mxu3  ;;  %v1741_v16 = vadd.f32 %v6436_v6, %v6440_v1 }
 0x379   : > { %v2434_v55 = vmax.f32 %v2402_v36, 0.0  ;;  %v2199_v11 = vadd.f32 %v2159_v63, %v2065_v5 }
 0x37a   : > { %3460 = vmatmul.bf16.gmra.mxu0 %v6682_v4  ;;  %v2543_v23 = vld [vmem:[#allocation3 + $0x140] sm:$0xff] }
 0x37b   : > { %2946 = vmatmul.bf16.gmra.mxu2 %v6695_v13  ;;  %2510 = vst [vmem:[#allocation3 + $0x151] sm:$0xff] %v2434_v55  ;;  %v2333_v46 = vadd.f32 %v2293_v0, %v2199_v11  ;;  %v2579_v50 = vpack.c.bf16 %v2543_v23, %v2543_v23  ;;  %3106 = vmatmul.bf16.gmra.mxu3 %v6727_v35 }
 0x37c   : > { %v3253_v18 = vpack.c.bf16 %v2434_v55, %v2434_v55 }
 0x37d   : > { %v2368_v60 = vmul.f32 %v6777_v56, %v2333_v46  ;;  %v2678_v45 = vunpack.c.l.b16 %v2579_v50 }
 0x37e   : > { %v2028_v22 = vpop.f32.mrf.mxu2  ;;  %v6835_v39 = vpop.f32.mrf.mxu1  ;;  %v3338_v33 = vunpack.c.l.b16 %v3253_v18 }
 0x37f   : > { %v2298_v10 = vpop.f32.mrf.mxu0  ;;  %v2066_v43 = vadd.f32 %v2028_v22, %v6433_v52  ;;  %v2403_v40 = vadd.f32 %v6785_v21, %v2368_v60  ;;  %v6838_v58 = vpack.c.b16 %v2678_v45, %v2677_v20  ;;  %v2162_v25 = vpop.f32.mrf.mxu3  ;;  %v5482_v52 = vld [vmem:[%s7546_s5 + $0x100] sm:$0xff] }
 0x380   : > { %3621 = vmatpush.bf16.msrb.mxu1 %v5482_v52 }
 0x381   : > { %v2435_v29 = vmax.f32 %v2403_v40, 0.0  ;;  %v2200_v0 = vadd.f32 %v2162_v25, %v2066_v43  ;;  %2833 = vmatmul.bf16.gmra.mxu1 %v6838_v58  ;;  %v7554_v40 = vld [vmem:[#allocation5_spill] sm:$0xff] }
 0x382   : > { %v2544_v63 = vld [vmem:[#allocation3 + $0x150] sm:$0xff] }
 0x383   : > { %2511 = vst [vmem:[#allocation3 + $0x159] sm:$0xff] %v2435_v29  ;;  %v2334_v44 = vadd.f32 %v2296_v3, %v2200_v0  ;;  %v3254_v17 = vpack.c.bf16 %v2435_v29, %v2435_v29  ;;  %v2580_v50 = vpack.c.bf16 %v2544_v63, %v2544_v63 }
 0x385   : > { %v2369_v51 = vmul.f32 %v6777_v56, %v2334_v44  ;;  %v3339_v5 = vunpack.c.l.b16 %v3254_v17  ;;  %v2679_v45 = vunpack.c.l.b16 %v2580_v50  ;;  %v5497_v17 = vld [vmem:[%s7546_s5 + $0x1f8] sm:$0xff] }
 0x386   : > { %v2030_v27 = vpop.f32.mrf.mxu2  ;;  %v6848_v36 = vpop.f32.mrf.mxu1  ;;  %3806 = vmatpush.bf16.msra.mxu2 %v5497_v17 }
 0x387   : > { %v2301_v13 = vpop.f32.mrf.mxu0  ;;  %v2067_v14 = vadd.f32 %v2030_v27, %v1741_v16  ;;  %v2404_v3 = vadd.f32 %v6785_v21, %v2369_v51  ;;  %v6851_v11 = vpack.c.b16 %v3339_v5, %v3338_v33  ;;  %v2164_v32 = vpop.f32.mrf.mxu3  ;;  %v7555_v33 = vld [vmem:[#allocation6_spill] sm:$0xff] }
 0x388   : > { %v1743_v5 = vadd.f32 %v6734_v47, %v7555_v33  ;;  %v5505_v47 = vld [vmem:[%s7546_s5 + $0xb8] sm:$0xff] }
 0x389   : > { %v2436_v23 = vmax.f32 %v2404_v3, 0.0  ;;  %v2201_v46 = vadd.f32 %v2164_v32, %v2067_v14  ;;  %4160 = vmatpush.bf16.msra.mxu3 %v5505_v47 }
 0x38a   : > { %3465 = vmatmul.bf16.gmra.mxu0 %v6703_v7  ;;  %v2545_v6 = vld [vmem:[#allocation3 + $0x158] sm:$0xff] }
 0x38b   : > { %2951 = vmatmul.bf16.gmra.mxu2 %v6709_v42  ;;  %2512 = vst [vmem:[#allocation3 + $0x169] sm:$0xff] %v2436_v23  ;;  %v2335_v1 = vadd.f32 %v2298_v10, %v2201_v46  ;;  %v2581_v60 = vpack.c.bf16 %v2545_v6, %v2545_v6  ;;  %3111 = vmatmul.bf16.gmra.mxu3 %v6746_v19 }
 0x38c   : > { %v3255_v16 = vpack.c.bf16 %v2436_v23, %v2436_v23 }
 0x38d   : > { %v2370_v22 = vmul.f32 %v6777_v56, %v2335_v1  ;;  %v2680_v43 = vunpack.c.l.b16 %v2581_v60 }
 0x38e   : > { %v2033_v20 = vpop.f32.mrf.mxu2  ;;  %v6857_v29 = vpop.f32.mrf.mxu1  ;;  %v3340_v3 = vunpack.c.l.b16 %v3255_v16 }
 0x38f   : > { %v2303_v55 = vpop.f32.mrf.mxu0  ;;  %v2068_v25 = vadd.f32 %v2033_v20, %v7554_v40  ;;  %v2405_v0 = vadd.f32 %v6785_v21, %v2370_v22  ;;  %v6860_v18 = vpack.c.b16 %v2680_v43, %v2679_v45  ;;  %v2167_v44 = vpop.f32.mrf.mxu3 }
 0x391   : > { %v2437_v52 = vmax.f32 %v2405_v0, 0.0  ;;  %v2202_v10 = vadd.f32 %v2167_v44, %v2068_v25  ;;  %2838 = vmatmul.bf16.gmra.mxu1 %v6860_v18 }
 0x392   : > { %v2546_v6 = vld [vmem:[#allocation3 + $0x168] sm:$0xff] }
 0x393   : > { %2513 = vst [vmem:[#allocation3 + $0x171] sm:$0xff] %v2437_v52  ;;  %v2336_v51 = vadd.f32 %v2301_v13, %v2202_v10  ;;  %v3256_v27 = vpack.c.bf16 %v2437_v52, %v2437_v52  ;;  %v2582_v45 = vpack.c.bf16 %v2546_v6, %v2546_v6 }
 0x395   : > { %v2371_v14 = vmul.f32 %v6777_v56, %v2336_v51  ;;  %v3341_v32 = vunpack.c.l.b16 %v3256_v27  ;;  %v2681_v52 = vunpack.c.l.b16 %v2582_v45 }
 0x396   : > { %v2035_v63 = vpop.f32.mrf.mxu2  ;;  %v6870_v50 = vpop.f32.mrf.mxu1 }
 0x397   : > { %v3431_v42 = vpop.f32.mrf.mxu0  ;;  %v2069_v46 = vadd.f32 %v2035_v63, %v1743_v5  ;;  %v2406_v23 = vadd.f32 %v6785_v21, %v2371_v14  ;;  %v6873_v60 = vpack.c.b16 %v3341_v32, %v3340_v3  ;;  %v2169_v13 = vpop.f32.mrf.mxu3  ;;  %v5521_v14 = vld [vmem:[%s7546_s5 + $0x238] sm:$0xff] }
 0x398   : > { %4544 = vmatpush.bf16.msra.mxu1 %v5521_v14 }
 0x399   : > { %v2438_v22 = vmax.f32 %v2406_v23, 0.0  ;;  %v2203_v20 = vadd.f32 %v2169_v13, %v2069_v46 }
 0x39a   : > { %3470 = vmatmul.bf16.gmra.mxu0 %v6717_v9  ;;  %v2547_v43 = vld [vmem:[#allocation3 + $0x170] sm:$0xff] }
 0x39b   : > { %2956 = vmatmul.bf16.gmra.mxu2 %v6727_v35  ;;  %2514 = vst [vmem:[#allocation3 + $0x181] sm:$0xff] %v2438_v22  ;;  %v2337_v40 = vadd.f32 %v2303_v55, %v2203_v20  ;;  %v2583_v25 = vpack.c.bf16 %v2547_v43, %v2547_v43  ;;  %3116 = vmatmul.bf16.gmra.mxu3 %v6768_v12 }
 0x39d   : > { %v2372_v0 = vmul.f32 %v6777_v56, %v2337_v40  ;;  %v2682_v10 = vunpack.c.l.b16 %v2583_v25  ;;  %v5513_v56 = vld [vmem:[%s7546_s5 + $0x178] sm:$0xff] }
 0x39e   : > { %v2917_v44 = vpop.f32.mrf.mxu2  ;;  %v6881_v17 = vpop.f32.mrf.mxu1  ;;  %4352 = vmatpush.bf16.msra.mxu0 %v5513_v56 }
 0x39f   : > { %v3433_v1 = vpop.f32.mrf.mxu0  ;;  %v2918_v16 = vadd.f32 %v2917_v44, %v6743_v57  ;;  %v2407_v51 = vadd.f32 %v6785_v21, %v2372_v0  ;;  %v6885_v27 = vpack.c.b16 %v2682_v10, %v2681_v52  ;;  %v3077_v33 = vpop.f32.mrf.mxu3 }
 0x3a1   : > { %v2439_v55 = vmax.f32 %v2407_v51, 0.0  ;;  %v3157_v5 = vadd.f32 %v3077_v33, %v2918_v16  ;;  %2843 = vmatmul.bf16.gmra.mxu1 %v6885_v27 }
 0x3a2   : > { %v2548_v32 = vld [vmem:[#allocation3 + $0x180] sm:$0xff] }
 0x3a3   : > { %2515 = vst [vmem:[#allocation3 + $0x189] sm:$0xff] %v2439_v55  ;;  %v6895_v57 = vadd.f32 %v3431_v42, %v3157_v5  ;;  %v2584_v13 = vpack.c.bf16 %v2548_v32, %v2548_v32  ;;  %v5504_v5 = vld [vmem:[%s7546_s5 + $0xb0] sm:$0xff] }
 0x3a4   : > { %4161 = vmatpush.bf16.msra.mxu3 %v5504_v5 }
 0x3a5   : > { %v2683_v47 = vunpack.c.l.b16 %v2584_v13 }
 0x3a6   : > { %v2919_v21 = vpop.f32.mrf.mxu2  ;;  %v6897_v63 = vpop.f32.mrf.mxu1 }
 0x3a7   : > { %v3436_v35 = vpop.f32.mrf.mxu0  ;;  %v2920_v3 = vadd.f32 %v2919_v21, %v6753_v38  ;;  %v3079_v6 = vpop.f32.mrf.mxu3 }
 0x3a9   : > { %v3158_v23 = vadd.f32 %v3079_v6, %v2920_v3  ;;  %v5512_v6 = vld [vmem:[%s7546_s5 + $0x170] sm:$0xff] }
 0x3aa   : > { %3475 = vmatmul.bf16.gmra.mxu0 %v6737_v28  ;;  %v2549_v22 = vld [vmem:[#allocation3 + $0x188] sm:$0xff] }
 0x3ab   : > { %2961 = vmatmul.bf16.gmra.mxu2 %v6746_v19  ;;  %v2585_v20 = vpack.c.bf16 %v2549_v22, %v2549_v22  ;;  %v6901_v45 = vadd.f32 %v3433_v1, %v3158_v23  ;;  %3121 = vmatmul.bf16.gmra.mxu3 %v6797_v53  ;;  %v5496_v19 = vld [vmem:[%s7546_s5 + $0x1f0] sm:$0xff] }
 0x3ac   : > { %3807 = vmatpush.bf16.msra.mxu2 %v5496_v19  ;;  %4353 = vmatpush.bf16.msra.mxu0 %v5512_v6  ;;  %v5511_v6 = vld [vmem:[%s7546_s5 + $0x168] sm:$0xff] }
 0x3ad   : > { %v2684_v43 = vunpack.c.l.b16 %v2585_v20 }
 0x3ae   : > { %v2922_v42 = vpop.f32.mrf.mxu2  ;;  %v6904_v40 = vpop.f32.mrf.mxu1 }
 0x3af   : > { %v3438_v46 = vpop.f32.mrf.mxu0  ;;  %v2923_v38 = vadd.f32 %v2922_v42, %v6765_v61  ;;  %v6907_v25 = vpack.c.b16 %v2684_v43, %v2683_v47  ;;  %v3082_v44 = vpop.f32.mrf.mxu3 }
 0x3b0   : > { %4354 = vmatpush.bf16.msra.mxu0 %v5511_v6  ;;  %v5507_v6 = vld [vmem:[%s7546_s5 + $0x148] sm:$0xff] }
 0x3b1   : > { %v3159_v52 = vadd.f32 %v3082_v44, %v2923_v38  ;;  %2848 = vmatmul.bf16.gmra.mxu1 %v6907_v25 }
 0x3b3   : > { %v6914_v1 = vadd.f32 %v3436_v35, %v3159_v52 }
 0x3b6   : > { %v2924_v10 = vpop.f32.mrf.mxu2  ;;  %v6916_v16 = vpop.f32.mrf.mxu1 }
 0x3b7   : > { %v3441_v0 = vpop.f32.mrf.mxu0  ;;  %v2925_v61 = vadd.f32 %v2924_v10, %v6780_v15  ;;  %v3084_v33 = vpop.f32.mrf.mxu3 }
 0x3b9   : > { %v3160_v55 = vadd.f32 %v3084_v33, %v2925_v61 }
 0x3ba   : > { %3480 = vmatmul.bf16.gmra.mxu0 %v6756_v62 }
 0x3bb   : > { %2966 = vmatmul.bf16.gmra.mxu2 %v6768_v12  ;;  %v6923_v56 = vadd.f32 %v3438_v46, %v3160_v55  ;;  %3126 = vmatmul.bf16.gmra.mxu3 %v6819_v26  ;;  %v5520_v12 = vld [vmem:[%s7546_s5 + $0x230] sm:$0xff]  ;;  %v5503_v55 = vld [vmem:[%s7546_s5 + $0xa8] sm:$0xff] }
 0x3bc   : > { %4545 = vmatpush.bf16.msra.mxu1 %v5520_v12  ;;  %4162 = vmatpush.bf16.msra.mxu3 %v5503_v55  ;;  %v5492_v55 = vld [vmem:[%s7546_s5 + $0x1d0] sm:$0xff] }
 0x3be   : > { %v2927_v35 = vpop.f32.mrf.mxu2  ;;  %v6926_v14 = vpop.f32.mrf.mxu1 }
 0x3bf   : > { %v3443_v51 = vpop.f32.mrf.mxu0  ;;  %v2928_v21 = vadd.f32 %v2927_v35, %v6794_v37  ;;  %v3087_v3 = vpop.f32.mrf.mxu3 }
 0x3c1   : > { %v3161_v32 = vadd.f32 %v3087_v3, %v2928_v21  ;;  %3622 = vmatmul.bf16.vlgmr.msrb.gmra.mxu1 %v6505_v31 }
 0x3c3   : > { %v6937_v46 = vadd.f32 %v3441_v0, %v3161_v32 }
 0x3c6   : > { %v2929_v37 = vpop.f32.mrf.mxu2  ;;  %v6939_v23 = vpop.f32.mrf.mxu1 }
 0x3c7   : > { %v3446_v15 = vpop.f32.mrf.mxu0  ;;  %v2930_v13 = vadd.f32 %v2929_v37, %v6804_v8  ;;  %v3089_v22 = vpop.f32.mrf.mxu3  ;;  %v5495_v8 = vld [vmem:[%s7546_s5 + $0x1e8] sm:$0xff] }
 0x3c8   : > { %3808 = vmatpush.bf16.msra.mxu2 %v5495_v8  ;;  %v5501_v8 = vld [vmem:[%s7546_s5 + $0x98] sm:$0xff] }
 0x3c9   : > { %v3162_v20 = vadd.f32 %v3089_v22, %v2930_v13 }
 0x3ca   : > { %3485 = vmatmul.bf16.gmra.mxu0 %v6788_v59 }
 0x3cb   : > { %2971 = vmatmul.bf16.gmra.mxu2 %v6797_v53  ;;  %v6943_v42 = vadd.f32 %v3443_v51, %v3162_v20  ;;  %3131 = vmatmul.bf16.gmra.mxu3 %v6838_v58 }
 0x3ce   : > { %v2932_v47 = vpop.f32.mrf.mxu2  ;;  %v6946_v43 = vpop.f32.mrf.mxu1 }
 0x3cf   : > { %v3448_v31 = vpop.f32.mrf.mxu0  ;;  %v2933_v38 = vadd.f32 %v2932_v47, %v6816_v24  ;;  %v3092_v44 = vpop.f32.mrf.mxu3  ;;  %v5494_v47 = vld [vmem:[%s7546_s5 + $0x1e0] sm:$0xff] }
 0x3d0   : > { %3809 = vmatpush.bf16.msra.mxu2 %v5494_v47 }
 0x3d1   : > { %v3163_v52 = vadd.f32 %v3092_v44, %v2933_v38  ;;  %3627 = vmatmul.bf16.gmra.mxu1 %v6530_v54  ;;  %v5502_v38 = vld [vmem:[%s7546_s5 + $0xa0] sm:$0xff] }
 0x3d2   : > { %4163 = vmatpush.bf16.msra.mxu3 %v5502_v38  ;;  %v5498_v38 = vld [vmem:[%s7546_s5 + $0x80] sm:$0xff] }
 0x3d3   : > { %v6954_v53 = vadd.f32 %v3446_v15, %v3163_v52  ;;  %v5493_v52 = vld [vmem:[%s7546_s5 + $0x1d8] sm:$0xff] }
 0x3d4   : > { %3810 = vmatpush.bf16.msra.mxu2 %v5493_v52 }
 0x3d6   : > { %v2934_v19 = vpop.f32.mrf.mxu2  ;;  %v6956_v10 = vpop.f32.mrf.mxu1  ;;  %4164 = vmatpush.bf16.msra.mxu3 %v5501_v8 }
 0x3d7   : > { %v3451_v0 = vpop.f32.mrf.mxu0  ;;  %v2935_v61 = vadd.f32 %v2934_v19, %v6826_v41  ;;  %v3094_v51 = vpop.f32.mrf.mxu3 }
 0x3d8   : > { %3811 = vmatpush.bf16.msra.mxu2 %v5492_v55 }
 0x3d9   : > { %v3164_v33 = vadd.f32 %v3094_v51, %v2935_v61 }
 0x3da   : > { %3490 = vmatmul.bf16.gmra.mxu0 %v6807_v30 }
 0x3db   : > { %2976 = vmatmul.bf16.gmra.mxu2 %v6819_v26  ;;  %v6963_v5 = vadd.f32 %v3448_v31, %v3164_v33  ;;  %3136 = vmatmul.bf16.gmra.mxu3 %v6860_v18  ;;  %v5519_v26 = vld [vmem:[%s7546_s5 + $0x228] sm:$0xff] }
 0x3dc   : > { %4546 = vmatpush.bf16.msra.mxu1 %v5519_v26 }
 0x3de   : > { %v2937_v35 = vpop.f32.mrf.mxu2  ;;  %v6966_v21 = vpop.f32.mrf.mxu1 }
 0x3df   : > { %v3453_v24 = vpop.f32.mrf.mxu0  ;;  %v2938_v15 = vadd.f32 %v2937_v35, %v6835_v39  ;;  %v3097_v3 = vpop.f32.mrf.mxu3  ;;  %v5500_v35 = vld [vmem:[%s7546_s5 + $0x90] sm:$0xff] }
 0x3e0   : > { %4165 = vmatpush.bf16.msra.mxu3 %v5500_v35 }
 0x3e1   : > { %v3165_v32 = vadd.f32 %v3097_v3, %v2938_v15  ;;  %3632 = vmatmul.bf16.gmra.mxu1 %v6555_v49  ;;  %v5491_v15 = vld [vmem:[%s7546_s5 + $0x1c8] sm:$0xff] }
 0x3e2   : > { %v5499_v3 = vld [vmem:[%s7546_s5 + $0x88] sm:$0xff]  ;;  %3812 = vmatpush.bf16.msra.mxu2 %v5491_v15 }
 0x3e3   : > { %v6977_v12 = vadd.f32 %v3451_v0, %v3165_v32  ;;  %v5510_v0 = vld [vmem:[%s7546_s5 + $0x160] sm:$0xff] }
 0x3e4   : > { %4355 = vmatpush.bf16.msra.mxu0 %v5510_v0  ;;  %4166 = vmatpush.bf16.msra.mxu3 %v5499_v3  ;;  %v5506_v0 = vld [vmem:[%s7546_s5 + $0x140] sm:$0xff]  ;;  %v3929_v3 = vld [vmem:[#allocation3 + $0x1a] sm:$0xff] }
 0x3e6   : > { %v2939_v39 = vpop.f32.mrf.mxu2  ;;  %v6979_v37 = vpop.f32.mrf.mxu1 }
 0x3e7   : > { %v3456_v41 = vpop.f32.mrf.mxu0  ;;  %v2940_v13 = vadd.f32 %v2939_v39, %v6848_v36  ;;  %v3099_v22 = vpop.f32.mrf.mxu3 }
 0x3e8   : > { %4167 = vmatpush.bf16.msra.mxu3 %v5498_v38 }
 0x3e9   : > { %v3166_v20 = vadd.f32 %v3099_v22, %v2940_v13 }
 0x3ea   : > { %3495 = vmatmul.bf16.gmra.mxu0 %v6829_v2 }
 0x3eb   : > { %2981 = vmatmul.bf16.gmra.mxu2 %v6838_v58  ;;  %v6992_v36 = vadd.f32 %v3453_v24, %v3166_v20  ;;  %3141 = vmatmul.bf16.gmra.mxu3 %v6885_v27  ;;  %v5509_v58 = vld [vmem:[%s7546_s5 + $0x158] sm:$0xff] }
 0x3ec   : > { %4356 = vmatpush.bf16.msra.mxu0 %v5509_v58  ;;  %v2550_v58 = vld [vmem:[#allocation3 + $0x198] sm:$0xff] }
 0x3ed   : > { %v2586_v55 = vpack.c.bf16 %v2550_v58, %v2550_v58 }
 0x3ee   : > { %v2942_v44 = vpop.f32.mrf.mxu2  ;;  %v7004_v19 = vpop.f32.mrf.mxu1 }
 0x3ef   : > { %v3458_v31 = vpop.f32.mrf.mxu0  ;;  %v2943_v61 = vadd.f32 %v2942_v44, %v6857_v29  ;;  %v3102_v51 = vpop.f32.mrf.mxu3  ;;  %v5508_v29 = vld [vmem:[%s7546_s5 + $0x150] sm:$0xff] }
 0x3f0   : > { %4357 = vmatpush.bf16.msra.mxu0 %v5508_v29 }
 0x3f1   : > { %v3167_v33 = vadd.f32 %v3102_v51, %v2943_v61  ;;  %3637 = vmatmul.bf16.gmra.mxu1 %v6585_v34 }
 0x3f3   : > { %v7024_v32 = vadd.f32 %v3456_v41, %v3167_v33  ;;  %v5490_v41 = vld [vmem:[%s7546_s5 + $0x1c0] sm:$0xff] }
 0x3f4   : > { %4358 = vmatpush.bf16.msra.mxu0 %v5507_v6  ;;  %3813 = vmatpush.bf16.msra.mxu2 %v5490_v41  ;;  %v3930_v6 = vld [vmem:[#allocation3 + $0x22] sm:$0xff]  ;;  %v3965_v41 = vpack.c.bf16 %v3929_v3, %v3929_v3 }
 0x3f5   : > { %v3966_v38 = vpack.c.bf16 %v3930_v6, %v3930_v6 }
 0x3f6   : > { %v2944_v26 = vpop.f32.mrf.mxu2  ;;  %v7029_v39 = vpop.f32.mrf.mxu1 }
 0x3f7   : > { %v3461_v24 = vpop.f32.mrf.mxu0  ;;  %v2945_v13 = vadd.f32 %v2944_v26, %v6870_v50  ;;  %v3104_v20 = vpop.f32.mrf.mxu3  ;;  %v4051_v58 = vunpack.c.l.b16 %v3966_v38 }
 0x3f8   : > { %4359 = vmatpush.bf16.msra.mxu0 %v5506_v0 }
 0x3f9   : > { %v3168_v47 = vadd.f32 %v3104_v20, %v2945_v13 }
 0x3fa   : > { %3500 = vmatmul.bf16.gmra.mxu0 %v6851_v11 }
 0x3fb   : > { %2986 = vmatmul.bf16.gmra.mxu2 %v6860_v18  ;;  %v7042_v50 = vadd.f32 %v3458_v31, %v3168_v47  ;;  %3146 = vmatmul.bf16.gmra.mxu3 %v6907_v25  ;;  %v5541_v18 = vld [vmem:[#allocation3 + $0x8] sm:$0xff]  ;;  %v5518_v31 = vld [vmem:[%s7546_s5 + $0x220] sm:$0xff] }
 0x3fc   : > { %v2587_v35 = vpack.c.bf16 %v5541_v18, %v5541_v18  ;;  %4547 = vmatpush.bf16.msra.mxu1 %v5518_v31  ;;  %v3927_v18 = vld [vmem:[#allocation3 + $0x2] sm:$0xff] }
 0x3fe   : > { %v2947_v44 = vpop.f32.mrf.mxu2  ;;  %v7045_v52 = vpop.f32.mrf.mxu1  ;;  %v3017_v15 = vunpack.c.l.b16 %v2587_v35 }
 0x3ff   : > { %v3463_v22 = vpop.f32.mrf.mxu0  ;;  %v2948_v8 = vadd.f32 %v2947_v44, %v6881_v17  ;;  %v3107_v51 = vpop.f32.mrf.mxu3  ;;  %v3016_v17 = vunpack.c.l.b16 %v2586_v55 }
 0x401   : > { %v3169_v33 = vadd.f32 %v3107_v51, %v2948_v8  ;;  %3642 = vmatmul.bf16.gmra.mxu1 %v6643_v48  ;;  %v3018_v44 = vpack.c.b16 %v3017_v15, %v3016_v17  ;;  %v3963_v17 = vpack.c.bf16 %v3927_v18, %v3927_v18 }
 0x403   : > { %v7053_v25 = vadd.f32 %v3461_v24, %v3169_v33  ;;  %v4050_v24 = vunpack.c.l.b16 %v3965_v41  ;;  %v4048_v6 = vunpack.c.l.b16 %v3963_v17  ;;  %v3932_v41 = vld [vmem:[#allocation3 + $0x3a] sm:$0xff] }
 0x406   : > { %v2949_v29 = vpop.f32.mrf.mxu2  ;;  %v7055_v26 = vpop.f32.mrf.mxu1 }
 0x407   : > { %v3466_v61 = vpop.f32.mrf.mxu0  ;;  %v2950_v13 = vadd.f32 %v2949_v29, %v6897_v63  ;;  %v3109_v47 = vpop.f32.mrf.mxu3  ;;  %v3928_v63 = vld [vmem:[#allocation3 + $0xa] sm:$0xff]  ;;  %v4081_v29 = vpack.c.b16 %v4051_v58, %v4050_v24  ;;  %v3968_v58 = vpack.c.bf16 %v3932_v41, %v3932_v41  ;;  %v3934_v41 = vld [vmem:[#allocation3 + $0x52] sm:$0xff] }
 0x409   : > { %v3170_v0 = vadd.f32 %v3109_v47, %v2950_v13  ;;  %v3931_v47 = vld [vmem:[#allocation3 + $0x32] sm:$0xff] }
 0x40a   : > { %3505 = vmatmul.bf16.gmra.mxu0 %v6873_v60  ;;  %v3967_v24 = vpack.c.bf16 %v3931_v47, %v3931_v47 }
 0x40b   : > { %2991 = vmatmul.bf16.gmra.mxu2 %v6885_v27  ;;  %v7059_v8 = vadd.f32 %v3463_v22, %v3170_v0  ;;  %3151 = vmatmul.bf16.gmra.mxu3 %v3018_v44  ;;  %v3964_v27 = vpack.c.bf16 %v3928_v63, %v3928_v63  ;;  %v4053_v63 = vunpack.c.l.b16 %v3968_v58 }
 0x40d   : > { %v4049_v13 = vunpack.c.l.b16 %v3964_v27 }
 0x40e   : > { %v2952_v51 = vpop.f32.mrf.mxu2  ;;  %v7061_v33 = vpop.f32.mrf.mxu1 }
 0x40f   : > { %v3468_v20 = vpop.f32.mrf.mxu0  ;;  %v2953_v55 = vadd.f32 %v2952_v51, %v6904_v40  ;;  %v3112_v31 = vpop.f32.mrf.mxu3 }
 0x411   : > { %v3171_v3 = vadd.f32 %v3112_v31, %v2953_v55  ;;  %3647 = vmatmul.bf16.gmra.mxu1 %v6682_v4  ;;  %v4080_v55 = vpack.c.b16 %v4049_v13, %v4048_v6  ;;  %v3933_v13 = vld [vmem:[#allocation3 + $0x4a] sm:$0xff] }
 0x412   : > { %v3969_v58 = vpack.c.bf16 %v3933_v13, %v3933_v13  ;;  %v3935_v13 = vld [vmem:[#allocation3 + $0x62] sm:$0xff] }
 0x413   : > { %v7065_v22 = vadd.f32 %v3466_v61, %v3171_v3  ;;  %v4052_v61 = vunpack.c.l.b16 %v3967_v24 }
 0x416   : > { %v2954_v15 = vpop.f32.mrf.mxu2  ;;  %v7067_v38 = vpop.f32.mrf.mxu1 }
 0x417   : > { %v3471_v35 = vpop.f32.mrf.mxu0  ;;  %v2955_v40 = vadd.f32 %v2954_v15, %v6916_v16  ;;  %v3114_v44 = vpop.f32.mrf.mxu3  ;;  %v7076_v15 = vpack.c.b16 %v4053_v63, %v4052_v61  ;;  %v4054_v63 = vunpack.c.l.b16 %v3969_v58  ;;  %v3971_v58 = vpack.c.bf16 %v3935_v13, %v3935_v13 }
 0x419   : > { %v3172_v51 = vadd.f32 %v3114_v44, %v2955_v40 }
 0x41a   : > { %4360 = vmatmul.bf16.vlgmr.msra.gmra.mxu0 %v4081_v29 }
 0x41b   : > { %3814 = vmatmul.bf16.vlgmr.msra.gmra.mxu2 %v6530_v54  ;;  %v7071_v18 = vadd.f32 %v3468_v20, %v3172_v51  ;;  %4168 = vmatmul.bf16.vlgmr.msra.gmra.mxu3 %v4080_v55  ;;  %v5517_v54 = vld [vmem:[%s7546_s5 + $0x218] sm:$0xff]  ;;  %v3970_v51 = vpack.c.bf16 %v3934_v41, %v3934_v41 }
 0x41c   : > { %4548 = vmatpush.bf16.msra.mxu1 %v5517_v54  ;;  %v3936_v41 = vld [vmem:[#allocation3 + $0x6a] sm:$0xff] }
 0x41e   : > { %v2957_v31 = vpop.f32.mrf.mxu2  ;;  %v7073_v3 = vpop.f32.mrf.mxu1 }
 0x41f   : > { %v3473_v0 = vpop.f32.mrf.mxu0  ;;  %v2958_v17 = vadd.f32 %v2957_v31, %v6926_v14  ;;  %v3117_v16 = vpop.f32.mrf.mxu3  ;;  %v4055_v31 = vunpack.c.l.b16 %v3970_v51  ;;  %v3972_v51 = vpack.c.bf16 %v3936_v41, %v3936_v41 }
 0x421   : > { %v3173_v47 = vadd.f32 %v3117_v16, %v2958_v17  ;;  %3652 = vmatmul.bf16.gmra.mxu1 %v6703_v7 }
 0x423   : > { %v7083_v20 = vadd.f32 %v3471_v35, %v3173_v47 }
 0x426   : > { %v2959_v6 = vpop.f32.mrf.mxu2  ;;  %v7085_v14 = vpop.f32.mrf.mxu1 }
 0x427   : > { %v3476_v27 = vpop.f32.mrf.mxu0  ;;  %v2960_v40 = vadd.f32 %v2959_v6, %v6939_v23  ;;  %v3119_v24 = vpop.f32.mrf.mxu3  ;;  %v7094_v23 = vpack.c.b16 %v4055_v31, %v4054_v63  ;;  %v4056_v31 = vunpack.c.l.b16 %v3971_v58 }
 0x429   : > { %v3174_v55 = vadd.f32 %v3119_v24, %v2960_v40 }
 0x42a   : > { %4365 = vmatmul.bf16.gmra.mxu0 %v7076_v15 }
 0x42b   : > { %3819 = vmatmul.bf16.gmra.mxu2 %v6555_v49  ;;  %v7089_v61 = vadd.f32 %v3473_v0, %v3174_v55  ;;  %4173 = vmatmul.bf16.gmra.mxu3 %v4081_v29 }
 0x42e   : > { %v2962_v35 = vpop.f32.mrf.mxu2  ;;  %v7091_v17 = vpop.f32.mrf.mxu1 }
 0x42f   : > { %v3478_v44 = vpop.f32.mrf.mxu0  ;;  %v2963_v16 = vadd.f32 %v2962_v35, %v6946_v43  ;;  %v3122_v54 = vpop.f32.mrf.mxu3  ;;  %v4057_v35 = vunpack.c.l.b16 %v3972_v51 }
 0x431   : > { %v3175_v6 = vadd.f32 %v3122_v54, %v2963_v16  ;;  %3657 = vmatmul.bf16.gmra.mxu1 %v6717_v9  ;;  %v7111_v13 = vpack.c.b16 %v4057_v35, %v4056_v31 }
 0x433   : > { %v7098_v49 = vadd.f32 %v3476_v27, %v3175_v6 }
 0x436   : > { %v2964_v0 = vpop.f32.mrf.mxu2  ;;  %v7100_v29 = vpop.f32.mrf.mxu1 }
 0x437   : > { %v3481_v47 = vpop.f32.mrf.mxu0  ;;  %v2965_v40 = vadd.f32 %v2964_v0, %v6956_v10  ;;  %v3124_v43 = vpop.f32.mrf.mxu3 }
 0x439   : > { %v3176_v55 = vadd.f32 %v3124_v43, %v2965_v40  ;;  %v3937_v40 = vld [vmem:[#allocation3 + $0x7a] sm:$0xff] }
 0x43a   : > { %4370 = vmatmul.bf16.gmra.mxu0 %v7094_v23  ;;  %v3973_v35 = vpack.c.bf16 %v3937_v40, %v3937_v40 }
 0x43b   : > { %3824 = vmatmul.bf16.gmra.mxu2 %v6585_v34  ;;  %v7104_v63 = vadd.f32 %v3478_v44, %v3176_v55  ;;  %4178 = vmatmul.bf16.gmra.mxu3 %v7076_v15  ;;  %v5516_v34 = vld [vmem:[%s7546_s5 + $0x210] sm:$0xff] }
 0x43c   : > { %4549 = vmatpush.bf16.msra.mxu1 %v5516_v34 }
 0x43e   : > { %v2967_v27 = vpop.f32.mrf.mxu2  ;;  %v3623_v54 = vpop.f32.mrf.mxu1 }
 0x43f   : > { %v3483_v24 = vpop.f32.mrf.mxu0  ;;  %v2968_v16 = vadd.f32 %v2967_v27, %v6966_v21  ;;  %v7109_v6 = vadd.f32 %v3623_v54, %v6895_v57  ;;  %v3127_v0 = vpop.f32.mrf.mxu3  ;;  %v3938_v57 = vld [vmem:[#allocation3 + $0x82] sm:$0xff] }
 0x440   : > { %v3974_v27 = vpack.c.bf16 %v3938_v57, %v3938_v57 }
 0x441   : > { %v3177_v41 = vadd.f32 %v3127_v0, %v2968_v16  ;;  %3662 = vmatmul.bf16.gmra.mxu1 %v6737_v28 }
 0x442   : > { %v4059_v0 = vunpack.c.l.b16 %v3974_v27 }
 0x443   : > { %v7118_v44 = vadd.f32 %v3481_v47, %v3177_v41  ;;  %v4058_v47 = vunpack.c.l.b16 %v3973_v35 }
 0x445   : > { %v7132_v40 = vpack.c.b16 %v4059_v0, %v4058_v47 }
 0x446   : > { %v2969_v21 = vpop.f32.mrf.mxu2  ;;  %v3625_v58 = vpop.f32.mrf.mxu1 }
 0x447   : > { %v3486_v10 = vpop.f32.mrf.mxu0  ;;  %v2970_v43 = vadd.f32 %v2969_v21, %v6979_v37  ;;  %v7122_v51 = vadd.f32 %v3625_v58, %v6901_v45  ;;  %v3129_v31 = vpop.f32.mrf.mxu3 }
 0x449   : > { %v3178_v16 = vadd.f32 %v3129_v31, %v2970_v43  ;;  %v3939_v43 = vld [vmem:[#allocation3 + $0x92] sm:$0xff]  ;;  %v3940_v31 = vld [vmem:[#allocation3 + $0x9a] sm:$0xff] }
 0x44a   : > { %4375 = vmatmul.bf16.gmra.mxu0 %v7111_v13  ;;  %v3975_v47 = vpack.c.bf16 %v3939_v43, %v3939_v43  ;;  %v3976_v0 = vpack.c.bf16 %v3940_v31, %v3940_v31 }
 0x44b   : > { %3829 = vmatmul.bf16.gmra.mxu2 %v6643_v48  ;;  %v7125_v54 = vadd.f32 %v3483_v24, %v3178_v16  ;;  %4183 = vmatmul.bf16.gmra.mxu3 %v7094_v23 }
 0x44e   : > { %v2972_v41 = vpop.f32.mrf.mxu2  ;;  %v3628_v34 = vpop.f32.mrf.mxu1 }
 0x44f   : > { %v3488_v55 = vpop.f32.mrf.mxu0  ;;  %v2973_v37 = vadd.f32 %v2972_v41, %v7004_v19  ;;  %v7130_v45 = vadd.f32 %v3628_v34, %v6914_v1  ;;  %v3132_v58 = vpop.f32.mrf.mxu3  ;;  %v4061_v34 = vunpack.c.l.b16 %v3976_v0 }
 0x451   : > { %v3179_v57 = vadd.f32 %v3132_v58, %v2973_v37  ;;  %3667 = vmatmul.bf16.gmra.mxu1 %v6756_v62 }
 0x453   : > { %v7136_v48 = vadd.f32 %v3486_v10, %v3179_v57  ;;  %v4060_v10 = vunpack.c.l.b16 %v3975_v47 }
 0x455   : > { %v7150_v43 = vpack.c.b16 %v4061_v34, %v4060_v10 }
 0x456   : > { %v2974_v24 = vpop.f32.mrf.mxu2  ;;  %v3630_v35 = vpop.f32.mrf.mxu1 }
 0x457   : > { %v3491_v21 = vpop.f32.mrf.mxu0  ;;  %v2975_v19 = vadd.f32 %v2974_v24, %v7029_v39  ;;  %v7140_v1 = vadd.f32 %v3630_v35, %v6923_v56  ;;  %v3134_v16 = vpop.f32.mrf.mxu3 }
 0x459   : > { %v3180_v41 = vadd.f32 %v3134_v16, %v2975_v19  ;;  %v3941_v19 = vld [vmem:[#allocation3 + $0xaa] sm:$0xff] }
 0x45a   : > { %4380 = vmatmul.bf16.gmra.mxu0 %v7132_v40  ;;  %v3977_v34 = vpack.c.bf16 %v3941_v19, %v3941_v19 }
 0x45b   : > { %3834 = vmatmul.bf16.gmra.mxu2 %v6682_v4  ;;  %v7143_v37 = vadd.f32 %v3488_v55, %v3180_v41  ;;  %4188 = vmatmul.bf16.gmra.mxu3 %v7111_v13  ;;  %v5515_v4 = vld [vmem:[%s7546_s5 + $0x208] sm:$0xff] }
 0x45c   : > { %4550 = vmatpush.bf16.msra.mxu1 %v5515_v4 }
 0x45e   : > { %v2977_v58 = vpop.f32.mrf.mxu2  ;;  %v3633_v57 = vpop.f32.mrf.mxu1 }
 0x45f   : > { %v3493_v27 = vpop.f32.mrf.mxu0  ;;  %v2978_v39 = vadd.f32 %v2977_v58, %v7045_v52  ;;  %v7148_v56 = vadd.f32 %v3633_v57, %v6937_v46  ;;  %v3137_v35 = vpop.f32.mrf.mxu3  ;;  %v3942_v46 = vld [vmem:[#allocation3 + $0xb2] sm:$0xff] }
 0x460   : > { %v3978_v58 = vpack.c.bf16 %v3942_v46, %v3942_v46 }
 0x461   : > { %v3181_v31 = vadd.f32 %v3137_v35, %v2978_v39  ;;  %3672 = vmatmul.bf16.gmra.mxu1 %v6788_v59 }
 0x462   : > { %v4063_v35 = vunpack.c.l.b16 %v3978_v58 }
 0x463   : > { %v7157_v55 = vadd.f32 %v3491_v21, %v3181_v31  ;;  %v4062_v21 = vunpack.c.l.b16 %v3977_v34 }
 0x465   : > { %v7171_v19 = vpack.c.b16 %v4063_v35, %v4062_v21 }
 0x466   : > { %v2979_v52 = vpop.f32.mrf.mxu2  ;;  %v3635_v47 = vpop.f32.mrf.mxu1 }
 0x467   : > { %v3496_v24 = vpop.f32.mrf.mxu0  ;;  %v2980_v16 = vadd.f32 %v2979_v52, %v7055_v26  ;;  %v7161_v0 = vadd.f32 %v3635_v47, %v6943_v42  ;;  %v3139_v10 = vpop.f32.mrf.mxu3 }
 0x469   : > { %v3182_v39 = vadd.f32 %v3139_v10, %v2980_v16  ;;  %v3943_v16 = vld [vmem:[#allocation3 + $0xc2] sm:$0xff]  ;;  %v3944_v10 = vld [vmem:[#allocation3 + $0xca] sm:$0xff] }
 0x46a   : > { %4385 = vmatmul.bf16.gmra.mxu0 %v7150_v43  ;;  %v3979_v21 = vpack.c.bf16 %v3943_v16, %v3943_v16  ;;  %v3980_v35 = vpack.c.bf16 %v3944_v10, %v3944_v10 }
 0x46b   : > { %3839 = vmatmul.bf16.gmra.mxu2 %v6703_v7  ;;  %v7164_v57 = vadd.f32 %v3493_v27, %v3182_v39  ;;  %4193 = vmatmul.bf16.gmra.mxu3 %v7132_v40 }
 0x46e   : > { %v2982_v31 = vpop.f32.mrf.mxu2  ;;  %v3638_v4 = vpop.f32.mrf.mxu1 }
 0x46f   : > { %v3498_v41 = vpop.f32.mrf.mxu0  ;;  %v2983_v26 = vadd.f32 %v2982_v31, %v7061_v33  ;;  %v7169_v42 = vadd.f32 %v3638_v4, %v6954_v53  ;;  %v3142_v47 = vpop.f32.mrf.mxu3  ;;  %v4065_v4 = vunpack.c.l.b16 %v3980_v35 }
 0x471   : > { %v3183_v46 = vadd.f32 %v3142_v47, %v2983_v26  ;;  %3677 = vmatmul.bf16.gmra.mxu1 %v6807_v30 }
 0x473   : > { %v7175_v7 = vadd.f32 %v3496_v24, %v3183_v46  ;;  %v4064_v24 = vunpack.c.l.b16 %v3979_v21 }
 0x475   : > { %v7189_v16 = vpack.c.b16 %v4065_v4, %v4064_v24 }
 0x476   : > { %v2984_v27 = vpop.f32.mrf.mxu2  ;;  %v3640_v34 = vpop.f32.mrf.mxu1 }
 0x477   : > { %v3501_v52 = vpop.f32.mrf.mxu0  ;;  %v2985_v33 = vadd.f32 %v2984_v27, %v7067_v38  ;;  %v7179_v53 = vadd.f32 %v3640_v34, %v6963_v5  ;;  %v3144_v39 = vpop.f32.mrf.mxu3 }
 0x479   : > { %v3184_v31 = vadd.f32 %v3144_v39, %v2985_v33  ;;  %v3945_v33 = vld [vmem:[#allocation3 + $0xda] sm:$0xff] }
 0x47a   : > { %4390 = vmatmul.bf16.gmra.mxu0 %v7171_v19  ;;  %v3981_v24 = vpack.c.bf16 %v3945_v33, %v3945_v33 }
 0x47b   : > { %3844 = vmatmul.bf16.gmra.mxu2 %v6717_v9  ;;  %v7182_v26 = vadd.f32 %v3498_v41, %v3184_v31  ;;  %4198 = vmatmul.bf16.gmra.mxu3 %v7150_v43  ;;  %v5514_v9 = vld [vmem:[%s7546_s5 + $0x200] sm:$0xff] }
 0x47c   : > { %4551 = vmatpush.bf16.msra.mxu1 %v5514_v9 }
 0x47e   : > { %v2987_v47 = vpop.f32.mrf.mxu2  ;;  %v3643_v46 = vpop.f32.mrf.mxu1 }
 0x47f   : > { %v3503_v58 = vpop.f32.mrf.mxu0  ;;  %v2988_v38 = vadd.f32 %v2987_v47, %v7073_v3  ;;  %v7187_v5 = vadd.f32 %v3643_v46, %v6977_v12  ;;  %v3147_v27 = vpop.f32.mrf.mxu3  ;;  %v3946_v12 = vld [vmem:[#allocation3 + $0xe2] sm:$0xff] }
 0x480   : > { %v3982_v4 = vpack.c.bf16 %v3946_v12, %v3946_v12 }
 0x481   : > { %v3185_v10 = vadd.f32 %v3147_v27, %v2988_v38  ;;  %3682 = vmatmul.bf16.gmra.mxu1 %v6829_v2 }
 0x482   : > { %v4067_v27 = vunpack.c.l.b16 %v3982_v4 }
 0x483   : > { %v7196_v41 = vadd.f32 %v3501_v52, %v3185_v10  ;;  %v4066_v52 = vunpack.c.l.b16 %v3981_v24 }
 0x485   : > { %v7210_v33 = vpack.c.b16 %v4067_v27, %v4066_v52 }
 0x486   : > { %v2989_v3 = vpop.f32.mrf.mxu2  ;;  %v3645_v21 = vpop.f32.mrf.mxu1 }
 0x487   : > { %v3506_v34 = vpop.f32.mrf.mxu0  ;;  %v2990_v39 = vadd.f32 %v2989_v3, %v7085_v14  ;;  %v7200_v35 = vadd.f32 %v3645_v21, %v6992_v36  ;;  %v3149_v31 = vpop.f32.mrf.mxu3  ;;  %v3947_v21 = vld [vmem:[#allocation3 + $0xf2] sm:$0xff] }
 0x489   : > { %v3186_v47 = vadd.f32 %v3149_v31, %v2990_v39  ;;  %v3948_v31 = vld [vmem:[#allocation3 + $0xfa] sm:$0xff] }
 0x48a   : > { %4395 = vmatmul.bf16.gmra.mxu0 %v7189_v16  ;;  %v3984_v52 = vpack.c.bf16 %v3948_v31, %v3948_v31 }
 0x48b   : > { %3849 = vmatmul.bf16.gmra.mxu2 %v6737_v28  ;;  %v7203_v46 = vadd.f32 %v3503_v58, %v3186_v47  ;;  %4203 = vmatmul.bf16.gmra.mxu3 %v7171_v19  ;;  %v3983_v47 = vpack.c.bf16 %v3947_v21, %v3947_v21 }
 0x48e   : > { %v2992_v10 = vpop.f32.mrf.mxu2  ;;  %v3648_v9 = vpop.f32.mrf.mxu1 }
 0x48f   : > { %v3508_v38 = vpop.f32.mrf.mxu0  ;;  %v2993_v14 = vadd.f32 %v2992_v10, %v7091_v17  ;;  %v7208_v36 = vadd.f32 %v3648_v9, %v7024_v32  ;;  %v3152_v3 = vpop.f32.mrf.mxu3 }
 0x491   : > { %v3187_v12 = vadd.f32 %v3152_v3, %v2993_v14  ;;  %3687 = vmatmul.bf16.gmra.mxu1 %v6851_v11  ;;  %v4069_v14 = vunpack.c.l.b16 %v3984_v52  ;;  %v3221_v52 = vld [vmem:[#allocation3 + $0x181] sm:$0xff] }
 0x493   : > { %v7214_v28 = vadd.f32 %v3506_v34, %v3187_v12  ;;  %v4068_v34 = vunpack.c.l.b16 %v3983_v47 }
 0x495   : > { %v7228_v21 = vpack.c.b16 %v4069_v14, %v4068_v34 }
 0x496   : > { %v2994_v39 = vpop.f32.mrf.mxu2  ;;  %v3650_v24 = vpop.f32.mrf.mxu1 }
 0x497   : > { %v4361_v58 = vpop.f32.mrf.mxu0  ;;  %v2995_v17 = vadd.f32 %v2994_v39, %v7100_v29  ;;  %v7218_v32 = vadd.f32 %v3650_v24, %v7042_v50  ;;  %v3154_v4 = vpop.f32.mrf.mxu3  ;;  %v3949_v24 = vld [vmem:[#allocation3 + $0x10a] sm:$0xff] }
 0x499   : > { %7556 = vst [vmem:[#allocation4_spill] sm:$0xff] %v7218_v32  ;;  %v3188_v27 = vadd.f32 %v3154_v4, %v2995_v17  ;;  %v3950_v4 = vld [vmem:[#allocation3 + $0x112] sm:$0xff] }
 0x49a   : > { %4400 = vmatmul.bf16.gmra.mxu0 %v7210_v33 }
 0x49b   : > { %3854 = vmatmul.bf16.gmra.mxu2 %v6756_v62  ;;  %v7221_v10 = vadd.f32 %v3508_v38, %v3188_v27  ;;  %4208 = vmatmul.bf16.gmra.mxu3 %v7189_v16  ;;  %v3222_v38 = vld [vmem:[#allocation3 + $0x189] sm:$0xff] }
 0x49c   : > { %v3258_v27 = vpack.c.bf16 %v3222_v38, %v3222_v38 }
 0x49e   : > { %v3815_v9 = vpop.f32.mrf.mxu2  ;;  %v3653_v3 = vpop.f32.mrf.mxu1 }
 0x49f   : > { %v3895_v29 = vadd.f32 %v3815_v9, %v7109_v6  ;;  %v4363_v12 = vpop.f32.mrf.mxu0  ;;  %v7226_v50 = vadd.f32 %v3653_v3, %v7053_v25  ;;  %v4169_v39 = vpop.f32.mrf.mxu3  ;;  %v3985_v9 = vpack.c.bf16 %v3949_v24, %v3949_v24  ;;  %v3986_v3 = vpack.c.bf16 %v3950_v4, %v3950_v4 }
 0x4a1   : > { %7557 = vst [vmem:[#allocation5_spill] sm:$0xff] %v7226_v50  ;;  %v4249_v31 = vadd.f32 %v4169_v39, %v3895_v29  ;;  %3692 = vmatmul.bf16.gmra.mxu1 %v6873_v60  ;;  %v3257_v39 = vpack.c.bf16 %v3221_v52, %v3221_v52  ;;  %v4070_v50 = vunpack.c.l.b16 %v3985_v9  ;;  %v4071_v32 = vunpack.c.l.b16 %v3986_v3  ;;  %v3952_v9 = vld [vmem:[#allocation3 + $0x12a] sm:$0xff] }
 0x4a3   : > { %v7232_v62 = vadd.f32 %v4361_v58, %v4249_v31  ;;  %v3563_v58 = vunpack.c.l.b16 %v3258_v27 }
 0x4a6   : > { %v3817_v17 = vpop.f32.mrf.mxu2  ;;  %v3655_v47 = vpop.f32.mrf.mxu1 }
 0x4a7   : > { %v3896_v6 = vadd.f32 %v3817_v17, %v7122_v51  ;;  %v7236_v25 = vadd.f32 %v3655_v47, %v7059_v8  ;;  %v4171_v34 = vpop.f32.mrf.mxu3  ;;  %v4366_v14 = vpop.f32.mrf.mxu0  ;;  %v3562_v17 = vunpack.c.l.b16 %v3257_v39 }
 0x4a9   : > { %v4250_v29 = vadd.f32 %v4171_v34, %v3896_v6  ;;  %v7246_v24 = vpack.c.b16 %v3563_v58, %v3562_v17  ;;  %v7248_v6 = vpack.c.b16 %v4071_v32, %v4070_v50  ;;  %v3951_v34 = vld [vmem:[#allocation3 + $0x122] sm:$0xff]  ;;  %v3988_v50 = vpack.c.bf16 %v3952_v9, %v3952_v9 }
 0x4aa   : > { %4405 = vmatmul.bf16.gmra.mxu0 %v7228_v21  ;;  %v3987_v32 = vpack.c.bf16 %v3951_v34, %v3951_v34  ;;  %v3953_v34 = vld [vmem:[#allocation3 + $0x13a] sm:$0xff]  ;;  %v3954_v9 = vld [vmem:[#allocation3 + $0x142] sm:$0xff] }
 0x4ab   : > { %3859 = vmatmul.bf16.gmra.mxu2 %v6788_v59  ;;  %v7239_v31 = vadd.f32 %v4363_v12, %v4250_v29  ;;  %4213 = vmatmul.bf16.gmra.mxu3 %v7210_v33  ;;  %v4073_v17 = vunpack.c.l.b16 %v3988_v50  ;;  %v3990_v50 = vpack.c.bf16 %v3954_v9, %v3954_v9  ;;  %v3956_v9 = vld [vmem:[#allocation3 + $0x15a] sm:$0xff] }
 0x4ae   : > { %v3820_v51 = vpop.f32.mrf.mxu2  ;;  %v3658_v8 = vpop.f32.mrf.mxu1 }
 0x4af   : > { %v3897_v38 = vadd.f32 %v3820_v51, %v7130_v45  ;;  %v7244_v47 = vadd.f32 %v3658_v8, %v7065_v22  ;;  %v4174_v4 = vpop.f32.mrf.mxu3  ;;  %v4368_v12 = vpop.f32.mrf.mxu0 }
 0x4b1   : > { %v4251_v59 = vadd.f32 %v4174_v4, %v3897_v38  ;;  %3697 = vmatmul.bf16.gmra.mxu1 %v7246_v24 }
 0x4b3   : > { %v7252_v52 = vadd.f32 %v4366_v14, %v4251_v59  ;;  %v4072_v14 = vunpack.c.l.b16 %v3987_v32  ;;  %v3989_v32 = vpack.c.bf16 %v3953_v34, %v3953_v34  ;;  %v3955_v34 = vld [vmem:[#allocation3 + $0x152] sm:$0xff] }
 0x4b5   : > { %v7266_v59 = vpack.c.b16 %v4073_v17, %v4072_v14  ;;  %v4075_v14 = vunpack.c.l.b16 %v3990_v50 }
 0x4b6   : > { %v3822_v27 = vpop.f32.mrf.mxu2  ;;  %v3660_v45 = vpop.f32.mrf.mxu1 }
 0x4b7   : > { %v3898_v22 = vadd.f32 %v3822_v27, %v7140_v1  ;;  %v7256_v3 = vadd.f32 %v3660_v45, %v7071_v18  ;;  %v4176_v29 = vpop.f32.mrf.mxu3  ;;  %v4371_v51 = vpop.f32.mrf.mxu0 }
 0x4b9   : > { %v4252_v39 = vadd.f32 %v4176_v29, %v3898_v22 }
 0x4ba   : > { %4410 = vmatmul.bf16.gmra.mxu0 %v7248_v6 }
 0x4bb   : > { %3864 = vmatmul.bf16.gmra.mxu2 %v6807_v30  ;;  %v7259_v58 = vadd.f32 %v4368_v12, %v4252_v39  ;;  %4218 = vmatmul.bf16.gmra.mxu3 %v7228_v21 }
 0x4be   : > { %v3825_v8 = vpop.f32.mrf.mxu2  ;;  %v3663_v38 = vpop.f32.mrf.mxu1 }
 0x4bf   : > { %v3899_v1 = vadd.f32 %v3825_v8, %v7148_v56  ;;  %v7264_v18 = vadd.f32 %v3663_v38, %v7083_v20  ;;  %v4179_v4 = vpop.f32.mrf.mxu3  ;;  %v4373_v45 = vpop.f32.mrf.mxu0 }
 0x4c1   : > { %v4253_v27 = vadd.f32 %v4179_v4, %v3899_v1  ;;  %4552 = vmatmul.bf16.vlgmr.msra.gmra.mxu1 %v7076_v15 }
 0x4c3   : > { %v7270_v30 = vadd.f32 %v4371_v51, %v4253_v27  ;;  %v4074_v51 = vunpack.c.l.b16 %v3989_v32 }
 0x4c5   : > { %v7284_v4 = vpack.c.b16 %v4075_v14, %v4074_v51 }
 0x4c6   : > { %v3827_v12 = vpop.f32.mrf.mxu2  ;;  %v3665_v22 = vpop.f32.mrf.mxu1 }
 0x4c7   : > { %v3900_v56 = vadd.f32 %v3827_v12, %v7161_v0  ;;  %v7274_v20 = vadd.f32 %v3665_v22, %v7089_v61  ;;  %v4181_v29 = vpop.f32.mrf.mxu3  ;;  %v4376_v61 = vpop.f32.mrf.mxu0 }
 0x4c9   : > { %v4254_v39 = vadd.f32 %v4181_v29, %v3900_v56  ;;  %v3991_v56 = vpack.c.bf16 %v3955_v34, %v3955_v34  ;;  %v3992_v29 = vpack.c.bf16 %v3956_v9, %v3956_v9  ;;  %v3960_v9 = vld [vmem:[#allocation3 + $0x18a] sm:$0xff] }
 0x4ca   : > { %4415 = vmatmul.bf16.gmra.mxu0 %v7266_v59 }
 0x4cb   : > { %3869 = vmatmul.bf16.gmra.mxu2 %v6829_v2  ;;  %v7277_v15 = vadd.f32 %v4373_v45, %v4254_v39  ;;  %4223 = vmatmul.bf16.gmra.mxu3 %v7248_v6  ;;  %v4076_v39 = vunpack.c.l.b16 %v3991_v56  ;;  %v4077_v51 = vunpack.c.l.b16 %v3992_v29  ;;  %v3223_v56 = vld [vmem:[#allocation3 + $0x199] sm:$0xff]  ;;  %v3224_v29 = vld [vmem:[#allocation3 + $0x1a1] sm:$0xff] }
 0x4ce   : > { %v3830_v17 = vpop.f32.mrf.mxu2  ;;  %v3668_v8 = vpop.f32.mrf.mxu1 }
 0x4cf   : > { %v3901_v38 = vadd.f32 %v3830_v17, %v7169_v42  ;;  %v7282_v0 = vadd.f32 %v3668_v8, %v7098_v49  ;;  %v4184_v1 = vpop.f32.mrf.mxu3  ;;  %v4378_v50 = vpop.f32.mrf.mxu0  ;;  %v3958_v8 = vld [vmem:[#allocation3 + $0x172] sm:$0xff] }
 0x4d1   : > { %v4255_v27 = vadd.f32 %v4184_v1, %v3901_v38  ;;  %4557 = vmatmul.bf16.gmra.mxu1 %v7094_v23  ;;  %v3994_v1 = vpack.c.bf16 %v3958_v8, %v3958_v8 }
 0x4d3   : > { %v7288_v2 = vadd.f32 %v4376_v61, %v4255_v27 }
 0x4d6   : > { %v3832_v12 = vpop.f32.mrf.mxu2  ;;  %v3670_v45 = vpop.f32.mrf.mxu1 }
 0x4d7   : > { %v3902_v42 = vadd.f32 %v3832_v12, %v7179_v53  ;;  %v7292_v49 = vadd.f32 %v3670_v45, %v7104_v63  ;;  %v4186_v22 = vpop.f32.mrf.mxu3  ;;  %v7301_v53 = vpack.c.b16 %v4077_v51, %v4076_v39  ;;  %v3957_v63 = vld [vmem:[#allocation3 + $0x16a] sm:$0xff]  ;;  %v4079_v12 = vunpack.c.l.b16 %v3994_v1 }
 0x4d8   : > { %v3993_v61 = vpack.c.bf16 %v3957_v63, %v3957_v63  ;;  %v3260_v39 = vpack.c.bf16 %v3224_v29, %v3224_v29  ;;  %v4381_v29 = vpop.f32.mrf.mxu0 }
 0x4d9   : > { %v4256_v32 = vadd.f32 %v4186_v22, %v3902_v42  ;;  %v3996_v22 = vpack.c.bf16 %v3960_v9, %v3960_v9 }
 0x4da   : > { %4420 = vmatmul.bf16.gmra.mxu0 %v7284_v4  ;;  %v4078_v27 = vunpack.c.l.b16 %v3993_v61  ;;  %v3755_v63 = vunpack.c.l.b16 %v3260_v39 }
 0x4db   : > { %3874 = vmatmul.bf16.gmra.mxu2 %v6851_v11  ;;  %v7295_v23 = vadd.f32 %v4378_v50, %v4256_v32  ;;  %4228 = vmatmul.bf16.gmra.mxu3 %v7266_v59  ;;  %v4301_v32 = vunpack.c.l.b16 %v3996_v22 }
 0x4de   : > { %v3673_v14 = vpop.f32.mrf.mxu1 }
 0x4df   : > { %v7299_v17 = vadd.f32 %v3673_v14, %v7118_v44 }
 0x4e1   : > { %4562 = vmatmul.bf16.gmra.mxu1 %v7111_v13  ;;  %v7313_v13 = vpack.c.b16 %v4079_v12, %v4078_v27 }
 0x4e6   : > { %v3675_v38 = vpop.f32.mrf.mxu1 }
 0x4e7   : > { %v7306_v11 = vadd.f32 %v3675_v38, %v7125_v54  ;;  %v3959_v54 = vld [vmem:[#allocation3 + $0x182] sm:$0xff] }
 0x4ea   : > { %4425 = vmatmul.bf16.gmra.mxu0 %v7301_v53 }
 0x4eb   : > { %3879 = vmatmul.bf16.gmra.mxu2 %v6873_v60  ;;  %4233 = vmatmul.bf16.gmra.mxu3 %v7284_v4  ;;  %v3995_v60 = vpack.c.bf16 %v3959_v54, %v3959_v54 }
 0x4ee   : > { %v3678_v44 = vpop.f32.mrf.mxu1 }
 0x4ef   : > { %v7311_v34 = vadd.f32 %v3678_v44, %v7136_v48  ;;  %v4300_v48 = vunpack.c.l.b16 %v3995_v60 }
 0x4f1   : > { %4567 = vmatmul.bf16.gmra.mxu1 %v7132_v40  ;;  %v3259_v40 = vpack.c.bf16 %v3223_v56, %v3223_v56  ;;  %v7325_v14 = vpack.c.b16 %v4301_v32, %v4300_v48 }
 0x4f6   : > { %v3680_v45 = vpop.f32.mrf.mxu1 }
 0x4f7   : > { %v7318_v42 = vadd.f32 %v3680_v45, %v7143_v37  ;;  %v3754_v37 = vunpack.c.l.b16 %v3259_v40 }
 0x4f9   : > { %v3756_v8 = vpack.c.b16 %v3755_v63, %v3754_v37 }
 0x4fa   : > { %4430 = vmatmul.bf16.gmra.mxu0 %v7313_v13 }
 0x4fb   : > { %3884 = vmatmul.bf16.gmra.mxu2 %v7246_v24  ;;  %4238 = vmatmul.bf16.gmra.mxu3 %v7301_v53 }
 0x4fe   : > { %v3683_v50 = vpop.f32.mrf.mxu1 }
 0x4ff   : > { %v7323_v51 = vadd.f32 %v3683_v50, %v7157_v55 }
 0x501   : > { %4572 = vmatmul.bf16.gmra.mxu1 %v7150_v43 }
 0x506   : > { %v3685_v24 = vpop.f32.mrf.mxu1 }
 0x507   : > { %v7330_v38 = vadd.f32 %v3685_v24, %v7164_v57 }
 0x50a   : > { %4435 = vmatmul.bf16.gmra.mxu0 %v7325_v14 }
 0x50b   : > { %3889 = vmatmul.bf16.gmra.mxu2 %v3756_v8  ;;  %4243 = vmatmul.bf16.gmra.mxu3 %v7313_v13  ;;  %v4383_v8 = vpop.f32.mrf.mxu0 }
 0x50e   : > { %v3688_v61 = vpop.f32.mrf.mxu1 }
 0x50f   : > { %v7334_v55 = vadd.f32 %v3688_v61, %v7175_v7 }
 0x511   : > { %4577 = vmatmul.bf16.gmra.mxu1 %v7171_v19 }
 0x516   : > { %v3690_v1 = vpop.f32.mrf.mxu1 }
 0x517   : > { %v7338_v43 = vadd.f32 %v3690_v1, %v7182_v26 }
 0x51e   : > { %v3693_v27 = vpop.f32.mrf.mxu1 }
 0x51f   : > { %v7341_v12 = vadd.f32 %v3693_v27, %v7196_v41  ;;  %v7357_v41 = vld [vmem:[%s7547_s6] ss:$0 sm:$0xff] }
 0x521   : > { %4582 = vmatmul.bf16.gmra.mxu1 %v7189_v16 }
 0x526   : > { %v3695_v57 = vpop.f32.mrf.mxu1 }
 0x527   : > { %v7345_v44 = vadd.f32 %v3695_v57, %v7203_v46  ;;  %v7363_v46 = vld [vmem:[%s7548_s7] ss:$0 sm:$0xff] }
 0x52e   : > { %v3698_v54 = vpop.f32.mrf.mxu1 }
 0x52f   : > { %v7348_v7 = vadd.f32 %v3698_v54, %v7214_v28 }
 0x531   : > { %4587 = vmatmul.bf16.gmra.mxu1 %v7210_v33 }
 0x536   : > { %v3700_v19 = vpop.f32.mrf.mxu1 }
 0x537   : > { %v7352_v26 = vadd.f32 %v3700_v19, %v7221_v10  ;;  %v3835_v10 = vpop.f32.mrf.mxu2 }
 0x53e   : > { %v4553_v16 = vpop.f32.mrf.mxu1 }
 0x53f   : > { %v4633_v9 = vadd.f32 %v4553_v16, %v7232_v62  ;;  %v3837_v32 = vpop.f32.mrf.mxu2  ;;  %v4386_v16 = vpop.f32.mrf.mxu0 }
 0x541   : > { %v4668_v28 = vmul.f32 %v7357_v41, %v4633_v9  ;;  %4592 = vmatmul.bf16.gmra.mxu1 %v7228_v21  ;;  %v4189_v21 = vpop.f32.mrf.mxu3 }
 0x543   : > { %v4703_v33 = vadd.f32 %v7363_v46, %v4668_v28 }
 0x545   : > { %v4735_v62 = vmax.f32 %v4703_v33, 0.0 }
 0x546   : > { %v4555_v45 = vpop.f32.mrf.mxu1 }
 0x547   : > { %4767 = vst.msk [vmem:[%s7373_s21] sm:$0xff] %vm327_vm2, %v4735_v62  ;;  %v4634_v60 = vadd.f32 %v4555_v45, %v7239_v31  ;;  %v3840_v1 = vpop.f32.mrf.mxu2 }
 0x549   : > { %v4669_v22 = vmul.f32 %v7357_v41, %v4634_v60  ;;  %v4191_v37 = vpop.f32.mrf.mxu3 }
 0x54b   : > { %v4704_v56 = vadd.f32 %v7363_v46, %v4669_v22 }
 0x54d   : > { %v4736_v48 = vmax.f32 %v4704_v56, 0.0  ;;  %v4388_v56 = vpop.f32.mrf.mxu0 }
 0x54e   : > { %v4558_v50 = vpop.f32.mrf.mxu1 }
 0x54f   : > { %4768 = vst.msk [vmem:[%s7373_s21 + $0x8] sm:$0xff] %vm327_vm2, %v4736_v48  ;;  %v4635_v40 = vadd.f32 %v4558_v50, %v7252_v52 }
 0x551   : > { %v4670_v39 = vmul.f32 %v7357_v41, %v4635_v40  ;;  %4597 = vmatmul.bf16.gmra.mxu1 %v7248_v6  ;;  %v4194_v54 = vpop.f32.mrf.mxu3 }
 0x553   : > { %v4705_v31 = vadd.f32 %v7363_v46, %v4670_v39 }
 0x555   : > { %v4737_v63 = vmax.f32 %v4705_v31, 0.0 }
 0x556   : > { %v4560_v24 = vpop.f32.mrf.mxu1 }
 0x557   : > { %4769 = vst.msk [vmem:[%s7373_s21 + $0x10] sm:$0xff] %vm327_vm2, %v4737_v63  ;;  %v4636_v61 = vadd.f32 %v4560_v24, %v7259_v58  ;;  %v3842_v58 = vpop.f32.mrf.mxu2  ;;  %v3903_v63 = vadd.f32 %v3835_v10, %v7187_v5  ;;  %v4391_v24 = vpop.f32.mrf.mxu0 }
 0x559   : > { %v4671_v27 = vmul.f32 %v7357_v41, %v4636_v61  ;;  %v4196_v60 = vpop.f32.mrf.mxu3 }
 0x55b   : > { %v4706_v52 = vadd.f32 %v7363_v46, %v4671_v27 }
 0x55d   : > { %v4738_v57 = vmax.f32 %v4706_v52, 0.0 }
 0x55e   : > { %v4563_v19 = vpop.f32.mrf.mxu1 }
 0x55f   : > { %4770 = vst.msk [vmem:[%s7373_s21 + $0x18] sm:$0xff] %vm327_vm2, %v4738_v57  ;;  %v4637_v6 = vadd.f32 %v4563_v19, %v7270_v30  ;;  %v3845_v48 = vpop.f32.mrf.mxu2  ;;  %v4257_v19 = vadd.f32 %v4189_v21, %v3903_v63 }
 0x561   : > { %v4672_v9 = vmul.f32 %v7357_v41, %v4637_v6  ;;  %4602 = vmatmul.bf16.gmra.mxu1 %v7266_v59  ;;  %v4199_v31 = vpop.f32.mrf.mxu3  ;;  %v4449_v5 = vadd.f32 %v4381_v29, %v4257_v19 }
 0x563   : > { %v4707_v28 = vadd.f32 %v7363_v46, %v4672_v9  ;;  %v3904_v9 = vadd.f32 %v3837_v32, %v7200_v35 }
 0x565   : > { %v4739_v33 = vmax.f32 %v4707_v28, 0.0 }
 0x566   : > { %v4565_v62 = vpop.f32.mrf.mxu1 }
 0x567   : > { %4771 = vst.msk [vmem:[%s7373_s21 + $0x20] sm:$0xff] %vm327_vm2, %v4739_v33  ;;  %v4638_v45 = vadd.f32 %v4565_v62, %v7277_v15  ;;  %v3847_v27 = vpop.f32.mrf.mxu2  ;;  %v4393_v33 = vpop.f32.mrf.mxu0 }
 0x569   : > { %v4673_v22 = vmul.f32 %v7357_v41, %v4638_v45 }
 0x56b   : > { %v4708_v30 = vadd.f32 %v7363_v46, %v4673_v22  ;;  %v4258_v22 = vadd.f32 %v4191_v37, %v3904_v9 }
 0x56d   : > { %v4740_v50 = vmax.f32 %v4708_v30, 0.0  ;;  %v3905_v30 = vadd.f32 %v3840_v1, %v7208_v36  ;;  %v4450_v32 = vadd.f32 %v4383_v8, %v4258_v22 }
 0x56e   : > { %v4568_v40 = vpop.f32.mrf.mxu1 }
 0x56f   : > { %4772 = vst.msk [vmem:[%s7373_s21 + $0x28] sm:$0xff] %vm327_vm2, %v4740_v50  ;;  %v4639_v59 = vadd.f32 %v4568_v40, %v7288_v2  ;;  %v3850_v45 = vpop.f32.mrf.mxu2 }
 0x571   : > { %v4674_v39 = vmul.f32 %v7357_v41, %v4639_v59  ;;  %4607 = vmatmul.bf16.gmra.mxu1 %v7284_v4  ;;  %v4201_v4 = vpop.f32.mrf.mxu3  ;;  %v4259_v59 = vadd.f32 %v4194_v54, %v3905_v30 }
 0x573   : > { %v4709_v15 = vadd.f32 %v7363_v46, %v4674_v39  ;;  %v4396_v39 = vpop.f32.mrf.mxu0  ;;  %v4451_v36 = vadd.f32 %v4386_v16, %v4259_v59 }
 0x575   : > { %v4741_v61 = vmax.f32 %v4709_v15, 0.0 }
 0x576   : > { %v4570_v52 = vpop.f32.mrf.mxu1 }
 0x577   : > { %4773 = vst.msk [vmem:[%s7373_s21 + $0x30] sm:$0xff] %vm327_vm2, %v4741_v61  ;;  %v4640_v57 = vadd.f32 %v4570_v52, %v7295_v23  ;;  %v3852_v15 = vpop.f32.mrf.mxu2 }
 0x579   : > { %v4675_v2 = vmul.f32 %v7357_v41, %v4640_v57  ;;  %v4204_v50 = vpop.f32.mrf.mxu3 }
 0x57b   : > { %v4710_v6 = vadd.f32 %v7363_v46, %v4675_v2  ;;  %v4398_v54 = vpop.f32.mrf.mxu0 }
 0x57d   : > { %v4742_v28 = vmax.f32 %v4710_v6, 0.0 }
 0x57e   : > { %v4573_v10 = vpop.f32.mrf.mxu1 }
 0x57f   : > { %4774 = vst.msk [vmem:[%s7373_s21 + $0x38] sm:$0xff] %vm327_vm2, %v4742_v28  ;;  %v4641_v62 = vadd.f32 %v4573_v10, %v4449_v5  ;;  %v3855_v9 = vpop.f32.mrf.mxu2  ;;  %v7559_v28 = vld [vmem:[#allocation5_spill] sm:$0xff] }
 0x580   : > { %v3907_v5 = vadd.f32 %v3845_v48, %v7559_v28 }
 0x581   : > { %v4676_v23 = vmul.f32 %v7357_v41, %v4641_v62  ;;  %4612 = vmatmul.bf16.gmra.mxu1 %v7301_v53  ;;  %v7558_v53 = vld [vmem:[#allocation4_spill] sm:$0xff]  ;;  %v4206_v57 = vpop.f32.mrf.mxu3 }
 0x582   : > { %v3906_v61 = vadd.f32 %v3842_v58, %v7558_v53  ;;  %v4261_v22 = vadd.f32 %v4199_v31, %v3907_v5  ;;  %v3961_v31 = vld [vmem:[#allocation3 + $0x19a] sm:$0xff] }
 0x583   : > { %v4711_v21 = vadd.f32 %v7363_v46, %v4676_v23  ;;  %v4401_v30 = vpop.f32.mrf.mxu0 }
 0x584   : > { %v4260_v19 = vadd.f32 %v4196_v60, %v3906_v61  ;;  %v3997_v61 = vpack.c.bf16 %v3961_v31, %v3961_v31 }
 0x585   : > { %v4743_v35 = vmax.f32 %v4711_v21, 0.0 }
 0x586   : > { %v4575_v29 = vpop.f32.mrf.mxu1  ;;  %v4452_v10 = vadd.f32 %v4388_v56, %v4260_v19 }
 0x587   : > { %4775 = vst.msk [vmem:[%s7373_s21 + $0x40] sm:$0xff] %vm327_vm2, %v4743_v35  ;;  %v4642_v40 = vadd.f32 %v4575_v29, %v4450_v32  ;;  %v4453_v32 = vadd.f32 %v4391_v24, %v4261_v22  ;;  %v3857_v29 = vpop.f32.mrf.mxu2 }
 0x588   : > { %v3912_v31 = vadd.f32 %v3857_v29, %v7274_v20 }
 0x589   : > { %v4677_v37 = vmul.f32 %v7357_v41, %v4642_v40  ;;  %v4209_v23 = vpop.f32.mrf.mxu3 }
 0x58b   : > { %v4712_v63 = vadd.f32 %v7363_v46, %v4677_v37  ;;  %v3962_v37 = vld [vmem:[#allocation3 + $0x1a2] sm:$0xff] }
 0x58d   : > { %v4744_v52 = vmax.f32 %v4712_v63, 0.0 }
 0x58e   : > { %v4578_v1 = vpop.f32.mrf.mxu1 }
 0x58f   : > { %4776 = vst.msk [vmem:[%s7373_s21 + $0x48] sm:$0xff] %vm327_vm2, %v4744_v52  ;;  %v4643_v8 = vadd.f32 %v4578_v1, %v4451_v36  ;;  %v3998_v52 = vpack.c.bf16 %v3962_v37, %v3962_v37  ;;  %v4403_v1 = vpop.f32.mrf.mxu0 }
 0x591   : > { %v4678_v2 = vmul.f32 %v7357_v41, %v4643_v8  ;;  %4617 = vmatmul.bf16.gmra.mxu1 %v7313_v13  ;;  %v3908_v13 = vadd.f32 %v3847_v27, %v7236_v25  ;;  %v4211_v53 = vpop.f32.mrf.mxu3  ;;  %v3909_v27 = vadd.f32 %v3850_v45, %v7244_v47  ;;  %v3860_v8 = vpop.f32.mrf.mxu2 }
 0x593   : > { %v4713_v6 = vadd.f32 %v7363_v46, %v4678_v2  ;;  %v4262_v40 = vadd.f32 %v4201_v4, %v3908_v13  ;;  %v4263_v19 = vadd.f32 %v4204_v50, %v3909_v27  ;;  %v4492_v2 = vunpack.c.l.b16 %v3997_v61 }
 0x594   : > { %v3911_v13 = vadd.f32 %v3855_v9, %v7264_v18 }
 0x595   : > { %v4745_v58 = vmax.f32 %v4713_v6, 0.0  ;;  %v4454_v25 = vadd.f32 %v4393_v33, %v4262_v40  ;;  %v4493_v6 = vunpack.c.l.b16 %v3998_v52  ;;  %v3910_v33 = vadd.f32 %v3852_v15, %v7256_v3 }
 0x596   : > { %v4580_v16 = vpop.f32.mrf.mxu1  ;;  %v4455_v45 = vadd.f32 %v4396_v39, %v4263_v19 }
 0x597   : > { %4777 = vst.msk [vmem:[%s7373_s21 + $0x50] sm:$0xff] %vm327_vm2, %v4745_v58  ;;  %v4644_v62 = vadd.f32 %v4580_v16, %v4452_v10  ;;  %v4494_v5 = vpack.c.b16 %v4493_v6, %v4492_v2  ;;  %v4406_v22 = vpop.f32.mrf.mxu0 }
 0x599   : > { %v4679_v60 = vmul.f32 %v7357_v41, %v4644_v62  ;;  %v4214_v58 = vpop.f32.mrf.mxu3  ;;  %v4264_v62 = vadd.f32 %v4206_v57, %v3910_v33 }
 0x59b   : > { %v4714_v21 = vadd.f32 %v7363_v46, %v4679_v60  ;;  %v3862_v60 = vpop.f32.mrf.mxu2  ;;  %v4456_v39 = vadd.f32 %v4398_v54, %v4264_v62 }
 0x59c   : > { %v3914_v2 = vadd.f32 %v3862_v60, %v7292_v49 }
 0x59d   : > { %v4746_v35 = vmax.f32 %v4714_v21, 0.0 }
 0x59e   : > { %v4583_v48 = vpop.f32.mrf.mxu1 }
 0x59f   : > { %4778 = vst.msk [vmem:[%s7373_s21 + $0x58] sm:$0xff] %vm327_vm2, %v4746_v35  ;;  %v4645_v56 = vadd.f32 %v4583_v48, %v4453_v32  ;;  %v4265_v48 = vadd.f32 %v4209_v23, %v3911_v13 }
 0x5a1   : > { %v4680_v59 = vmul.f32 %v7357_v41, %v4645_v56  ;;  %4622 = vmatmul.bf16.gmra.mxu1 %v7325_v14  ;;  %v4216_v32 = vpop.f32.mrf.mxu3  ;;  %v4408_v56 = vpop.f32.mrf.mxu0  ;;  %v4457_v18 = vadd.f32 %v4401_v30, %v4265_v48 }
 0x5a3   : > { %v4715_v63 = vadd.f32 %v7363_v46, %v4680_v59  ;;  %v3865_v59 = vpop.f32.mrf.mxu2 }
 0x5a5   : > { %v4747_v24 = vmax.f32 %v4715_v63, 0.0  ;;  %v4266_v63 = vadd.f32 %v4211_v53, %v3912_v31 }
 0x5a6   : > { %v4585_v36 = vpop.f32.mrf.mxu1 }
 0x5a7   : > { %4779 = vst.msk [vmem:[%s7373_s21 + $0x60] sm:$0xff] %vm327_vm2, %v4747_v24  ;;  %v4646_v4 = vadd.f32 %v4585_v36, %v4454_v25  ;;  %v3913_v24 = vadd.f32 %v3860_v8, %v7282_v0  ;;  %v4458_v36 = vadd.f32 %v4403_v1, %v4266_v63 }
 0x5a9   : > { %v4681_v14 = vmul.f32 %v7357_v41, %v4646_v4  ;;  %v4219_v27 = vpop.f32.mrf.mxu3  ;;  %v4411_v61 = vpop.f32.mrf.mxu0  ;;  %v4267_v4 = vadd.f32 %v4214_v58, %v3913_v24  ;;  %v3915_v58 = vadd.f32 %v3865_v59, %v7299_v17 }
 0x5ab   : > { %v4716_v28 = vadd.f32 %v7363_v46, %v4681_v14  ;;  %v3867_v20 = vpop.f32.mrf.mxu2  ;;  %v4459_v0 = vadd.f32 %v4406_v22, %v4267_v4 }
 0x5ad   : > { %v4748_v47 = vmax.f32 %v4716_v28, 0.0 }
 0x5ae   : > { %v4588_v10 = vpop.f32.mrf.mxu1 }
 0x5af   : > { %4780 = vst.msk [vmem:[%s7373_s21 + $0x68] sm:$0xff] %vm327_vm2, %v4748_v47  ;;  %v4647_v16 = vadd.f32 %v4588_v10, %v4455_v45  ;;  %v4268_v47 = vadd.f32 %v4216_v32, %v3914_v2 }
 0x5b1   : > { %v4682_v50 = vmul.f32 %v7357_v41, %v4647_v16  ;;  %4627 = vmatmul.bf16.gmra.mxu1 %v4494_v5  ;;  %v4221_v14 = vpop.f32.mrf.mxu3  ;;  %v4413_v28 = vpop.f32.mrf.mxu0  ;;  %v4460_v16 = vadd.f32 %v4408_v56, %v4268_v47 }
 0x5b3   : > { %v4717_v21 = vadd.f32 %v7363_v46, %v4682_v50  ;;  %v3870_v33 = vpop.f32.mrf.mxu2  ;;  %v4269_v50 = vadd.f32 %v4219_v27, %v3915_v58 }
 0x5b5   : > { %v4749_v3 = vmax.f32 %v4717_v21, 0.0  ;;  %v4461_v17 = vadd.f32 %v4411_v61, %v4269_v50 }
 0x5b6   : > { %v4590_v15 = vpop.f32.mrf.mxu1 }
 0x5b7   : > { %4781 = vst.msk [vmem:[%s7373_s21 + $0x70] sm:$0xff] %vm327_vm2, %v4749_v3  ;;  %v4648_v35 = vadd.f32 %v4590_v15, %v4456_v39  ;;  %v3916_v39 = vadd.f32 %v3867_v20, %v7306_v11 }
 0x5b9   : > { %v4683_v57 = vmul.f32 %v7357_v41, %v4648_v35  ;;  %v4224_v49 = vpop.f32.mrf.mxu3  ;;  %v4416_v60 = vpop.f32.mrf.mxu0 }
 0x5bb   : > { %v4718_v40 = vadd.f32 %v7363_v46, %v4683_v57  ;;  %v3872_v13 = vpop.f32.mrf.mxu2  ;;  %v4270_v57 = vadd.f32 %v4221_v14, %v3916_v39 }
 0x5bc   : > { %v3918_v24 = vadd.f32 %v3872_v13, %v7318_v42 }
 0x5bd   : > { %v4750_v37 = vmax.f32 %v4718_v40, 0.0  ;;  %v4462_v11 = vadd.f32 %v4413_v28, %v4270_v57 }
 0x5be   : > { %v4593_v9 = vpop.f32.mrf.mxu1 }
 0x5bf   : > { %4782 = vst.msk [vmem:[%s7373_s21 + $0x78] sm:$0xff] %vm327_vm2, %v4750_v37  ;;  %v4649_v54 = vadd.f32 %v4593_v9, %v4457_v18  ;;  %v3917_v37 = vadd.f32 %v3870_v33, %v7311_v34 }
 0x5c1   : > { %v4684_v25 = vmul.f32 %v7357_v41, %v4649_v54  ;;  %v4226_v48 = vpop.f32.mrf.mxu3  ;;  %v4418_v40 = vpop.f32.mrf.mxu0  ;;  %v4271_v63 = vadd.f32 %v4224_v49, %v3917_v37 }
 0x5c3   : > { %v4719_v23 = vadd.f32 %v7363_v46, %v4684_v25  ;;  %v3875_v31 = vpop.f32.mrf.mxu2 }
 0x5c4   : > { %v3919_v14 = vadd.f32 %v3875_v31, %v7323_v51 }
 0x5c5   : > { %v4751_v52 = vmax.f32 %v4719_v23, 0.0 }
 0x5c6   : > { %v4595_v29 = vpop.f32.mrf.mxu1 }
 0x5c7   : > { %4783 = vst.msk [vmem:[%s7373_s21 + $0x80] sm:$0xff] %vm327_vm2, %v4751_v52  ;;  %v4650_v30 = vadd.f32 %v4595_v29, %v4458_v36  ;;  %v4463_v36 = vadd.f32 %v4416_v60, %v4271_v63 }
 0x5c9   : > { %v4685_v19 = vmul.f32 %v7357_v41, %v4650_v30  ;;  %v4229_v27 = vpop.f32.mrf.mxu3  ;;  %v4421_v61 = vpop.f32.mrf.mxu0  ;;  %v4272_v30 = vadd.f32 %v4226_v48, %v3918_v24 }
 0x5cb   : > { %v4720_v53 = vadd.f32 %v7363_v46, %v4685_v19  ;;  %v3877_v34 = vpop.f32.mrf.mxu2  ;;  %v4464_v42 = vadd.f32 %v4418_v40, %v4272_v30 }
 0x5cd   : > { %v4752_v6 = vmax.f32 %v4720_v53, 0.0 }
 0x5ce   : > { %v4598_v8 = vpop.f32.mrf.mxu1 }
 0x5cf   : > { %4784 = vst.msk [vmem:[%s7373_s21 + $0x88] sm:$0xff] %vm327_vm2, %v4752_v6  ;;  %v4651_v1 = vadd.f32 %v4598_v8, %v4459_v0 }
 0x5d1   : > { %v4686_v45 = vmul.f32 %v7357_v41, %v4651_v1  ;;  %v4231_v53 = vpop.f32.mrf.mxu3  ;;  %v4423_v0 = vpop.f32.mrf.mxu0  ;;  %v4273_v1 = vadd.f32 %v4229_v27, %v3919_v14 }
 0x5d3   : > { %v4721_v5 = vadd.f32 %v7363_v46, %v4686_v45  ;;  %v3880_v28 = vpop.f32.mrf.mxu2  ;;  %v3920_v45 = vadd.f32 %v3877_v34, %v7330_v38  ;;  %v4465_v58 = vadd.f32 %v4421_v61, %v4273_v1 }
 0x5d5   : > { %v4753_v10 = vmax.f32 %v4721_v5, 0.0  ;;  %v4274_v49 = vadd.f32 %v4231_v53, %v3920_v45 }
 0x5d6   : > { %v4600_v62 = vpop.f32.mrf.mxu1 }
 0x5d7   : > { %4785 = vst.msk [vmem:[%s7373_s21 + $0x90] sm:$0xff] %vm327_vm2, %v4753_v10  ;;  %v4652_v22 = vadd.f32 %v4600_v62, %v4460_v16  ;;  %v4466_v38 = vadd.f32 %v4423_v0, %v4274_v49 }
 0x5d9   : > { %v4687_v21 = vmul.f32 %v7357_v41, %v4652_v22  ;;  %v4234_v51 = vpop.f32.mrf.mxu3  ;;  %v4426_v62 = vpop.f32.mrf.mxu0 }
 0x5db   : > { %v4722_v3 = vadd.f32 %v7363_v46, %v4687_v21  ;;  %v3882_v50 = vpop.f32.mrf.mxu2  ;;  %v3921_v21 = vadd.f32 %v3880_v28, %v7334_v55 }
 0x5dd   : > { %v4754_v15 = vmax.f32 %v4722_v3, 0.0 }
 0x5de   : > { %v4603_v35 = vpop.f32.mrf.mxu1 }
 0x5df   : > { %4786 = vst.msk [vmem:[%s7373_s21 + $0x98] sm:$0xff] %vm327_vm2, %v4754_v15  ;;  %v4653_v32 = vadd.f32 %v4603_v35, %v4461_v17  ;;  %v4275_v17 = vadd.f32 %v4234_v51, %v3921_v21 }
 0x5e1   : > { %v4688_v56 = vmul.f32 %v7357_v41, %v4653_v32  ;;  %v4236_v15 = vpop.f32.mrf.mxu3  ;;  %v4428_v32 = vpop.f32.mrf.mxu0  ;;  %v4467_v55 = vadd.f32 %v4426_v62, %v4275_v17 }
 0x5e3   : > { %v4723_v59 = vadd.f32 %v7363_v46, %v4688_v56  ;;  %v3885_v57 = vpop.f32.mrf.mxu2  ;;  %v3922_v56 = vadd.f32 %v3882_v50, %v7338_v43 }
 0x5e4   : > { %v3923_v63 = vadd.f32 %v3885_v57, %v7341_v12 }
 0x5e5   : > { %v4755_v18 = vmax.f32 %v4723_v59, 0.0  ;;  %v4276_v37 = vadd.f32 %v4236_v15, %v3922_v56 }
 0x5e6   : > { %v4605_v9 = vpop.f32.mrf.mxu1 }
 0x5e7   : > { %4787 = vst.msk [vmem:[%s7373_s21 + $0xa0] sm:$0xff] %vm327_vm2, %v4755_v18  ;;  %v4654_v54 = vadd.f32 %v4605_v9, %v4462_v11  ;;  %v4468_v27 = vadd.f32 %v4428_v32, %v4276_v37 }
 0x5e9   : > { %v4689_v25 = vmul.f32 %v7357_v41, %v4654_v54  ;;  %v4239_v11 = vpop.f32.mrf.mxu3  ;;  %v4431_v54 = vpop.f32.mrf.mxu0 }
 0x5ea   : > { %v4277_v61 = vadd.f32 %v4239_v11, %v3923_v63 }
 0x5eb   : > { %v4724_v23 = vadd.f32 %v7363_v46, %v4689_v25  ;;  %v3887_v43 = vpop.f32.mrf.mxu2 }
 0x5ec   : > { %v4469_v30 = vadd.f32 %v4431_v54, %v4277_v61 }
 0x5ed   : > { %v4756_v52 = vmax.f32 %v4724_v23, 0.0 }
 0x5ee   : > { %v4608_v20 = vpop.f32.mrf.mxu1 }
 0x5ef   : > { %4788 = vst.msk [vmem:[%s7373_s21 + $0xa8] sm:$0xff] %vm327_vm2, %v4756_v52  ;;  %v4655_v29 = vadd.f32 %v4608_v20, %v4463_v36  ;;  %v3924_v20 = vadd.f32 %v3887_v43, %v7345_v44 }
 0x5f1   : > { %v4690_v4 = vmul.f32 %v7357_v41, %v4655_v29  ;;  %v4241_v34 = vpop.f32.mrf.mxu3 }
 0x5f2   : > { %v4278_v14 = vadd.f32 %v4241_v34, %v3924_v20 }
 0x5f3   : > { %v4725_v19 = vadd.f32 %v7363_v46, %v4690_v4  ;;  %v3890_v53 = vpop.f32.mrf.mxu2 }
 0x5f5   : > { %v4757_v2 = vmax.f32 %v4725_v19, 0.0  ;;  %v4433_v19 = vpop.f32.mrf.mxu0 }
 0x5f6   : > { %v4610_v6 = vpop.f32.mrf.mxu1 }
 0x5f7   : > { %4789 = vst.msk [vmem:[%s7373_s21 + $0xb0] sm:$0xff] %vm327_vm2, %v4757_v2  ;;  %v4656_v8 = vadd.f32 %v4610_v6, %v4464_v42  ;;  %v3925_v6 = vadd.f32 %v3890_v53, %v7348_v7 }
 0x5f9   : > { %v4691_v33 = vmul.f32 %v7357_v41, %v4656_v8  ;;  %v4470_v8 = vadd.f32 %v4433_v19, %v4278_v14  ;;  %v4244_v44 = vpop.f32.mrf.mxu3 }
 0x5fb   : > { %v4726_v47 = vadd.f32 %v7363_v46, %v4691_v33  ;;  %v4279_v33 = vadd.f32 %v4244_v44, %v3925_v6 }
 0x5fd   : > { %v4758_v5 = vmax.f32 %v4726_v47, 0.0  ;;  %v4436_v45 = vpop.f32.mrf.mxu0 }
 0x5fe   : > { %v4613_v10 = vpop.f32.mrf.mxu1  ;;  %v4471_v7 = vadd.f32 %v4436_v45, %v4279_v33 }
 0x5ff   : > { %4790 = vst.msk [vmem:[%s7373_s21 + $0xb8] sm:$0xff] %vm327_vm2, %v4758_v5  ;;  %v4657_v16 = vadd.f32 %v4613_v10, %v4465_v58  ;;  %v3892_v5 = vpop.f32.mrf.mxu2 }
 0x600   : > { %v3926_v51 = vadd.f32 %v3892_v5, %v7352_v26 }
 0x601   : > { %v4692_v22 = vmul.f32 %v7357_v41, %v4657_v16  ;;  %v4246_v62 = vpop.f32.mrf.mxu3 }
 0x603   : > { %v4727_v60 = vadd.f32 %v7363_v46, %v4692_v22  ;;  %v4280_v22 = vadd.f32 %v4246_v62, %v3926_v51 }
 0x605   : > { %v4759_v13 = vmax.f32 %v4727_v60, 0.0  ;;  %v4438_v21 = vpop.f32.mrf.mxu0 }
 0x606   : > { %v4615_v3 = vpop.f32.mrf.mxu1 }
 0x607   : > { %4791 = vst.msk [vmem:[%s7373_s21 + $0xc0] sm:$0xff] %vm327_vm2, %v4759_v13  ;;  %v4658_v39 = vadd.f32 %v4615_v3, %v4466_v38  ;;  %v4472_v38 = vadd.f32 %v4438_v21, %v4280_v22 }
 0x609   : > { %v4693_v35 = vmul.f32 %v7357_v41, %v4658_v39 }
 0x60b   : > { %v4728_v48 = vadd.f32 %v7363_v46, %v4693_v35 }
 0x60d   : > { %v4760_v40 = vmax.f32 %v4728_v48, 0.0 }
 0x60e   : > { %v4618_v59 = vpop.f32.mrf.mxu1 }
 0x60f   : > { %4792 = vst.msk [vmem:[%s7373_s21 + $0xc8] sm:$0xff] %vm327_vm2, %v4760_v40  ;;  %v4659_v31 = vadd.f32 %v4618_v59, %v4467_v55 }
 0x611   : > { %v4694_v18 = vmul.f32 %v7357_v41, %v4659_v31 }
 0x613   : > { %v4729_v9 = vadd.f32 %v7363_v46, %v4694_v18 }
 0x615   : > { %v4761_v25 = vmax.f32 %v4729_v9, 0.0 }
 0x616   : > { %v4620_v23 = vpop.f32.mrf.mxu1 }
 0x617   : > { %4793 = vst.msk [vmem:[%s7373_s21 + $0xd0] sm:$0xff] %vm327_vm2, %v4761_v25  ;;  %v4660_v24 = vadd.f32 %v4620_v23, %v4468_v27 }
 0x619   : > { %v4695_v52 = vmul.f32 %v7357_v41, %v4660_v24 }
 0x61b   : > { %v4730_v36 = vadd.f32 %v7363_v46, %v4695_v52 }
 0x61d   : > { %v4762_v29 = vmax.f32 %v4730_v36, 0.0 }
 0x61e   : > { %v4623_v4 = vpop.f32.mrf.mxu1 }
 0x61f   : > { %4794 = vst.msk [vmem:[%s7373_s21 + $0xd8] sm:$0xff] %vm327_vm2, %v4762_v29  ;;  %v4661_v12 = vadd.f32 %v4623_v4, %v4469_v30 }
 0x621   : > { %v4696_v2 = vmul.f32 %v7357_v41, %v4661_v12 }
 0x623   : > { %v4731_v42 = vadd.f32 %v7363_v46, %v4696_v2 }
 0x625   : > { %v4763_v0 = vmax.f32 %v4731_v42, 0.0 }
 0x626   : > { %v4625_v28 = vpop.f32.mrf.mxu1 }
 0x627   : > { %4795 = vst.msk [vmem:[%s7373_s21 + $0xe0] sm:$0xff] %vm327_vm2, %v4763_v0  ;;  %v4662_v1 = vadd.f32 %v4625_v28, %v4470_v8 }
 0x629   : > { %v4697_v47 = vmul.f32 %v7357_v41, %v4662_v1 }
 0x62b   : > { %v4732_v58 = vadd.f32 %v7363_v46, %v4697_v47 }
 0x62d   : > { %v4764_v10 = vmax.f32 %v4732_v58, 0.0 }
 0x62e   : > { %v4628_v16 = vpop.f32.mrf.mxu1 }
 0x62f   : > { %4796 = vst.msk [vmem:[%s7373_s21 + $0xe8] sm:$0xff] %vm327_vm2, %v4764_v10  ;;  %v4663_v49 = vadd.f32 %v4628_v16, %v4471_v7 }
 0x631   : > { %v4698_v50 = vmul.f32 %v7357_v41, %v4663_v49 }
 0x633   : > { %v4733_v60 = vadd.f32 %v7363_v46, %v4698_v50 }
 0x635   : > { %v4765_v13 = vmax.f32 %v4733_v60, 0.0 }
 0x636   : > { %v4630_v3 = vpop.f32.mrf.mxu1 }
 0x637   : > { %4797 = vst.msk [vmem:[%s7373_s21 + $0xf0] sm:$0xff] %vm327_vm2, %v4765_v13  ;;  %v4664_v26 = vadd.f32 %v4630_v3, %v4472_v38 }
 0x639   : > { %v4699_v39 = vmul.f32 %v7357_v41, %v4664_v26 }
 0x63b   : > { %v4734_v15 = vadd.f32 %v7363_v46, %v4699_v39 }
 0x63d   : > { %v4766_v17 = vmax.f32 %v4734_v15, 0.0 }
 0x63f   : > { %4798 = vst.msk [vmem:[%s7373_s21 + $0xf8] sm:$0xff] %vm327_vm2, %v4766_v17 }
 0x640 PF: > { %s18_s27 = sadd.s32 1, %s5548_s27  }
 0x641   : > { %p15_p4 = scmp.ge.s32.totalorder %s18_s27, 4  }
 0x643   :  { %17 = sbr.rel (!%p15_p4) target bundleno = 1 (0x1), region = 105 }

</bundles_post_ra>
